<compile_context>
chip_gen: v7x
topology: tpu7x:2x2x1
jax: 0.10.0
libtpu: 0.0.40
codegen_flags: <defaults>
</compile_context>

<pallas_src>
import math
from functools import partial

import numpy as np
import jax
import jax.numpy as jnp
from jax.experimental import pallas as pl
from jax.experimental.pallas import tpu as pltpu

# stand-in for the external `cfg` used in GCN.forward
CFG = dict(TRAIN_POSITIVES_PER_QUERY=1, TRAIN_NEGATIVES_PER_QUERY=1)


# ----------------------------------------------------------------------------
# tiling helper
# ----------------------------------------------------------------------------

def _pick_tile(M, target, align=128):
    """Largest multiple of `align` <= target that divides M, else full M."""
    if M <= target:
        return M
    t = (target // align) * align
    while t >= align:
        if M % t == 0:
            return t
        t -= align
    return M


# ----------------------------------------------------------------------------
# Pallas kernels
# ----------------------------------------------------------------------------

def _conv_kernel(*refs, n_in, act, slope):
    """1x1 conv tile over n_in inputs: y = sum_i W_i @ x_i + b, opt activation."""
    x_refs = refs[:n_in]
    w_refs = refs[n_in:2 * n_in]
    b_ref = refs[2 * n_in]
    o_ref = refs[2 * n_in + 1]
    y = jnp.dot(w_refs[0][...], x_refs[0][0], preferred_element_type=jnp.float32)
    for xr, wr in zip(x_refs[1:], w_refs[1:]):
        y = y + jnp.dot(wr[...], xr[0], preferred_element_type=jnp.float32)
    y = y + b_ref[...]
    if act == "relu":
        y = jnp.maximum(y, 0.0)
    elif act == "leaky":
        y = jnp.where(y >= 0.0, y, slope * y)
    o_ref[0] = y.astype(o_ref.dtype)


def _conv_stats_kernel(*refs, n_in):
    """1x1 conv tile (n_in inputs) + per-channel sum / sumsq (for InstanceNorm)."""
    x_refs = refs[:n_in]
    w_refs = refs[n_in:2 * n_in]
    b_ref = refs[2 * n_in]
    o_ref = refs[2 * n_in + 1]
    s1_ref = refs[2 * n_in + 2]
    s2_ref = refs[2 * n_in + 3]

    j = pl.program_id(1)

    @pl.when(j == 0)
    def _():
        s1_ref[...] = jnp.zeros_like(s1_ref)
        s2_ref[...] = jnp.zeros_like(s2_ref)

    y = jnp.dot(w_refs[0][...], x_refs[0][0], preferred_element_type=jnp.float32)
    for xr, wr in zip(x_refs[1:], w_refs[1:]):
        y = y + jnp.dot(wr[...], xr[0], preferred_element_type=jnp.float32)
    y = y + b_ref[...]
    o_ref[0] = y.astype(o_ref.dtype)
    s1_ref[0] += jnp.sum(y, axis=-1, keepdims=True)
    s2_ref[0] += jnp.sum(y * y, axis=-1, keepdims=True)


def _norm_act_kernel(y_ref, s1_ref, s2_ref, o_ref, *, inv_n, eps, act, slope):
    """InstanceNorm (from precomputed sums) + activation, tiled over M."""
    y = y_ref[0]                      # [Cout, TM]
    mean = s1_ref[0] * inv_n          # [Cout, 1]
    var = s2_ref[0] * inv_n - mean * mean
    r = jax.lax.rsqrt(jnp.maximum(var, 0.0) + eps)
    z = (y - mean) * r
    if act == "relu":
        z = jnp.maximum(z, 0.0)
    elif act == "leaky":
        z = jnp.where(z >= 0.0, z, slope * z)
    o_ref[0] = z.astype(o_ref.dtype)


def _edge_stats_kernel(a_ref, dg_ref, s1_ref, s2_ref, *, k):
    """Per-channel sum / sumsq of y[c,j,n] = a[c,n] + dg[j,c,n] (y never stored)."""
    t = pl.program_id(1)

    @pl.when(t == 0)
    def _():
        s1_ref[...] = jnp.zeros_like(s1_ref)
        s2_ref[...] = jnp.zeros_like(s2_ref)

    a = a_ref[0]                      # [Cout, TN] lane-dense
    ps1 = None
    ps2 = None
    for j in range(k):                # k is small and static -> unrolled VPU work
        yj = a + dg_ref[0, j]         # contiguous [Cout, TN] slab
        sa = jnp.sum(yj, axis=-1, keepdims=True)
        sb = jnp.sum(yj * yj, axis=-1, keepdims=True)
        ps1 = sa if ps1 is None else ps1 + sa
        ps2 = sb if ps2 is None else ps2 + sb
    s1_ref[0] += ps1
    s2_ref[0] += ps2


def _edge_norm_lrelu_max_kernel(a_ref, dg_ref, s1_ref, s2_ref, o_ref, *,
                                k, inv_n, eps, slope):
    """InstanceNorm2d + LeakyReLU + max over k of y = a + dg, fused (y never stored)."""
    a = a_ref[0]                      # [Cout, TN]
    mean = s1_ref[0] * inv_n          # [Cout, 1]
    var = s2_ref[0] * inv_n - mean * mean
    r = jax.lax.rsqrt(jnp.maximum(var, 0.0) + eps)
    out = None
    for j in range(k):
        z = (a + dg_ref[0, j] - mean) * r           # [Cout, TN]
        z = jnp.where(z >= 0.0, z, slope * z)
        out = z if out is None else jnp.maximum(out, z)
    o_ref[0] = out.astype(o_ref.dtype)


def _attn_kernel(q_ref, k_ref, v_ref, o_ref, *, scale):
    """One (batch, head, q-tile): softmax(q^T k / sqrt(d)) @ v^T, lane-dense."""
    q = q_ref[0, 0] * scale           # [dim, TQ]   (scale on N*d elems, not N*M)
    kk = k_ref[0, 0]                  # [dim, M]
    v = v_ref[0, 0]                   # [dim, M]
    s = jax.lax.dot_general(q, kk, (((0,), (0,)), ((), ())),
                            preferred_element_type=jnp.float32)   # [TQ, M]
    m = jnp.max(s, axis=-1, keepdims=True)
    e = jnp.exp(s - m)
    denom = jnp.sum(e, axis=-1, keepdims=True)
    p = e * pl.reciprocal(denom, approx=True)                     # EUP reciprocal
    o = jax.lax.dot_general(v, p, (((1,), (1,)), ((), ())),
                            preferred_element_type=jnp.float32)   # [dim, TQ]
    o_ref[0, 0] = o.astype(o_ref.dtype)


def _sqdist_kernel(pq_ref, pk_ref, o_ref):
    """Squared pairwise distances for one (batch, query-row tile), lane-dense over N."""
    pq = pq_ref[0]                    # [TQ, 3]
    pk = pk_ref[0]                    # [3, N]
    g = jnp.dot(pq, pk, preferred_element_type=jnp.float32)       # [TQ, N]
    sq_q = jnp.sum(pq * pq, axis=-1, keepdims=True)               # [TQ, 1]
    sq_k = jnp.sum(pk * pk, axis=0, keepdims=True)                # [1, N]
    d = sq_q - 2.0 * g + sq_k
    o_ref[0] = jnp.maximum(d, 1e-12).astype(o_ref.dtype)


# ----------------------------------------------------------------------------
# Pallas wrappers
# ----------------------------------------------------------------------------

def _as_list(x):
    return list(x) if isinstance(x, (list, tuple)) else [x]


def _split_weight(w, cins):
    offs = np.cumsum([0] + list(cins))
    return [w[:, offs[i]:offs[i + 1]] for i in range(len(cins))]


def conv1x1(x, w, b=None, *, act=None, slope=0.2, tile=512):
    """x: [B, Cin, M] (or list of such) , w: [Cout, sum(Cin)] -> [B, Cout, M]."""
    xs = _as_list(x)
    B, _, M = xs[0].shape
    cins = [xi.shape[1] for xi in xs]
    Cout = w.shape[0]
    w = w.astype(jnp.float32)
    ws = _split_weight(w, cins)
    if b is None:
        b = jnp.zeros((Cout,), jnp.float32)
    b2 = b.reshape(Cout, 1).astype(jnp.float32)
    TM = _pick_tile(M, tile)
    nm = M // TM
    n = len(xs)
    in_specs = (
        [pl.BlockSpec((1, c, TM), lambda i, j: (i, 0, j)) for c in cins]
        + [pl.BlockSpec((Cout, c), lambda i, j: (0, 0)) for c in cins]
        + [pl.BlockSpec((Cout, 1), lambda i, j: (0, 0))]
    )
    kernel = partial(_conv_kernel, n_in=n, act=act, slope=slope)
    return pl.pallas_call(
        kernel,
        out_shape=jax.ShapeDtypeStruct((B, Cout, M), jnp.float32),
        grid=(B, nm),
        in_specs=in_specs,
        out_specs=pl.BlockSpec((1, Cout, TM), lambda i, j: (i, 0, j)),
        compiler_params=pltpu.CompilerParams(
            dimension_semantics=("parallel", "parallel")),
    )(*[xi.astype(jnp.float32) for xi in xs], *ws, b2)


def conv1x1_in_act(x, w, b=None, *, act="relu", eps=1e-5, slope=0.2, tile=512):
    """1x1 conv (multi-input) + InstanceNorm + activation, two tiled passes."""
    xs = _as_list(x)
    B, _, M = xs[0].shape
    cins = [xi.shape[1] for xi in xs]
    Cout = w.shape[0]
    w = w.astype(jnp.float32)
    ws = _split_weight(w, cins)
    if b is None:
        b = jnp.zeros((Cout,), jnp.float32)
    b2 = b.reshape(Cout, 1).astype(jnp.float32)
    TM = _pick_tile(M, tile)
    nm = M // TM
    n = len(xs)
    in_specs = (
        [pl.BlockSpec((1, c, TM), lambda i, j: (i, 0, j)) for c in cins]
        + [pl.BlockSpec((Cout, c), lambda i, j: (0, 0)) for c in cins]
        + [pl.BlockSpec((Cout, 1), lambda i, j: (0, 0))]
    )
    y, s1, s2 = pl.pallas_call(
        partial(_conv_stats_kernel, n_in=n),
        out_shape=(jax.ShapeDtypeStruct((B, Cout, M), jnp.float32),
                   jax.ShapeDtypeStruct((B, Cout, 1), jnp.float32),
                   jax.ShapeDtypeStruct((B, Cout, 1), jnp.float32)),
        grid=(B, nm),
        in_specs=in_specs,
        out_specs=(pl.BlockSpec((1, Cout, TM), lambda i, j: (i, 0, j)),
                   pl.BlockSpec((1, Cout, 1), lambda i, j: (i, 0, 0)),
                   pl.BlockSpec((1, Cout, 1), lambda i, j: (i, 0, 0))),
        compiler_params=pltpu.CompilerParams(
            dimension_semantics=("parallel", "arbitrary")),
    )(*[xi.astype(jnp.float32) for xi in xs], *ws, b2)

    kernel = partial(_norm_act_kernel, inv_n=1.0 / M, eps=eps, act=act, slope=slope)
    return pl.pallas_call(
        kernel,
        out_shape=jax.ShapeDtypeStruct((B, Cout, M), jnp.float32),
        grid=(B, nm),
        in_specs=[
            pl.BlockSpec((1, Cout, TM), lambda i, j: (i, 0, j)),
            pl.BlockSpec((1, Cout, 1), lambda i, j: (i, 0, 0)),
            pl.BlockSpec((1, Cout, 1), lambda i, j: (i, 0, 0)),
        ],
        out_specs=pl.BlockSpec((1, Cout, TM), lambda i, j: (i, 0, j)),
        compiler_params=pltpu.CompilerParams(
            dimension_semantics=("parallel", "parallel")),
    )(y, s1, s2)


def mha_attention_hb(q, k, v, num_heads, *, tile=128):
    """Multi-head attention; q/k/v channels already in head-blocked order.

    q: [B, D, N], k/v: [B, D, M] -> [B, D, N] (head-blocked channel order)."""
    B, D, N = q.shape
    M = k.shape[2]
    dim = D // num_heads
    qh = q.reshape(B, num_heads, dim, N)          # free view (contiguous heads)
    kh = k.reshape(B, num_heads, dim, M)
    vh = v.reshape(B, num_heads, dim, M)
    TQ = _pick_tile(N, tile)
    nq = N // TQ
    scale = 1.0 / math.sqrt(dim)
    out = pl.pallas_call(
        partial(_attn_kernel, scale=scale),
        out_shape=jax.ShapeDtypeStruct((B, num_heads, dim, N), jnp.float32),
        grid=(B, num_heads, nq),
        in_specs=[
            pl.BlockSpec((1, 1, dim, TQ), lambda b, h, t: (b, h, 0, t)),
            pl.BlockSpec((1, 1, dim, M), lambda b, h, t: (b, h, 0, 0)),
            pl.BlockSpec((1, 1, dim, M), lambda b, h, t: (b, h, 0, 0)),
        ],
        out_specs=pl.BlockSpec((1, 1, dim, TQ), lambda b, h, t: (b, h, 0, t)),
        compiler_params=pltpu.CompilerParams(
            dimension_semantics=("parallel", "parallel", "parallel")),
    )(qh.astype(jnp.float32), kh.astype(jnp.float32), vh.astype(jnp.float32))
    return out.reshape(B, D, N)


def square_distance_self(coords, *, tile=128):
    """coords: [B, 3, N] -> clamped squared distances [B, N, N] (row-tiled)."""
    B, C3, N = coords.shape
    pts_nt = jnp.transpose(coords, (0, 2, 1))     # [B, N, 3]
    TQ = _pick_tile(N, tile)
    nq = N // TQ
    return pl.pallas_call(
        _sqdist_kernel,
        out_shape=jax.ShapeDtypeStruct((B, N, N), jnp.float32),
        grid=(B, nq),
        in_specs=[
            pl.BlockSpec((1, TQ, C3), lambda b, t: (b, t, 0)),
            pl.BlockSpec((1, C3, N), lambda b, t: (b, 0, 0)),
        ],
        out_specs=pl.BlockSpec((1, TQ, N), lambda b, t: (b, t, 0)),
        compiler_params=pltpu.CompilerParams(
            dimension_semantics=("parallel", "parallel")),
    )(pts_nt.astype(jnp.float32), coords.astype(jnp.float32))


# ----------------------------------------------------------------------------
# Module forward passes (glue in JAX, compute in the kernels above)
# ----------------------------------------------------------------------------

def knn_indices(coords, k):
    """coords: [B, 3, N] -> neighbour indices [B, N, k] (self index dropped)."""
    dist = square_distance_self(coords)                       # [B, N, N]
    # TODO(synk): top-k neighbour selection has no clean Pallas sort primitive.
    _, idx = jax.lax.top_k(-dist, k + 1)                      # ascending distance
    return idx[:, :, 1:]                                      # drop self


def edge_conv_in_lrelu_max(feats, idx, w, *, eps=1e-5, slope=0.2, tile=256):
    """Fused get_graph_feature + Conv2d-1x1 (no bias) + InstanceNorm2d +
    LeakyReLU + max over k, via the weight-split identity
        W @ [x ; x_j - x] = (W_c - W_d) @ x + W_d @ x_j.
    The [B, 2C, N, k] graph-feature slab and the [B, Cout, k, N] conv output
    are never materialized in HBM.
    feats: [B, Cf, N], idx: [B, N, k], w: [Cout, 2*Cf] -> [B, Cout, N]."""
    B, Cf, N = feats.shape
    K = idx.shape[-1]
    Cout = w.shape[0]
    w = w.astype(jnp.float32)
    w_c, w_d = w[:, :Cf], w[:, Cf:]
    w_stack = jnp.concatenate([w_c - w_d, w_d], axis=0)       # [2*Cout, Cf]
    ad = conv1x1(feats, w_stack)                              # one Pallas matmul
    a, d = ad[:, :Cout], ad[:, Cout:]                         # [B, Cout, N] each
    idx_t = jnp.transpose(idx, (0, 2, 1))                     # [B, K, N]
    # gather neighbour features with N on the last (lane) axis: [B, K, Cout, N]
    gather_one = jax.vmap(lambda db, ij: db[:, ij], in_axes=(None, 0))
    dg = jax.vmap(gather_one, in_axes=(0, 0))(d, idx_t)       # [B, K, Cout, N]

    TN = _pick_tile(N, tile)
    nt = N // TN
    s1, s2 = pl.pallas_call(
        partial(_edge_stats_kernel, k=K),
        out_shape=(jax.ShapeDtypeStruct((B, Cout, 1), jnp.float32),
                   jax.ShapeDtypeStruct((B, Cout, 1), jnp.float32)),
        grid=(B, nt),
        in_specs=[pl.BlockSpec((1, Cout, TN), lambda b, t: (b, 0, t)),
                  pl.BlockSpec((1, K, Cout, TN), lambda b, t: (b, 0, 0, t))],
        out_specs=(pl.BlockSpec((1, Cout, 1), lambda b, t: (b, 0, 0)),
                   pl.BlockSpec((1, Cout, 1), lambda b, t: (b, 0, 0))),
        compiler_params=pltpu.CompilerParams(
            dimension_semantics=("parallel", "arbitrary")),
    )(a, dg)

    kernel = partial(_edge_norm_lrelu_max_kernel, k=K, inv_n=1.0 / (K * N),
                     eps=eps, slope=slope)
    return pl.pallas_call(
        kernel,
        out_shape=jax.ShapeDtypeStruct((B, Cout, N), jnp.float32),
        grid=(B, nt),
        in_specs=[pl.BlockSpec((1, Cout, TN), lambda b, t: (b, 0, t)),
                  pl.BlockSpec((1, K, Cout, TN), lambda b, t: (b, 0, 0, t)),
                  pl.BlockSpec((1, Cout, 1), lambda b, t: (b, 0, 0)),
                  pl.BlockSpec((1, Cout, 1), lambda b, t: (b, 0, 0))],
        out_specs=pl.BlockSpec((1, Cout, TN), lambda b, t: (b, 0, t)),
        compiler_params=pltpu.CompilerParams(
            dimension_semantics=("parallel", "parallel")),
    )(a, dg, s1, s2)


def self_attention_layer(p, coords, feats, k):
    """SelfAttention.forward — coords: [B, 3, N], feats: [B, C, N] -> [B, C, N]."""
    idx = knn_indices(coords, k)          # coords unchanged -> compute knn once
    x0 = feats
    x1 = edge_conv_in_lrelu_max(x0, idx, p["w1"])             # conv1 + in1 + lrelu + max
    x2 = edge_conv_in_lrelu_max(x1, idx, p["w2"])             # conv2 + in2 + lrelu + max
    # conv3 + in3 + lrelu; concat folded into the conv (weight-column split)
    return conv1x1_in_act([x0, x1, x2], p["w3"], act="leaky")


def attentional_propagation(p, x, source):
    """AttentionalPropagation.forward — x: [B, C, N], source: [B, C, M]."""
    D = x.shape[1]
    H = p["num_heads"]
    dim = D // H
    # head-blocked position h*dim + d  <-  PyTorch interleaved channel d*H + h.
    perm = jnp.arange(D).reshape(dim, H).T.reshape(-1)
    wq, bq = p["wq"][perm], p["bq"][perm]     # projections emit head-blocked order
    wk, bk = p["wk"][perm], p["bk"][perm]
    wv, bv = p["wv"][perm], p["bv"][perm]
    wm = p["wm"][:, perm]                     # merge consumes head-blocked order

    q = conv1x1(x, wq, bq)
    kv = conv1x1(source, jnp.concatenate([wk, wv], axis=0),
                 jnp.concatenate([bk, bv], axis=0))           # k & v in one matmul
    k_, v_ = kv[:, :D], kv[:, D:]
    msg = mha_attention_hb(q, k_, v_, H)
    msg = conv1x1(msg, wm, p["bm"])                           # merge conv
    # MLP first conv + InstanceNorm + ReLU; concat([x, msg]) folded into the conv
    h = conv1x1_in_act([x, msg], p["mlp_w1"], p["mlp_b1"], act="relu")
    return conv1x1(h, p["mlp_w2"], p["mlp_b2"])               # last conv (bias init 0)


def gcn_forward(params, names, coords, descs, knn):
    """GCN.forward — coords: [B, N, 3], descs: [B, N, C] -> [B, N, C]."""
    B = coords.shape[0]
    if B >= 4:
        sizes = [1, CFG["TRAIN_POSITIVES_PER_QUERY"], CFG["TRAIN_NEGATIVES_PER_QUERY"], 1]
    elif B == 3:
        sizes = [1, CFG["TRAIN_POSITIVES_PER_QUERY"], CFG["TRAIN_NEGATIVES_PER_QUERY"]]
    elif B == 2:
        sizes = [1, CFG["TRAIN_POSITIVES_PER_QUERY"]]
    elif B == 1:
        sizes = [1]
    else:
        return descs

    coords_t = jnp.transpose(coords, (0, 2, 1))        # [B, 3, N]
    descs_t = jnp.transpose(descs, (0, 2, 1))          # [B, C, N]
    offs = np.cumsum([0] + sizes)
    pcds = [coords_t[offs[i]:offs[i + 1]] for i in range(len(sizes))]
    xs = [descs_t[offs[i]:offs[i + 1]] for i in range(len(sizes))]

    for p, name in zip(params, names):
        if name == "cross":
            if len(xs) == 1:
                xs[0] = xs[0] + attentional_propagation(p, xs[0], xs[0])
            else:
                xs[0] = xs[0] + attentional_propagation(p, xs[0], xs[1])
                for i in range(1, len(xs)):   # later splits see the updated query
                    xs[i] = xs[i] + attentional_propagation(p, xs[i], xs[0])
        elif name == "self":
            for i in range(len(xs)):
                xs[i] = self_attention_layer(p, pcds[i], xs[i], knn)

    x_gcn = jnp.concatenate(xs, axis=0)                # [B, C, N]
    return jnp.transpose(x_gcn, (0, 2, 1))             # [B, N, C]


# ----------------------------------------------------------------------------
# Deterministic parameter init (shapes from GCN.__init__)
# ----------------------------------------------------------------------------

def init_gcn_params(key, num_head, feature_dim, layer_names):
    C = feature_dim
    params = []
    for name in layer_names:
        key, k0, k1, k2, k3, k4 = jax.random.split(key, 6)
        if name == "cross":
            # MultiHeadedAttention: proj_q/k/v are deepcopies of `merge` at init.
            wm = (jax.random.normal(k0, (C, C)) / math.sqrt(C)).astype(jnp.float32)
            bm = (jax.random.normal(k1, (C,)) * 0.01).astype(jnp.float32)
            p = dict(
                num_heads=num_head,
                wq=wm, bq=bm, wk=wm, bk=bm, wv=wm, bv=bm, wm=wm, bm=bm,
                mlp_w1=(jax.random.normal(k2, (2 * C, 2 * C)) / math.sqrt(2 * C)).astype(jnp.float32),
                mlp_b1=(jax.random.normal(k3, (2 * C,)) * 0.01).astype(jnp.float32),
                mlp_w2=(jax.random.normal(k4, (C, 2 * C)) / math.sqrt(2 * C)).astype(jnp.float32),
                mlp_b2=jnp.zeros((C,), jnp.float32),   # nn.init.constant_(mlp[-1].bias, 0)
            )
        else:  # 'self' — all convs bias=False
            p = dict(
                w1=(jax.random.normal(k0, (C, 2 * C)) / math.sqrt(2 * C)).astype(jnp.float32),
                w2=(jax.random.normal(k1, (2 * C, 2 * C)) / math.sqrt(2 * C)).astype(jnp.float32),
                w3=(jax.random.normal(k2, (C, 4 * C)) / math.sqrt(4 * C)).astype(jnp.float32),
            )
        params.append(p)
    return params


# ----------------------------------------------------------------------------

if __name__ == "__main__":
    key = jax.random.PRNGKey(0)
    B, N, C = 2, 32, 16        # batch=2 -> (query, positive) split path
    num_head, knn = 2, 6       # head dim = 8
    layer_names = ["self", "cross"]

    k_coords, k_descs, k_params = jax.random.split(key, 3)
    coords = jax.random.normal(k_coords, (B, N, 3), jnp.float32)
    descs = jax.random.normal(k_descs, (B, N, C), jnp.float32)
    params = init_gcn_params(k_params, num_head, C, layer_names)

    fwd = jax.jit(lambda c, d: gcn_forward(params, layer_names, c, d, knn))
    out = jax.block_until_ready(fwd(coords, descs))

    assert out.shape == (B, N, C), out.shape
    assert bool(jnp.all(jnp.isfinite(out)))
    print("KERNEL_OK")
</pallas_src>

<mosaic_0001>
module attributes {stable_mosaic.version = 11 : i64} {
  func.func @_conv_kernel(%arg0: i32, %arg1: i32, %arg2: memref<1x16x32xf32, #tpu.memory_space<vmem>>, %arg3: memref<32x16xf32, #tpu.memory_space<vmem>>, %arg4: memref<32x1xf32, #tpu.memory_space<vmem>>, %arg5: memref<1x32x32xf32, #tpu.memory_space<vmem>>) attributes {dimension_semantics = [#tpu.dimension_semantics<parallel>, #tpu.dimension_semantics<parallel>], iteration_bounds = array<i64: 1, 1>, scalar_prefetch = 0 : i64, scratch_operands = 0 : i64, tpu.core_type = #tpu.core_type<tc>, window_params = [{transform_indices = @transform_0, window_bounds = array<i64: 1, 16, 32>}, {pipeline_mode = #tpu.pipeline_mode<synchronous>, transform_indices = @transform_1, window_bounds = array<i64: 32, 16>}, {pipeline_mode = #tpu.pipeline_mode<synchronous>, transform_indices = @transform_2, window_bounds = array<i64: 32, 1>}, {transform_indices = @transform_3, window_bounds = array<i64: 1, 32, 32>}]} {
    %c0 = arith.constant 0 : index
    %c0_0 = arith.constant 0 : index
    %0 = vector.load %arg3[%c0, %c0_0] : memref<32x16xf32, #tpu.memory_space<vmem>>, vector<32x16xf32>
    %c0_1 = arith.constant 0 : index
    %c0_2 = arith.constant 0 : index
    %c0_3 = arith.constant 0 : index
    %1 = vector.load %arg2[%c0_1, %c0_2, %c0_3] : memref<1x16x32xf32, #tpu.memory_space<vmem>>, vector<1x16x32xf32>
    %2 = vector.shape_cast %1 : vector<1x16x32xf32> to vector<16x32xf32>
    %cst = arith.constant dense<0.000000e+00> : vector<32x32xf32>
    %3 = tpu.matmul %0, %2, %cst {dimension_numbers = #tpu.dot_dimension_numbers<[1], [0], [0], [1], [0, 0, 1, 1], [], []>} : vector<32x16xf32>, vector<16x32xf32>, vector<32x32xf32> -> vector<32x32xf32>
    %c0_4 = arith.constant 0 : index
    %c0_5 = arith.constant 0 : index
    %4 = vector.load %arg4[%c0_4, %c0_5] : memref<32x1xf32, #tpu.memory_space<vmem>>, vector<32x1xf32>
    %5 = vector.broadcast %4 : vector<32x1xf32> to vector<32x32xf32>
    %6 = arith.addf %3, %5 : vector<32x32xf32>
    %c0_6 = arith.constant 0 : index
    %c0_7 = arith.constant 0 : index
    %c0_8 = arith.constant 0 : index
    %7 = vector.load %arg5[%c0_6, %c0_7, %c0_8] : memref<1x32x32xf32, #tpu.memory_space<vmem>>, vector<1x32x32xf32>
    %8 = vector.shape_cast %7 : vector<1x32x32xf32> to vector<32x32xf32>
    %9 = vector.shape_cast %6 : vector<32x32xf32> to vector<1x32x32xf32>
    tpu.vector_store %arg5[%c0_6, %c0_7, %c0_8], %9 {strides = array<i32>} : memref<1x32x32xf32, #tpu.memory_space<vmem>>, vector<1x32x32xf32>,
    return
  }
  func.func @transform_0(%arg0: i32, %arg1: i32) -> (i32, i32, i32) {
    %c0_i32 = arith.constant 0 : i32
    %c0_i32_0 = arith.constant 0 : i32
    return %arg0, %c0_i32, %arg1 : i32, i32, i32
  }
  func.func @transform_1(%arg0: i32, %arg1: i32) -> (i32, i32) {
    %c0_i32 = arith.constant 0 : i32
    %c0_i32_0 = arith.constant 0 : i32
    %c0_i32_1 = arith.constant 0 : i32
    return %c0_i32, %c0_i32_0 : i32, i32
  }
  func.func @transform_2(%arg0: i32, %arg1: i32) -> (i32, i32) {
    %c0_i32 = arith.constant 0 : i32
    %c0_i32_0 = arith.constant 0 : i32
    %c0_i32_1 = arith.constant 0 : i32
    return %c0_i32, %c0_i32_0 : i32, i32
  }
  func.func @transform_3(%arg0: i32, %arg1: i32) -> (i32, i32, i32) {
    %c0_i32 = arith.constant 0 : i32
    %c0_i32_0 = arith.constant 0 : i32
    return %arg0, %c0_i32, %arg1 : i32, i32, i32
  }
}

module attributes {stable_mosaic.version = 11 : i64} {
  func.func @_sqdist_kernel(%arg0: i32, %arg1: i32, %arg2: memref<1x32x3xf32, #tpu.memory_space<vmem>>, %arg3: memref<1x3x32xf32, #tpu.memory_space<vmem>>, %arg4: memref<1x32x32xf32, #tpu.memory_space<vmem>>) attributes {dimension_semantics = [#tpu.dimension_semantics<parallel>, #tpu.dimension_semantics<parallel>], iteration_bounds = array<i64: 1, 1>, scalar_prefetch = 0 : i64, scratch_operands = 0 : i64, tpu.core_type = #tpu.core_type<tc>, window_params = [{transform_indices = @transform_0, window_bounds = array<i64: 1, 32, 3>}, {transform_indices = @transform_1, window_bounds = array<i64: 1, 3, 32>}, {transform_indices = @transform_2, window_bounds = array<i64: 1, 32, 32>}]} {
    %c0 = arith.constant 0 : index
    %c0_0 = arith.constant 0 : index
    %c0_1 = arith.constant 0 : index
    %0 = vector.load %arg2[%c0, %c0_0, %c0_1] : memref<1x32x3xf32, #tpu.memory_space<vmem>>, vector<1x32x3xf32>
    %1 = vector.shape_cast %0 : vector<1x32x3xf32> to vector<32x3xf32>
    %c0_2 = arith.constant 0 : index
    %c0_3 = arith.constant 0 : index
    %c0_4 = arith.constant 0 : index
    %2 = vector.load %arg3[%c0_2, %c0_3, %c0_4] : memref<1x3x32xf32, #tpu.memory_space<vmem>>, vector<1x3x32xf32>
    %3 = vector.shape_cast %2 : vector<1x3x32xf32> to vector<3x32xf32>
    %cst = arith.constant dense<0.000000e+00> : vector<32x32xf32>
    %4 = tpu.matmul %1, %3, %cst {dimension_numbers = #tpu.dot_dimension_numbers<[1], [0], [0], [1], [0, 0, 1, 1], [], []>} : vector<32x3xf32>, vector<3x32xf32>, vector<32x32xf32> -> vector<32x32xf32>
    %5 = arith.mulf %1, %1 : vector<32x3xf32>
    %cst_5 = arith.constant dense<0.000000e+00> : vector<32xf32>
    %6 = vector.multi_reduction <add>, %5, %cst_5 [1] : vector<32x3xf32> to vector<32xf32>
    %7 = vector.shape_cast %6 : vector<32xf32> to vector<32x1xf32>
    %8 = arith.mulf %3, %3 : vector<3x32xf32>
    %cst_6 = arith.constant dense<0.000000e+00> : vector<32xf32>
    %9 = vector.multi_reduction <add>, %8, %cst_6 [0] : vector<3x32xf32> to vector<32xf32>
    %10 = vector.shape_cast %9 : vector<32xf32> to vector<1x32xf32>
    %cst_7 = arith.constant 2.000000e+00 : f32
    %11 = vector.broadcast %cst_7 : f32 to vector<32x32xf32>
    %12 = arith.mulf %11, %4 : vector<32x32xf32>
    %13 = vector.broadcast %7 : vector<32x1xf32> to vector<32x32xf32>
    %14 = arith.subf %13, %12 : vector<32x32xf32>
    %15 = vector.broadcast %10 : vector<1x32xf32> to vector<32x32xf32>
    %16 = arith.addf %14, %15 : vector<32x32xf32>
    %cst_8 = arith.constant 9.99999996E-13 : f32
    %17 = vector.broadcast %cst_8 : f32 to vector<32x32xf32>
    %18 = arith.maximumf %16, %17 : vector<32x32xf32>
    %c0_9 = arith.constant 0 : index
    %c0_10 = arith.constant 0 : index
    %c0_11 = arith.constant 0 : index
    %19 = vector.load %arg4[%c0_9, %c0_10, %c0_11] : memref<1x32x32xf32, #tpu.memory_space<vmem>>, vector<1x32x32xf32>
    %20 = vector.shape_cast %19 : vector<1x32x32xf32> to vector<32x32xf32>
    %21 = vector.shape_cast %18 : vector<32x32xf32> to vector<1x32x32xf32>
    tpu.vector_store %arg4[%c0_9, %c0_10, %c0_11], %21 {strides = array<i32>} : memref<1x32x32xf32, #tpu.memory_space<vmem>>, vector<1x32x32xf32>,
    return
  }
  func.func @transform_0(%arg0: i32, %arg1: i32) -> (i32, i32, i32) {
    %c0_i32 = arith.constant 0 : i32
    %c0_i32_0 = arith.constant 0 : i32
    return %arg0, %arg1, %c0_i32 : i32, i32, i32
  }
  func.func @transform_1(%arg0: i32, %arg1: i32) -> (i32, i32, i32) {
    %c0_i32 = arith.constant 0 : i32
    %c0_i32_0 = arith.constant 0 : i32
    %c0_i32_1 = arith.constant 0 : i32
    return %arg0, %c0_i32, %c0_i32_0 : i32, i32, i32
  }
  func.func @transform_2(%arg0: i32, %arg1: i32) -> (i32, i32, i32) {
    %c0_i32 = arith.constant 0 : i32
    %c0_i32_0 = arith.constant 0 : i32
    return %arg0, %arg1, %c0_i32 : i32, i32, i32
  }
}

module attributes {stable_mosaic.version = 11 : i64} {
  func.func @_edge_stats_kernel(%arg0: i32, %arg1: i32, %arg2: memref<1x16x32xf32, #tpu.memory_space<vmem>>, %arg3: memref<1x6x16x32xf32, #tpu.memory_space<vmem>>, %arg4: memref<1x16x1xf32, #tpu.memory_space<vmem>>, %arg5: memref<1x16x1xf32, #tpu.memory_space<vmem>>) attributes {dimension_semantics = [#tpu.dimension_semantics<parallel>, #tpu.dimension_semantics<arbitrary>], iteration_bounds = array<i64: 1, 1>, scalar_prefetch = 0 : i64, scratch_operands = 0 : i64, tpu.core_type = #tpu.core_type<tc>, window_params = [{transform_indices = @transform_0, window_bounds = array<i64: 1, 16, 32>}, {transform_indices = @transform_1, window_bounds = array<i64: 1, 6, 16, 32>}, {transform_indices = @transform_2, window_bounds = array<i64: 1, 16, 1>}, {transform_indices = @transform_3, window_bounds = array<i64: 1, 16, 1>}]} {
    %c0_i32 = arith.constant 0 : i32
    %0 = arith.cmpi eq, %arg1, %c0_i32 : i32
    %1 = arith.extui %0 : i1 to i32
    %c0_i32_0 = arith.constant 0 : i32
    %2 = arith.cmpi ne, %1, %c0_i32_0 : i32
    scf.if %2 {
      %cst_45 = arith.constant 0.000000e+00 : f32
      %75 = vector.broadcast %cst_45 : f32 to vector<1x16x1xf32>
      %c0_46 = arith.constant 0 : index
      %c0_47 = arith.constant 0 : index
      %c0_48 = arith.constant 0 : index
      %76 = vector.load %arg4[%c0_46, %c0_47, %c0_48] : memref<1x16x1xf32, #tpu.memory_space<vmem>>, vector<1x16x1xf32>
      tpu.vector_store %arg4[%c0_46, %c0_47, %c0_48], %75 {strides = array<i32>} : memref<1x16x1xf32, #tpu.memory_space<vmem>>, vector<1x16x1xf32>,
      %cst_49 = arith.constant 0.000000e+00 : f32
      %77 = vector.broadcast %cst_49 : f32 to vector<1x16x1xf32>
      %c0_50 = arith.constant 0 : index
      %c0_51 = arith.constant 0 : index
      %c0_52 = arith.constant 0 : index
      %78 = vector.load %arg5[%c0_50, %c0_51, %c0_52] : memref<1x16x1xf32, #tpu.memory_space<vmem>>, vector<1x16x1xf32>
      tpu.vector_store %arg5[%c0_50, %c0_51, %c0_52], %77 {strides = array<i32>} : memref<1x16x1xf32, #tpu.memory_space<vmem>>, vector<1x16x1xf32>,
    } else {
    }
    %c0 = arith.constant 0 : index
    %c0_1 = arith.constant 0 : index
    %c0_2 = arith.constant 0 : index
    %3 = vector.load %arg2[%c0, %c0_1, %c0_2] : memref<1x16x32xf32, #tpu.memory_space<vmem>>, vector<1x16x32xf32>
    %4 = vector.shape_cast %3 : vector<1x16x32xf32> to vector<16x32xf32>
    %c0_3 = arith.constant 0 : index
    %c0_4 = arith.constant 0 : index
    %c0_5 = arith.constant 0 : index
    %c0_6 = arith.constant 0 : index
    %5 = vector.load %arg3[%c0_3, %c0_4, %c0_5, %c0_6] : memref<1x6x16x32xf32, #tpu.memory_space<vmem>>, vector<1x1x16x32xf32>
    %6 = vector.shape_cast %5 : vector<1x1x16x32xf32> to vector<16x32xf32>
    %7 = arith.addf %4, %6 : vector<16x32xf32>
    %cst = arith.constant dense<0.000000e+00> : vector<16xf32>
    %8 = vector.multi_reduction <add>, %7, %cst [1] : vector<16x32xf32> to vector<16xf32>
    %9 = vector.shape_cast %8 : vector<16xf32> to vector<16x1xf32>
    %10 = arith.mulf %7, %7 : vector<16x32xf32>
    %cst_7 = arith.constant dense<0.000000e+00> : vector<16xf32>
    %11 = vector.multi_reduction <add>, %10, %cst_7 [1] : vector<16x32xf32> to vector<16xf32>
    %12 = vector.shape_cast %11 : vector<16xf32> to vector<16x1xf32>
    %c0_8 = arith.constant 0 : index
    %c1 = arith.constant 1 : index
    %c0_9 = arith.constant 0 : index
    %c0_10 = arith.constant 0 : index
    %13 = vector.load %arg3[%c0_8, %c1, %c0_9, %c0_10] : memref<1x6x16x32xf32, #tpu.memory_space<vmem>>, vector<1x1x16x32xf32>
    %14 = vector.shape_cast %13 : vector<1x1x16x32xf32> to vector<16x32xf32>
    %15 = arith.addf %4, %14 : vector<16x32xf32>
    %cst_11 = arith.constant dense<0.000000e+00> : vector<16xf32>
    %16 = vector.multi_reduction <add>, %15, %cst_11 [1] : vector<16x32xf32> to vector<16xf32>
    %17 = vector.shape_cast %16 : vector<16xf32> to vector<16x1xf32>
    %18 = arith.mulf %15, %15 : vector<16x32xf32>
    %cst_12 = arith.constant dense<0.000000e+00> : vector<16xf32>
    %19 = vector.multi_reduction <add>, %18, %cst_12 [1] : vector<16x32xf32> to vector<16xf32>
    %20 = vector.shape_cast %19 : vector<16xf32> to vector<16x1xf32>
    %21 = arith.addf %9, %17 : vector<16x1xf32>
    %22 = arith.addf %12, %20 : vector<16x1xf32>
    %c0_13 = arith.constant 0 : index
    %c2 = arith.constant 2 : index
    %c0_14 = arith.constant 0 : index
    %c0_15 = arith.constant 0 : index
    %23 = vector.load %arg3[%c0_13, %c2, %c0_14, %c0_15] : memref<1x6x16x32xf32, #tpu.memory_space<vmem>>, vector<1x1x16x32xf32>
    %24 = vector.shape_cast %23 : vector<1x1x16x32xf32> to vector<16x32xf32>
    %25 = arith.addf %4, %24 : vector<16x32xf32>
    %cst_16 = arith.constant dense<0.000000e+00> : vector<16xf32>
    %26 = vector.multi_reduction <add>, %25, %cst_16 [1] : vector<16x32xf32> to vector<16xf32>
    %27 = vector.shape_cast %26 : vector<16xf32> to vector<16x1xf32>
    %28 = arith.mulf %25, %25 : vector<16x32xf32>
    %cst_17 = arith.constant dense<0.000000e+00> : vector<16xf32>
    %29 = vector.multi_reduction <add>, %28, %cst_17 [1] : vector<16x32xf32> to vector<16xf32>
    %30 = vector.shape_cast %29 : vector<16xf32> to vector<16x1xf32>
    %31 = arith.addf %21, %27 : vector<16x1xf32>
    %32 = arith.addf %22, %30 : vector<16x1xf32>
    %c0_18 = arith.constant 0 : index
    %c3 = arith.constant 3 : index
    %c0_19 = arith.constant 0 : index
    %c0_20 = arith.constant 0 : index
    %33 = vector.load %arg3[%c0_18, %c3, %c0_19, %c0_20] : memref<1x6x16x32xf32, #tpu.memory_space<vmem>>, vector<1x1x16x32xf32>
    %34 = vector.shape_cast %33 : vector<1x1x16x32xf32> to vector<16x32xf32>
    %35 = arith.addf %4, %34 : vector<16x32xf32>
    %cst_21 = arith.constant dense<0.000000e+00> : vector<16xf32>
    %36 = vector.multi_reduction <add>, %35, %cst_21 [1] : vector<16x32xf32> to vector<16xf32>
    %37 = vector.shape_cast %36 : vector<16xf32> to vector<16x1xf32>
    %38 = arith.mulf %35, %35 : vector<16x32xf32>
    %cst_22 = arith.constant dense<0.000000e+00> : vector<16xf32>
    %39 = vector.multi_reduction <add>, %38, %cst_22 [1] : vector<16x32xf32> to vector<16xf32>
    %40 = vector.shape_cast %39 : vector<16xf32> to vector<16x1xf32>
    %41 = arith.addf %31, %37 : vector<16x1xf32>
    %42 = arith.addf %32, %40 : vector<16x1xf32>
    %c0_23 = arith.constant 0 : index
    %c4 = arith.constant 4 : index
    %c0_24 = arith.constant 0 : index
    %c0_25 = arith.constant 0 : index
    %43 = vector.load %arg3[%c0_23, %c4, %c0_24, %c0_25] : memref<1x6x16x32xf32, #tpu.memory_space<vmem>>, vector<1x1x16x32xf32>
    %44 = vector.shape_cast %43 : vector<1x1x16x32xf32> to vector<16x32xf32>
    %45 = arith.addf %4, %44 : vector<16x32xf32>
    %cst_26 = arith.constant dense<0.000000e+00> : vector<16xf32>
    %46 = vector.multi_reduction <add>, %45, %cst_26 [1] : vector<16x32xf32> to vector<16xf32>
    %47 = vector.shape_cast %46 : vector<16xf32> to vector<16x1xf32>
    %48 = arith.mulf %45, %45 : vector<16x32xf32>
    %cst_27 = arith.constant dense<0.000000e+00> : vector<16xf32>
    %49 = vector.multi_reduction <add>, %48, %cst_27 [1] : vector<16x32xf32> to vector<16xf32>
    %50 = vector.shape_cast %49 : vector<16xf32> to vector<16x1xf32>
    %51 = arith.addf %41, %47 : vector<16x1xf32>
    %52 = arith.addf %42, %50 : vector<16x1xf32>
    %c0_28 = arith.constant 0 : index
    %c5 = arith.constant 5 : index
    %c0_29 = arith.constant 0 : index
    %c0_30 = arith.constant 0 : index
    %53 = vector.load %arg3[%c0_28, %c5, %c0_29, %c0_30] : memref<1x6x16x32xf32, #tpu.memory_space<vmem>>, vector<1x1x16x32xf32>
    %54 = vector.shape_cast %53 : vector<1x1x16x32xf32> to vector<16x32xf32>
    %55 = arith.addf %4, %54 : vector<16x32xf32>
    %cst_31 = arith.constant dense<0.000000e+00> : vector<16xf32>
    %56 = vector.multi_reduction <add>, %55, %cst_31 [1] : vector<16x32xf32> to vector<16xf32>
    %57 = vector.shape_cast %56 : vector<16xf32> to vector<16x1xf32>
    %58 = arith.mulf %55, %55 : vector<16x32xf32>
    %cst_32 = arith.constant dense<0.000000e+00> : vector<16xf32>
    %59 = vector.multi_reduction <add>, %58, %cst_32 [1] : vector<16x32xf32> to vector<16xf32>
    %60 = vector.shape_cast %59 : vector<16xf32> to vector<16x1xf32>
    %61 = arith.addf %51, %57 : vector<16x1xf32>
    %62 = arith.addf %52, %60 : vector<16x1xf32>
    %c0_33 = arith.constant 0 : index
    %c0_34 = arith.constant 0 : index
    %c0_35 = arith.constant 0 : index
    %63 = vector.load %arg4[%c0_33, %c0_34, %c0_35] : memref<1x16x1xf32, #tpu.memory_space<vmem>>, vector<1x16x1xf32>
    %64 = vector.shape_cast %63 : vector<1x16x1xf32> to vector<16x1xf32>
    %65 = arith.addf %64, %61 : vector<16x1xf32>
    %c0_36 = arith.constant 0 : index
    %c0_37 = arith.constant 0 : index
    %c0_38 = arith.constant 0 : index
    %66 = vector.load %arg4[%c0_36, %c0_37, %c0_38] : memref<1x16x1xf32, #tpu.memory_space<vmem>>, vector<1x16x1xf32>
    %67 = vector.shape_cast %66 : vector<1x16x1xf32> to vector<16x1xf32>
    %68 = vector.shape_cast %65 : vector<16x1xf32> to vector<1x16x1xf32>
    tpu.vector_store %arg4[%c0_36, %c0_37, %c0_38], %68 {strides = array<i32>} : memref<1x16x1xf32, #tpu.memory_space<vmem>>, vector<1x16x1xf32>,
    %c0_39 = arith.constant 0 : index
    %c0_40 = arith.constant 0 : index
    %c0_41 = arith.constant 0 : index
    %69 = vector.load %arg5[%c0_39, %c0_40, %c0_41] : memref<1x16x1xf32, #tpu.memory_space<vmem>>, vector<1x16x1xf32>
    %70 = vector.shape_cast %69 : vector<1x16x1xf32> to vector<16x1xf32>
    %71 = arith.addf %70, %62 : vector<16x1xf32>
    %c0_42 = arith.constant 0 : index
    %c0_43 = arith.constant 0 : index
    %c0_44 = arith.constant 0 : index
    %72 = vector.load %arg5[%c0_42, %c0_43, %c0_44] : memref<1x16x1xf32, #tpu.memory_space<vmem>>, vector<1x16x1xf32>
    %73 = vector.shape_cast %72 : vector<1x16x1xf32> to vector<16x1xf32>
    %74 = vector.shape_cast %71 : vector<16x1xf32> to vector<1x16x1xf32>
    tpu.vector_store %arg5[%c0_42, %c0_43, %c0_44], %74 {strides = array<i32>} : memref<1x16x1xf32, #tpu.memory_space<vmem>>, vector<1x16x1xf32>,
    return
  }
  func.func @transform_0(%arg0: i32, %arg1: i32) -> (i32, i32, i32) {
    %c0_i32 = arith.constant 0 : i32
    %c0_i32_0 = arith.constant 0 : i32
    return %arg0, %c0_i32, %arg1 : i32, i32, i32
  }
  func.func @transform_1(%arg0: i32, %arg1: i32) -> (i32, i32, i32, i32) {
    %c0_i32 = arith.constant 0 : i32
    %c0_i32_0 = arith.constant 0 : i32
    %c0_i32_1 = arith.constant 0 : i32
    return %arg0, %c0_i32, %c0_i32_0, %arg1 : i32, i32, i32, i32
  }
  func.func @transform_2(%arg0: i32, %arg1: i32) -> (i32, i32, i32) {
    %c0_i32 = arith.constant 0 : i32
    %c0_i32_0 = arith.constant 0 : i32
    %c0_i32_1 = arith.constant 0 : i32
    return %arg0, %c0_i32, %c0_i32_0 : i32, i32, i32
  }
  func.func @transform_3(%arg0: i32, %arg1: i32) -> (i32, i32, i32) {
    %c0_i32 = arith.constant 0 : i32
    %c0_i32_0 = arith.constant 0 : i32
    %c0_i32_1 = arith.constant 0 : i32
    return %arg0, %c0_i32, %c0_i32_0 : i32, i32, i32
  }
}

module attributes {stable_mosaic.version = 11 : i64} {
  func.func @_edge_norm_lrelu_max_kernel(%arg0: i32, %arg1: i32, %arg2: memref<1x16x32xf32, #tpu.memory_space<vmem>>, %arg3: memref<1x6x16x32xf32, #tpu.memory_space<vmem>>, %arg4: memref<1x16x1xf32, #tpu.memory_space<vmem>>, %arg5: memref<1x16x1xf32, #tpu.memory_space<vmem>>, %arg6: memref<1x16x32xf32, #tpu.memory_space<vmem>>) attributes {dimension_semantics = [#tpu.dimension_semantics<parallel>, #tpu.dimension_semantics<parallel>], iteration_bounds = array<i64: 1, 1>, scalar_prefetch = 0 : i64, scratch_operands = 0 : i64, tpu.core_type = #tpu.core_type<tc>, window_params = [{transform_indices = @transform_0, window_bounds = array<i64: 1, 16, 32>}, {transform_indices = @transform_1, window_bounds = array<i64: 1, 6, 16, 32>}, {transform_indices = @transform_2, window_bounds = array<i64: 1, 16, 1>}, {transform_indices = @transform_3, window_bounds = array<i64: 1, 16, 1>}, {transform_indices = @transform_4, window_bounds = array<i64: 1, 16, 32>}]} {
    %c0 = arith.constant 0 : index
    %c0_0 = arith.constant 0 : index
    %c0_1 = arith.constant 0 : index
    %0 = vector.load %arg2[%c0, %c0_0, %c0_1] : memref<1x16x32xf32, #tpu.memory_space<vmem>>, vector<1x16x32xf32>
    %1 = vector.shape_cast %0 : vector<1x16x32xf32> to vector<16x32xf32>
    %c0_2 = arith.constant 0 : index
    %c0_3 = arith.constant 0 : index
    %c0_4 = arith.constant 0 : index
    %2 = vector.load %arg4[%c0_2, %c0_3, %c0_4] : memref<1x16x1xf32, #tpu.memory_space<vmem>>, vector<1x16x1xf32>
    %3 = vector.shape_cast %2 : vector<1x16x1xf32> to vector<16x1xf32>
    %cst = arith.constant 0.00520833349 : f32
    %4 = vector.broadcast %cst : f32 to vector<16x1xf32>
    %5 = arith.mulf %3, %4 : vector<16x1xf32>
    %c0_5 = arith.constant 0 : index
    %c0_6 = arith.constant 0 : index
    %c0_7 = arith.constant 0 : index
    %6 = vector.load %arg5[%c0_5, %c0_6, %c0_7] : memref<1x16x1xf32, #tpu.memory_space<vmem>>, vector<1x16x1xf32>
    %7 = vector.shape_cast %6 : vector<1x16x1xf32> to vector<16x1xf32>
    %cst_8 = arith.constant 0.00520833349 : f32
    %8 = vector.broadcast %cst_8 : f32 to vector<16x1xf32>
    %9 = arith.mulf %7, %8 : vector<16x1xf32>
    %10 = arith.mulf %5, %5 : vector<16x1xf32>
    %11 = arith.subf %9, %10 : vector<16x1xf32>
    %cst_9 = arith.constant 0.000000e+00 : f32
    %12 = vector.broadcast %cst_9 : f32 to vector<16x1xf32>
    %13 = arith.maximumf %11, %12 : vector<16x1xf32>
    %cst_10 = arith.constant 9.99999974E-6 : f32
    %14 = vector.broadcast %cst_10 : f32 to vector<16x1xf32>
    %15 = arith.addf %13, %14 : vector<16x1xf32>
    %16 = math.rsqrt %15 : vector<16x1xf32>
    %c0_11 = arith.constant 0 : index
    %c0_12 = arith.constant 0 : index
    %c0_13 = arith.constant 0 : index
    %c0_14 = arith.constant 0 : index
    %17 = vector.load %arg3[%c0_11, %c0_12, %c0_13, %c0_14] : memref<1x6x16x32xf32, #tpu.memory_space<vmem>>, vector<1x1x16x32xf32>
    %18 = vector.shape_cast %17 : vector<1x1x16x32xf32> to vector<16x32xf32>
    %19 = arith.addf %1, %18 : vector<16x32xf32>
    %20 = vector.broadcast %5 : vector<16x1xf32> to vector<16x32xf32>
    %21 = arith.subf %19, %20 : vector<16x32xf32>
    %22 = vector.broadcast %16 : vector<16x1xf32> to vector<16x32xf32>
    %23 = arith.mulf %21, %22 : vector<16x32xf32>
    %cst_15 = arith.constant 0.000000e+00 : f32
    %24 = vector.broadcast %cst_15 : f32 to vector<16x32xf32>
    %25 = arith.cmpf oge, %23, %24 : vector<16x32xf32>
    %cst_16 = arith.constant 2.000000e-01 : f32
    %26 = vector.broadcast %cst_16 : f32 to vector<16x32xf32>
    %27 = arith.mulf %26, %23 : vector<16x32xf32>
    %28 = arith.select %25, %23, %27 : vector<16x32xi1>, vector<16x32xf32>
    %c0_17 = arith.constant 0 : index
    %c1 = arith.constant 1 : index
    %c0_18 = arith.constant 0 : index
    %c0_19 = arith.constant 0 : index
    %29 = vector.load %arg3[%c0_17, %c1, %c0_18, %c0_19] : memref<1x6x16x32xf32, #tpu.memory_space<vmem>>, vector<1x1x16x32xf32>
    %30 = vector.shape_cast %29 : vector<1x1x16x32xf32> to vector<16x32xf32>
    %31 = arith.addf %1, %30 : vector<16x32xf32>
    %32 = vector.broadcast %5 : vector<16x1xf32> to vector<16x32xf32>
    %33 = arith.subf %31, %32 : vector<16x32xf32>
    %34 = vector.broadcast %16 : vector<16x1xf32> to vector<16x32xf32>
    %35 = arith.mulf %33, %34 : vector<16x32xf32>
    %cst_20 = arith.constant 0.000000e+00 : f32
    %36 = vector.broadcast %cst_20 : f32 to vector<16x32xf32>
    %37 = arith.cmpf oge, %35, %36 : vector<16x32xf32>
    %cst_21 = arith.constant 2.000000e-01 : f32
    %38 = vector.broadcast %cst_21 : f32 to vector<16x32xf32>
    %39 = arith.mulf %38, %35 : vector<16x32xf32>
    %40 = arith.select %37, %35, %39 : vector<16x32xi1>, vector<16x32xf32>
    %41 = arith.maximumf %28, %40 : vector<16x32xf32>
    %c0_22 = arith.constant 0 : index
    %c2 = arith.constant 2 : index
    %c0_23 = arith.constant 0 : index
    %c0_24 = arith.constant 0 : index
    %42 = vector.load %arg3[%c0_22, %c2, %c0_23, %c0_24] : memref<1x6x16x32xf32, #tpu.memory_space<vmem>>, vector<1x1x16x32xf32>
    %43 = vector.shape_cast %42 : vector<1x1x16x32xf32> to vector<16x32xf32>
    %44 = arith.addf %1, %43 : vector<16x32xf32>
    %45 = vector.broadcast %5 : vector<16x1xf32> to vector<16x32xf32>
    %46 = arith.subf %44, %45 : vector<16x32xf32>
    %47 = vector.broadcast %16 : vector<16x1xf32> to vector<16x32xf32>
    %48 = arith.mulf %46, %47 : vector<16x32xf32>
    %cst_25 = arith.constant 0.000000e+00 : f32
    %49 = vector.broadcast %cst_25 : f32 to vector<16x32xf32>
    %50 = arith.cmpf oge, %48, %49 : vector<16x32xf32>
    %cst_26 = arith.constant 2.000000e-01 : f32
    %51 = vector.broadcast %cst_26 : f32 to vector<16x32xf32>
    %52 = arith.mulf %51, %48 : vector<16x32xf32>
    %53 = arith.select %50, %48, %52 : vector<16x32xi1>, vector<16x32xf32>
    %54 = arith.maximumf %41, %53 : vector<16x32xf32>
    %c0_27 = arith.constant 0 : index
    %c3 = arith.constant 3 : index
    %c0_28 = arith.constant 0 : index
    %c0_29 = arith.constant 0 : index
    %55 = vector.load %arg3[%c0_27, %c3, %c0_28, %c0_29] : memref<1x6x16x32xf32, #tpu.memory_space<vmem>>, vector<1x1x16x32xf32>
    %56 = vector.shape_cast %55 : vector<1x1x16x32xf32> to vector<16x32xf32>
    %57 = arith.addf %1, %56 : vector<16x32xf32>
    %58 = vector.broadcast %5 : vector<16x1xf32> to vector<16x32xf32>
    %59 = arith.subf %57, %58 : vector<16x32xf32>
    %60 = vector.broadcast %16 : vector<16x1xf32> to vector<16x32xf32>
    %61 = arith.mulf %59, %60 : vector<16x32xf32>
    %cst_30 = arith.constant 0.000000e+00 : f32
    %62 = vector.broadcast %cst_30 : f32 to vector<16x32xf32>
    %63 = arith.cmpf oge, %61, %62 : vector<16x32xf32>
    %cst_31 = arith.constant 2.000000e-01 : f32
    %64 = vector.broadcast %cst_31 : f32 to vector<16x32xf32>
    %65 = arith.mulf %64, %61 : vector<16x32xf32>
    %66 = arith.select %63, %61, %65 : vector<16x32xi1>, vector<16x32xf32>
    %67 = arith.maximumf %54, %66 : vector<16x32xf32>
    %c0_32 = arith.constant 0 : index
    %c4 = arith.constant 4 : index
    %c0_33 = arith.constant 0 : index
    %c0_34 = arith.constant 0 : index
    %68 = vector.load %arg3[%c0_32, %c4, %c0_33, %c0_34] : memref<1x6x16x32xf32, #tpu.memory_space<vmem>>, vector<1x1x16x32xf32>
    %69 = vector.shape_cast %68 : vector<1x1x16x32xf32> to vector<16x32xf32>
    %70 = arith.addf %1, %69 : vector<16x32xf32>
    %71 = vector.broadcast %5 : vector<16x1xf32> to vector<16x32xf32>
    %72 = arith.subf %70, %71 : vector<16x32xf32>
    %73 = vector.broadcast %16 : vector<16x1xf32> to vector<16x32xf32>
    %74 = arith.mulf %72, %73 : vector<16x32xf32>
    %cst_35 = arith.constant 0.000000e+00 : f32
    %75 = vector.broadcast %cst_35 : f32 to vector<16x32xf32>
    %76 = arith.cmpf oge, %74, %75 : vector<16x32xf32>
    %cst_36 = arith.constant 2.000000e-01 : f32
    %77 = vector.broadcast %cst_36 : f32 to vector<16x32xf32>
    %78 = arith.mulf %77, %74 : vector<16x32xf32>
    %79 = arith.select %76, %74, %78 : vector<16x32xi1>, vector<16x32xf32>
    %80 = arith.maximumf %67, %79 : vector<16x32xf32>
    %c0_37 = arith.constant 0 : index
    %c5 = arith.constant 5 : index
    %c0_38 = arith.constant 0 : index
    %c0_39 = arith.constant 0 : index
    %81 = vector.load %arg3[%c0_37, %c5, %c0_38, %c0_39] : memref<1x6x16x32xf32, #tpu.memory_space<vmem>>, vector<1x1x16x32xf32>
    %82 = vector.shape_cast %81 : vector<1x1x16x32xf32> to vector<16x32xf32>
    %83 = arith.addf %1, %82 : vector<16x32xf32>
    %84 = vector.broadcast %5 : vector<16x1xf32> to vector<16x32xf32>
    %85 = arith.subf %83, %84 : vector<16x32xf32>
    %86 = vector.broadcast %16 : vector<16x1xf32> to vector<16x32xf32>
    %87 = arith.mulf %85, %86 : vector<16x32xf32>
    %cst_40 = arith.constant 0.000000e+00 : f32
    %88 = vector.broadcast %cst_40 : f32 to vector<16x32xf32>
    %89 = arith.cmpf oge, %87, %88 : vector<16x32xf32>
    %cst_41 = arith.constant 2.000000e-01 : f32
    %90 = vector.broadcast %cst_41 : f32 to vector<16x32xf32>
    %91 = arith.mulf %90, %87 : vector<16x32xf32>
    %92 = arith.select %89, %87, %91 : vector<16x32xi1>, vector<16x32xf32>
    %93 = arith.maximumf %80, %92 : vector<16x32xf32>
    %c0_42 = arith.constant 0 : index
    %c0_43 = arith.constant 0 : index
    %c0_44 = arith.constant 0 : index
    %94 = vector.load %arg6[%c0_42, %c0_43, %c0_44] : memref<1x16x32xf32, #tpu.memory_space<vmem>>, vector<1x16x32xf32>
    %95 = vector.shape_cast %94 : vector<1x16x32xf32> to vector<16x32xf32>
    %96 = vector.shape_cast %93 : vector<16x32xf32> to vector<1x16x32xf32>
    tpu.vector_store %arg6[%c0_42, %c0_43, %c0_44], %96 {strides = array<i32>} : memref<1x16x32xf32, #tpu.memory_space<vmem>>, vector<1x16x32xf32>,
    return
  }
  func.func @transform_0(%arg0: i32, %arg1: i32) -> (i32, i32, i32) {
    %c0_i32 = arith.constant 0 : i32
    %c0_i32_0 = arith.constant 0 : i32
    return %arg0, %c0_i32, %arg1 : i32, i32, i32
  }
  func.func @transform_1(%arg0: i32, %arg1: i32) -> (i32, i32, i32, i32) {
    %c0_i32 = arith.constant 0 : i32
    %c0_i32_0 = arith.constant 0 : i32
    %c0_i32_1 = arith.constant 0 : i32
    return %arg0, %c0_i32, %c0_i32_0, %arg1 : i32, i32, i32, i32
  }
  func.func @transform_2(%arg0: i32, %arg1: i32) -> (i32, i32, i32) {
    %c0_i32 = arith.constant 0 : i32
    %c0_i32_0 = arith.constant 0 : i32
    %c0_i32_1 = arith.constant 0 : i32
    return %arg0, %c0_i32, %c0_i32_0 : i32, i32, i32
  }
  func.func @transform_3(%arg0: i32, %arg1: i32) -> (i32, i32, i32) {
    %c0_i32 = arith.constant 0 : i32
    %c0_i32_0 = arith.constant 0 : i32
    %c0_i32_1 = arith.constant 0 : i32
    return %arg0, %c0_i32, %c0_i32_0 : i32, i32, i32
  }
  func.func @transform_4(%arg0: i32, %arg1: i32) -> (i32, i32, i32) {
    %c0_i32 = arith.constant 0 : i32
    %c0_i32_0 = arith.constant 0 : i32
    return %arg0, %c0_i32, %arg1 : i32, i32, i32
  }
}

module attributes {stable_mosaic.version = 11 : i64} {
  func.func @_conv_kernel(%arg0: i32, %arg1: i32, %arg2: memref<1x16x32xf32, #tpu.memory_space<vmem>>, %arg3: memref<64x16xf32, #tpu.memory_space<vmem>>, %arg4: memref<64x1xf32, #tpu.memory_space<vmem>>, %arg5: memref<1x64x32xf32, #tpu.memory_space<vmem>>) attributes {dimension_semantics = [#tpu.dimension_semantics<parallel>, #tpu.dimension_semantics<parallel>], iteration_bounds = array<i64: 1, 1>, scalar_prefetch = 0 : i64, scratch_operands = 0 : i64, tpu.core_type = #tpu.core_type<tc>, window_params = [{transform_indices = @transform_0, window_bounds = array<i64: 1, 16, 32>}, {pipeline_mode = #tpu.pipeline_mode<synchronous>, transform_indices = @transform_1, window_bounds = array<i64: 64, 16>}, {pipeline_mode = #tpu.pipeline_mode<synchronous>, transform_indices = @transform_2, window_bounds = array<i64: 64, 1>}, {transform_indices = @transform_3, window_bounds = array<i64: 1, 64, 32>}]} {
    %c0 = arith.constant 0 : index
    %c0_0 = arith.constant 0 : index
    %0 = vector.load %arg3[%c0, %c0_0] : memref<64x16xf32, #tpu.memory_space<vmem>>, vector<64x16xf32>
    %c0_1 = arith.constant 0 : index
    %c0_2 = arith.constant 0 : index
    %c0_3 = arith.constant 0 : index
    %1 = vector.load %arg2[%c0_1, %c0_2, %c0_3] : memref<1x16x32xf32, #tpu.memory_space<vmem>>, vector<1x16x32xf32>
    %2 = vector.shape_cast %1 : vector<1x16x32xf32> to vector<16x32xf32>
    %cst = arith.constant dense<0.000000e+00> : vector<64x32xf32>
    %3 = tpu.matmul %0, %2, %cst {dimension_numbers = #tpu.dot_dimension_numbers<[1], [0], [0], [1], [0, 0, 1, 1], [], []>} : vector<64x16xf32>, vector<16x32xf32>, vector<64x32xf32> -> vector<64x32xf32>
    %c0_4 = arith.constant 0 : index
    %c0_5 = arith.constant 0 : index
    %4 = vector.load %arg4[%c0_4, %c0_5] : memref<64x1xf32, #tpu.memory_space<vmem>>, vector<64x1xf32>
    %5 = vector.broadcast %4 : vector<64x1xf32> to vector<64x32xf32>
    %6 = arith.addf %3, %5 : vector<64x32xf32>
    %c0_6 = arith.constant 0 : index
    %c0_7 = arith.constant 0 : index
    %c0_8 = arith.constant 0 : index
    %7 = vector.load %arg5[%c0_6, %c0_7, %c0_8] : memref<1x64x32xf32, #tpu.memory_space<vmem>>, vector<1x64x32xf32>
    %8 = vector.shape_cast %7 : vector<1x64x32xf32> to vector<64x32xf32>
    %9 = vector.shape_cast %6 : vector<64x32xf32> to vector<1x64x32xf32>
    tpu.vector_store %arg5[%c0_6, %c0_7, %c0_8], %9 {strides = array<i32>} : memref<1x64x32xf32, #tpu.memory_space<vmem>>, vector<1x64x32xf32>,
    return
  }
  func.func @transform_0(%arg0: i32, %arg1: i32) -> (i32, i32, i32) {
    %c0_i32 = arith.constant 0 : i32
    %c0_i32_0 = arith.constant 0 : i32
    return %arg0, %c0_i32, %arg1 : i32, i32, i32
  }
  func.func @transform_1(%arg0: i32, %arg1: i32) -> (i32, i32) {
    %c0_i32 = arith.constant 0 : i32
    %c0_i32_0 = arith.constant 0 : i32
    %c0_i32_1 = arith.constant 0 : i32
    return %c0_i32, %c0_i32_0 : i32, i32
  }
  func.func @transform_2(%arg0: i32, %arg1: i32) -> (i32, i32) {
    %c0_i32 = arith.constant 0 : i32
    %c0_i32_0 = arith.constant 0 : i32
    %c0_i32_1 = arith.constant 0 : i32
    return %c0_i32, %c0_i32_0 : i32, i32
  }
  func.func @transform_3(%arg0: i32, %arg1: i32) -> (i32, i32, i32) {
    %c0_i32 = arith.constant 0 : i32
    %c0_i32_0 = arith.constant 0 : i32
    return %arg0, %c0_i32, %arg1 : i32, i32, i32
  }
}

module attributes {stable_mosaic.version = 11 : i64} {
  func.func @_edge_stats_kernel(%arg0: i32, %arg1: i32, %arg2: memref<1x32x32xf32, #tpu.memory_space<vmem>>, %arg3: memref<1x6x32x32xf32, #tpu.memory_space<vmem>>, %arg4: memref<1x32x1xf32, #tpu.memory_space<vmem>>, %arg5: memref<1x32x1xf32, #tpu.memory_space<vmem>>) attributes {dimension_semantics = [#tpu.dimension_semantics<parallel>, #tpu.dimension_semantics<arbitrary>], iteration_bounds = array<i64: 1, 1>, scalar_prefetch = 0 : i64, scratch_operands = 0 : i64, tpu.core_type = #tpu.core_type<tc>, window_params = [{transform_indices = @transform_0, window_bounds = array<i64: 1, 32, 32>}, {transform_indices = @transform_1, window_bounds = array<i64: 1, 6, 32, 32>}, {transform_indices = @transform_2, window_bounds = array<i64: 1, 32, 1>}, {transform_indices = @transform_3, window_bounds = array<i64: 1, 32, 1>}]} {
    %c0_i32 = arith.constant 0 : i32
    %0 = arith.cmpi eq, %arg1, %c0_i32 : i32
    %1 = arith.extui %0 : i1 to i32
    %c0_i32_0 = arith.constant 0 : i32
    %2 = arith.cmpi ne, %1, %c0_i32_0 : i32
    scf.if %2 {
      %cst_45 = arith.constant 0.000000e+00 : f32
      %75 = vector.broadcast %cst_45 : f32 to vector<1x32x1xf32>
      %c0_46 = arith.constant 0 : index
      %c0_47 = arith.constant 0 : index
      %c0_48 = arith.constant 0 : index
      %76 = vector.load %arg4[%c0_46, %c0_47, %c0_48] : memref<1x32x1xf32, #tpu.memory_space<vmem>>, vector<1x32x1xf32>
      tpu.vector_store %arg4[%c0_46, %c0_47, %c0_48], %75 {strides = array<i32>} : memref<1x32x1xf32, #tpu.memory_space<vmem>>, vector<1x32x1xf32>,
      %cst_49 = arith.constant 0.000000e+00 : f32
      %77 = vector.broadcast %cst_49 : f32 to vector<1x32x1xf32>
      %c0_50 = arith.constant 0 : index
      %c0_51 = arith.constant 0 : index
      %c0_52 = arith.constant 0 : index
      %78 = vector.load %arg5[%c0_50, %c0_51, %c0_52] : memref<1x32x1xf32, #tpu.memory_space<vmem>>, vector<1x32x1xf32>
      tpu.vector_store %arg5[%c0_50, %c0_51, %c0_52], %77 {strides = array<i32>} : memref<1x32x1xf32, #tpu.memory_space<vmem>>, vector<1x32x1xf32>,
    } else {
    }
    %c0 = arith.constant 0 : index
    %c0_1 = arith.constant 0 : index
    %c0_2 = arith.constant 0 : index
    %3 = vector.load %arg2[%c0, %c0_1, %c0_2] : memref<1x32x32xf32, #tpu.memory_space<vmem>>, vector<1x32x32xf32>
    %4 = vector.shape_cast %3 : vector<1x32x32xf32> to vector<32x32xf32>
    %c0_3 = arith.constant 0 : index
    %c0_4 = arith.constant 0 : index
    %c0_5 = arith.constant 0 : index
    %c0_6 = arith.constant 0 : index
    %5 = vector.load %arg3[%c0_3, %c0_4, %c0_5, %c0_6] : memref<1x6x32x32xf32, #tpu.memory_space<vmem>>, vector<1x1x32x32xf32>
    %6 = vector.shape_cast %5 : vector<1x1x32x32xf32> to vector<32x32xf32>
    %7 = arith.addf %4, %6 : vector<32x32xf32>
    %cst = arith.constant dense<0.000000e+00> : vector<32xf32>
    %8 = vector.multi_reduction <add>, %7, %cst [1] : vector<32x32xf32> to vector<32xf32>
    %9 = vector.shape_cast %8 : vector<32xf32> to vector<32x1xf32>
    %10 = arith.mulf %7, %7 : vector<32x32xf32>
    %cst_7 = arith.constant dense<0.000000e+00> : vector<32xf32>
    %11 = vector.multi_reduction <add>, %10, %cst_7 [1] : vector<32x32xf32> to vector<32xf32>
    %12 = vector.shape_cast %11 : vector<32xf32> to vector<32x1xf32>
    %c0_8 = arith.constant 0 : index
    %c1 = arith.constant 1 : index
    %c0_9 = arith.constant 0 : index
    %c0_10 = arith.constant 0 : index
    %13 = vector.load %arg3[%c0_8, %c1, %c0_9, %c0_10] : memref<1x6x32x32xf32, #tpu.memory_space<vmem>>, vector<1x1x32x32xf32>
    %14 = vector.shape_cast %13 : vector<1x1x32x32xf32> to vector<32x32xf32>
    %15 = arith.addf %4, %14 : vector<32x32xf32>
    %cst_11 = arith.constant dense<0.000000e+00> : vector<32xf32>
    %16 = vector.multi_reduction <add>, %15, %cst_11 [1] : vector<32x32xf32> to vector<32xf32>
    %17 = vector.shape_cast %16 : vector<32xf32> to vector<32x1xf32>
    %18 = arith.mulf %15, %15 : vector<32x32xf32>
    %cst_12 = arith.constant dense<0.000000e+00> : vector<32xf32>
    %19 = vector.multi_reduction <add>, %18, %cst_12 [1] : vector<32x32xf32> to vector<32xf32>
    %20 = vector.shape_cast %19 : vector<32xf32> to vector<32x1xf32>
    %21 = arith.addf %9, %17 : vector<32x1xf32>
    %22 = arith.addf %12, %20 : vector<32x1xf32>
    %c0_13 = arith.constant 0 : index
    %c2 = arith.constant 2 : index
    %c0_14 = arith.constant 0 : index
    %c0_15 = arith.constant 0 : index
    %23 = vector.load %arg3[%c0_13, %c2, %c0_14, %c0_15] : memref<1x6x32x32xf32, #tpu.memory_space<vmem>>, vector<1x1x32x32xf32>
    %24 = vector.shape_cast %23 : vector<1x1x32x32xf32> to vector<32x32xf32>
    %25 = arith.addf %4, %24 : vector<32x32xf32>
    %cst_16 = arith.constant dense<0.000000e+00> : vector<32xf32>
    %26 = vector.multi_reduction <add>, %25, %cst_16 [1] : vector<32x32xf32> to vector<32xf32>
    %27 = vector.shape_cast %26 : vector<32xf32> to vector<32x1xf32>
    %28 = arith.mulf %25, %25 : vector<32x32xf32>
    %cst_17 = arith.constant dense<0.000000e+00> : vector<32xf32>
    %29 = vector.multi_reduction <add>, %28, %cst_17 [1] : vector<32x32xf32> to vector<32xf32>
    %30 = vector.shape_cast %29 : vector<32xf32> to vector<32x1xf32>
    %31 = arith.addf %21, %27 : vector<32x1xf32>
    %32 = arith.addf %22, %30 : vector<32x1xf32>
    %c0_18 = arith.constant 0 : index
    %c3 = arith.constant 3 : index
    %c0_19 = arith.constant 0 : index
    %c0_20 = arith.constant 0 : index
    %33 = vector.load %arg3[%c0_18, %c3, %c0_19, %c0_20] : memref<1x6x32x32xf32, #tpu.memory_space<vmem>>, vector<1x1x32x32xf32>
    %34 = vector.shape_cast %33 : vector<1x1x32x32xf32> to vector<32x32xf32>
    %35 = arith.addf %4, %34 : vector<32x32xf32>
    %cst_21 = arith.constant dense<0.000000e+00> : vector<32xf32>
    %36 = vector.multi_reduction <add>, %35, %cst_21 [1] : vector<32x32xf32> to vector<32xf32>
    %37 = vector.shape_cast %36 : vector<32xf32> to vector<32x1xf32>
    %38 = arith.mulf %35, %35 : vector<32x32xf32>
    %cst_22 = arith.constant dense<0.000000e+00> : vector<32xf32>
    %39 = vector.multi_reduction <add>, %38, %cst_22 [1] : vector<32x32xf32> to vector<32xf32>
    %40 = vector.shape_cast %39 : vector<32xf32> to vector<32x1xf32>
    %41 = arith.addf %31, %37 : vector<32x1xf32>
    %42 = arith.addf %32, %40 : vector<32x1xf32>
    %c0_23 = arith.constant 0 : index
    %c4 = arith.constant 4 : index
    %c0_24 = arith.constant 0 : index
    %c0_25 = arith.constant 0 : index
    %43 = vector.load %arg3[%c0_23, %c4, %c0_24, %c0_25] : memref<1x6x32x32xf32, #tpu.memory_space<vmem>>, vector<1x1x32x32xf32>
    %44 = vector.shape_cast %43 : vector<1x1x32x32xf32> to vector<32x32xf32>
    %45 = arith.addf %4, %44 : vector<32x32xf32>
    %cst_26 = arith.constant dense<0.000000e+00> : vector<32xf32>
    %46 = vector.multi_reduction <add>, %45, %cst_26 [1] : vector<32x32xf32> to vector<32xf32>
    %47 = vector.shape_cast %46 : vector<32xf32> to vector<32x1xf32>
    %48 = arith.mulf %45, %45 : vector<32x32xf32>
    %cst_27 = arith.constant dense<0.000000e+00> : vector<32xf32>
    %49 = vector.multi_reduction <add>, %48, %cst_27 [1] : vector<32x32xf32> to vector<32xf32>
    %50 = vector.shape_cast %49 : vector<32xf32> to vector<32x1xf32>
    %51 = arith.addf %41, %47 : vector<32x1xf32>
    %52 = arith.addf %42, %50 : vector<32x1xf32>
    %c0_28 = arith.constant 0 : index
    %c5 = arith.constant 5 : index
    %c0_29 = arith.constant 0 : index
    %c0_30 = arith.constant 0 : index
    %53 = vector.load %arg3[%c0_28, %c5, %c0_29, %c0_30] : memref<1x6x32x32xf32, #tpu.memory_space<vmem>>, vector<1x1x32x32xf32>
    %54 = vector.shape_cast %53 : vector<1x1x32x32xf32> to vector<32x32xf32>
    %55 = arith.addf %4, %54 : vector<32x32xf32>
    %cst_31 = arith.constant dense<0.000000e+00> : vector<32xf32>
    %56 = vector.multi_reduction <add>, %55, %cst_31 [1] : vector<32x32xf32> to vector<32xf32>
    %57 = vector.shape_cast %56 : vector<32xf32> to vector<32x1xf32>
    %58 = arith.mulf %55, %55 : vector<32x32xf32>
    %cst_32 = arith.constant dense<0.000000e+00> : vector<32xf32>
    %59 = vector.multi_reduction <add>, %58, %cst_32 [1] : vector<32x32xf32> to vector<32xf32>
    %60 = vector.shape_cast %59 : vector<32xf32> to vector<32x1xf32>
    %61 = arith.addf %51, %57 : vector<32x1xf32>
    %62 = arith.addf %52, %60 : vector<32x1xf32>
    %c0_33 = arith.constant 0 : index
    %c0_34 = arith.constant 0 : index
    %c0_35 = arith.constant 0 : index
    %63 = vector.load %arg4[%c0_33, %c0_34, %c0_35] : memref<1x32x1xf32, #tpu.memory_space<vmem>>, vector<1x32x1xf32>
    %64 = vector.shape_cast %63 : vector<1x32x1xf32> to vector<32x1xf32>
    %65 = arith.addf %64, %61 : vector<32x1xf32>
    %c0_36 = arith.constant 0 : index
    %c0_37 = arith.constant 0 : index
    %c0_38 = arith.constant 0 : index
    %66 = vector.load %arg4[%c0_36, %c0_37, %c0_38] : memref<1x32x1xf32, #tpu.memory_space<vmem>>, vector<1x32x1xf32>
    %67 = vector.shape_cast %66 : vector<1x32x1xf32> to vector<32x1xf32>
    %68 = vector.shape_cast %65 : vector<32x1xf32> to vector<1x32x1xf32>
    tpu.vector_store %arg4[%c0_36, %c0_37, %c0_38], %68 {strides = array<i32>} : memref<1x32x1xf32, #tpu.memory_space<vmem>>, vector<1x32x1xf32>,
    %c0_39 = arith.constant 0 : index
    %c0_40 = arith.constant 0 : index
    %c0_41 = arith.constant 0 : index
    %69 = vector.load %arg5[%c0_39, %c0_40, %c0_41] : memref<1x32x1xf32, #tpu.memory_space<vmem>>, vector<1x32x1xf32>
    %70 = vector.shape_cast %69 : vector<1x32x1xf32> to vector<32x1xf32>
    %71 = arith.addf %70, %62 : vector<32x1xf32>
    %c0_42 = arith.constant 0 : index
    %c0_43 = arith.constant 0 : index
    %c0_44 = arith.constant 0 : index
    %72 = vector.load %arg5[%c0_42, %c0_43, %c0_44] : memref<1x32x1xf32, #tpu.memory_space<vmem>>, vector<1x32x1xf32>
    %73 = vector.shape_cast %72 : vector<1x32x1xf32> to vector<32x1xf32>
    %74 = vector.shape_cast %71 : vector<32x1xf32> to vector<1x32x1xf32>
    tpu.vector_store %arg5[%c0_42, %c0_43, %c0_44], %74 {strides = array<i32>} : memref<1x32x1xf32, #tpu.memory_space<vmem>>, vector<1x32x1xf32>,
    return
  }
  func.func @transform_0(%arg0: i32, %arg1: i32) -> (i32, i32, i32) {
    %c0_i32 = arith.constant 0 : i32
    %c0_i32_0 = arith.constant 0 : i32
    return %arg0, %c0_i32, %arg1 : i32, i32, i32
  }
  func.func @transform_1(%arg0: i32, %arg1: i32) -> (i32, i32, i32, i32) {
    %c0_i32 = arith.constant 0 : i32
    %c0_i32_0 = arith.constant 0 : i32
    %c0_i32_1 = arith.constant 0 : i32
    return %arg0, %c0_i32, %c0_i32_0, %arg1 : i32, i32, i32, i32
  }
  func.func @transform_2(%arg0: i32, %arg1: i32) -> (i32, i32, i32) {
    %c0_i32 = arith.constant 0 : i32
    %c0_i32_0 = arith.constant 0 : i32
    %c0_i32_1 = arith.constant 0 : i32
    return %arg0, %c0_i32, %c0_i32_0 : i32, i32, i32
  }
  func.func @transform_3(%arg0: i32, %arg1: i32) -> (i32, i32, i32) {
    %c0_i32 = arith.constant 0 : i32
    %c0_i32_0 = arith.constant 0 : i32
    %c0_i32_1 = arith.constant 0 : i32
    return %arg0, %c0_i32, %c0_i32_0 : i32, i32, i32
  }
}

module attributes {stable_mosaic.version = 11 : i64} {
  func.func @_edge_norm_lrelu_max_kernel(%arg0: i32, %arg1: i32, %arg2: memref<1x32x32xf32, #tpu.memory_space<vmem>>, %arg3: memref<1x6x32x32xf32, #tpu.memory_space<vmem>>, %arg4: memref<1x32x1xf32, #tpu.memory_space<vmem>>, %arg5: memref<1x32x1xf32, #tpu.memory_space<vmem>>, %arg6: memref<1x32x32xf32, #tpu.memory_space<vmem>>) attributes {dimension_semantics = [#tpu.dimension_semantics<parallel>, #tpu.dimension_semantics<parallel>], iteration_bounds = array<i64: 1, 1>, scalar_prefetch = 0 : i64, scratch_operands = 0 : i64, tpu.core_type = #tpu.core_type<tc>, window_params = [{transform_indices = @transform_0, window_bounds = array<i64: 1, 32, 32>}, {transform_indices = @transform_1, window_bounds = array<i64: 1, 6, 32, 32>}, {transform_indices = @transform_2, window_bounds = array<i64: 1, 32, 1>}, {transform_indices = @transform_3, window_bounds = array<i64: 1, 32, 1>}, {transform_indices = @transform_4, window_bounds = array<i64: 1, 32, 32>}]} {
    %c0 = arith.constant 0 : index
    %c0_0 = arith.constant 0 : index
    %c0_1 = arith.constant 0 : index
    %0 = vector.load %arg2[%c0, %c0_0, %c0_1] : memref<1x32x32xf32, #tpu.memory_space<vmem>>, vector<1x32x32xf32>
    %1 = vector.shape_cast %0 : vector<1x32x32xf32> to vector<32x32xf32>
    %c0_2 = arith.constant 0 : index
    %c0_3 = arith.constant 0 : index
    %c0_4 = arith.constant 0 : index
    %2 = vector.load %arg4[%c0_2, %c0_3, %c0_4] : memref<1x32x1xf32, #tpu.memory_space<vmem>>, vector<1x32x1xf32>
    %3 = vector.shape_cast %2 : vector<1x32x1xf32> to vector<32x1xf32>
    %cst = arith.constant 0.00520833349 : f32
    %4 = vector.broadcast %cst : f32 to vector<32x1xf32>
    %5 = arith.mulf %3, %4 : vector<32x1xf32>
    %c0_5 = arith.constant 0 : index
    %c0_6 = arith.constant 0 : index
    %c0_7 = arith.constant 0 : index
    %6 = vector.load %arg5[%c0_5, %c0_6, %c0_7] : memref<1x32x1xf32, #tpu.memory_space<vmem>>, vector<1x32x1xf32>
    %7 = vector.shape_cast %6 : vector<1x32x1xf32> to vector<32x1xf32>
    %cst_8 = arith.constant 0.00520833349 : f32
    %8 = vector.broadcast %cst_8 : f32 to vector<32x1xf32>
    %9 = arith.mulf %7, %8 : vector<32x1xf32>
    %10 = arith.mulf %5, %5 : vector<32x1xf32>
    %11 = arith.subf %9, %10 : vector<32x1xf32>
    %cst_9 = arith.constant 0.000000e+00 : f32
    %12 = vector.broadcast %cst_9 : f32 to vector<32x1xf32>
    %13 = arith.maximumf %11, %12 : vector<32x1xf32>
    %cst_10 = arith.constant 9.99999974E-6 : f32
    %14 = vector.broadcast %cst_10 : f32 to vector<32x1xf32>
    %15 = arith.addf %13, %14 : vector<32x1xf32>
    %16 = math.rsqrt %15 : vector<32x1xf32>
    %c0_11 = arith.constant 0 : index
    %c0_12 = arith.constant 0 : index
    %c0_13 = arith.constant 0 : index
    %c0_14 = arith.constant 0 : index
    %17 = vector.load %arg3[%c0_11, %c0_12, %c0_13, %c0_14] : memref<1x6x32x32xf32, #tpu.memory_space<vmem>>, vector<1x1x32x32xf32>
    %18 = vector.shape_cast %17 : vector<1x1x32x32xf32> to vector<32x32xf32>
    %19 = arith.addf %1, %18 : vector<32x32xf32>
    %20 = vector.broadcast %5 : vector<32x1xf32> to vector<32x32xf32>
    %21 = arith.subf %19, %20 : vector<32x32xf32>
    %22 = vector.broadcast %16 : vector<32x1xf32> to vector<32x32xf32>
    %23 = arith.mulf %21, %22 : vector<32x32xf32>
    %cst_15 = arith.constant 0.000000e+00 : f32
    %24 = vector.broadcast %cst_15 : f32 to vector<32x32xf32>
    %25 = arith.cmpf oge, %23, %24 : vector<32x32xf32>
    %cst_16 = arith.constant 2.000000e-01 : f32
    %26 = vector.broadcast %cst_16 : f32 to vector<32x32xf32>
    %27 = arith.mulf %26, %23 : vector<32x32xf32>
    %28 = arith.select %25, %23, %27 : vector<32x32xi1>, vector<32x32xf32>
    %c0_17 = arith.constant 0 : index
    %c1 = arith.constant 1 : index
    %c0_18 = arith.constant 0 : index
    %c0_19 = arith.constant 0 : index
    %29 = vector.load %arg3[%c0_17, %c1, %c0_18, %c0_19] : memref<1x6x32x32xf32, #tpu.memory_space<vmem>>, vector<1x1x32x32xf32>
    %30 = vector.shape_cast %29 : vector<1x1x32x32xf32> to vector<32x32xf32>
    %31 = arith.addf %1, %30 : vector<32x32xf32>
    %32 = vector.broadcast %5 : vector<32x1xf32> to vector<32x32xf32>
    %33 = arith.subf %31, %32 : vector<32x32xf32>
    %34 = vector.broadcast %16 : vector<32x1xf32> to vector<32x32xf32>
    %35 = arith.mulf %33, %34 : vector<32x32xf32>
    %cst_20 = arith.constant 0.000000e+00 : f32
    %36 = vector.broadcast %cst_20 : f32 to vector<32x32xf32>
    %37 = arith.cmpf oge, %35, %36 : vector<32x32xf32>
    %cst_21 = arith.constant 2.000000e-01 : f32
    %38 = vector.broadcast %cst_21 : f32 to vector<32x32xf32>
    %39 = arith.mulf %38, %35 : vector<32x32xf32>
    %40 = arith.select %37, %35, %39 : vector<32x32xi1>, vector<32x32xf32>
    %41 = arith.maximumf %28, %40 : vector<32x32xf32>
    %c0_22 = arith.constant 0 : index
    %c2 = arith.constant 2 : index
    %c0_23 = arith.constant 0 : index
    %c0_24 = arith.constant 0 : index
    %42 = vector.load %arg3[%c0_22, %c2, %c0_23, %c0_24] : memref<1x6x32x32xf32, #tpu.memory_space<vmem>>, vector<1x1x32x32xf32>
    %43 = vector.shape_cast %42 : vector<1x1x32x32xf32> to vector<32x32xf32>
    %44 = arith.addf %1, %43 : vector<32x32xf32>
    %45 = vector.broadcast %5 : vector<32x1xf32> to vector<32x32xf32>
    %46 = arith.subf %44, %45 : vector<32x32xf32>
    %47 = vector.broadcast %16 : vector<32x1xf32> to vector<32x32xf32>
    %48 = arith.mulf %46, %47 : vector<32x32xf32>
    %cst_25 = arith.constant 0.000000e+00 : f32
    %49 = vector.broadcast %cst_25 : f32 to vector<32x32xf32>
    %50 = arith.cmpf oge, %48, %49 : vector<32x32xf32>
    %cst_26 = arith.constant 2.000000e-01 : f32
    %51 = vector.broadcast %cst_26 : f32 to vector<32x32xf32>
    %52 = arith.mulf %51, %48 : vector<32x32xf32>
    %53 = arith.select %50, %48, %52 : vector<32x32xi1>, vector<32x32xf32>
    %54 = arith.maximumf %41, %53 : vector<32x32xf32>
    %c0_27 = arith.constant 0 : index
    %c3 = arith.constant 3 : index
    %c0_28 = arith.constant 0 : index
    %c0_29 = arith.constant 0 : index
    %55 = vector.load %arg3[%c0_27, %c3, %c0_28, %c0_29] : memref<1x6x32x32xf32, #tpu.memory_space<vmem>>, vector<1x1x32x32xf32>
    %56 = vector.shape_cast %55 : vector<1x1x32x32xf32> to vector<32x32xf32>
    %57 = arith.addf %1, %56 : vector<32x32xf32>
    %58 = vector.broadcast %5 : vector<32x1xf32> to vector<32x32xf32>
    %59 = arith.subf %57, %58 : vector<32x32xf32>
    %60 = vector.broadcast %16 : vector<32x1xf32> to vector<32x32xf32>
    %61 = arith.mulf %59, %60 : vector<32x32xf32>
    %cst_30 = arith.constant 0.000000e+00 : f32
    %62 = vector.broadcast %cst_30 : f32 to vector<32x32xf32>
    %63 = arith.cmpf oge, %61, %62 : vector<32x32xf32>
    %cst_31 = arith.constant 2.000000e-01 : f32
    %64 = vector.broadcast %cst_31 : f32 to vector<32x32xf32>
    %65 = arith.mulf %64, %61 : vector<32x32xf32>
    %66 = arith.select %63, %61, %65 : vector<32x32xi1>, vector<32x32xf32>
    %67 = arith.maximumf %54, %66 : vector<32x32xf32>
    %c0_32 = arith.constant 0 : index
    %c4 = arith.constant 4 : index
    %c0_33 = arith.constant 0 : index
    %c0_34 = arith.constant 0 : index
    %68 = vector.load %arg3[%c0_32, %c4, %c0_33, %c0_34] : memref<1x6x32x32xf32, #tpu.memory_space<vmem>>, vector<1x1x32x32xf32>
    %69 = vector.shape_cast %68 : vector<1x1x32x32xf32> to vector<32x32xf32>
    %70 = arith.addf %1, %69 : vector<32x32xf32>
    %71 = vector.broadcast %5 : vector<32x1xf32> to vector<32x32xf32>
    %72 = arith.subf %70, %71 : vector<32x32xf32>
    %73 = vector.broadcast %16 : vector<32x1xf32> to vector<32x32xf32>
    %74 = arith.mulf %72, %73 : vector<32x32xf32>
    %cst_35 = arith.constant 0.000000e+00 : f32
    %75 = vector.broadcast %cst_35 : f32 to vector<32x32xf32>
    %76 = arith.cmpf oge, %74, %75 : vector<32x32xf32>
    %cst_36 = arith.constant 2.000000e-01 : f32
    %77 = vector.broadcast %cst_36 : f32 to vector<32x32xf32>
    %78 = arith.mulf %77, %74 : vector<32x32xf32>
    %79 = arith.select %76, %74, %78 : vector<32x32xi1>, vector<32x32xf32>
    %80 = arith.maximumf %67, %79 : vector<32x32xf32>
    %c0_37 = arith.constant 0 : index
    %c5 = arith.constant 5 : index
    %c0_38 = arith.constant 0 : index
    %c0_39 = arith.constant 0 : index
    %81 = vector.load %arg3[%c0_37, %c5, %c0_38, %c0_39] : memref<1x6x32x32xf32, #tpu.memory_space<vmem>>, vector<1x1x32x32xf32>
    %82 = vector.shape_cast %81 : vector<1x1x32x32xf32> to vector<32x32xf32>
    %83 = arith.addf %1, %82 : vector<32x32xf32>
    %84 = vector.broadcast %5 : vector<32x1xf32> to vector<32x32xf32>
    %85 = arith.subf %83, %84 : vector<32x32xf32>
    %86 = vector.broadcast %16 : vector<32x1xf32> to vector<32x32xf32>
    %87 = arith.mulf %85, %86 : vector<32x32xf32>
    %cst_40 = arith.constant 0.000000e+00 : f32
    %88 = vector.broadcast %cst_40 : f32 to vector<32x32xf32>
    %89 = arith.cmpf oge, %87, %88 : vector<32x32xf32>
    %cst_41 = arith.constant 2.000000e-01 : f32
    %90 = vector.broadcast %cst_41 : f32 to vector<32x32xf32>
    %91 = arith.mulf %90, %87 : vector<32x32xf32>
    %92 = arith.select %89, %87, %91 : vector<32x32xi1>, vector<32x32xf32>
    %93 = arith.maximumf %80, %92 : vector<32x32xf32>
    %c0_42 = arith.constant 0 : index
    %c0_43 = arith.constant 0 : index
    %c0_44 = arith.constant 0 : index
    %94 = vector.load %arg6[%c0_42, %c0_43, %c0_44] : memref<1x32x32xf32, #tpu.memory_space<vmem>>, vector<1x32x32xf32>
    %95 = vector.shape_cast %94 : vector<1x32x32xf32> to vector<32x32xf32>
    %96 = vector.shape_cast %93 : vector<32x32xf32> to vector<1x32x32xf32>
    tpu.vector_store %arg6[%c0_42, %c0_43, %c0_44], %96 {strides = array<i32>} : memref<1x32x32xf32, #tpu.memory_space<vmem>>, vector<1x32x32xf32>,
    return
  }
  func.func @transform_0(%arg0: i32, %arg1: i32) -> (i32, i32, i32) {
    %c0_i32 = arith.constant 0 : i32
    %c0_i32_0 = arith.constant 0 : i32
    return %arg0, %c0_i32, %arg1 : i32, i32, i32
  }
  func.func @transform_1(%arg0: i32, %arg1: i32) -> (i32, i32, i32, i32) {
    %c0_i32 = arith.constant 0 : i32
    %c0_i32_0 = arith.constant 0 : i32
    %c0_i32_1 = arith.constant 0 : i32
    return %arg0, %c0_i32, %c0_i32_0, %arg1 : i32, i32, i32, i32
  }
  func.func @transform_2(%arg0: i32, %arg1: i32) -> (i32, i32, i32) {
    %c0_i32 = arith.constant 0 : i32
    %c0_i32_0 = arith.constant 0 : i32
    %c0_i32_1 = arith.constant 0 : i32
    return %arg0, %c0_i32, %c0_i32_0 : i32, i32, i32
  }
  func.func @transform_3(%arg0: i32, %arg1: i32) -> (i32, i32, i32) {
    %c0_i32 = arith.constant 0 : i32
    %c0_i32_0 = arith.constant 0 : i32
    %c0_i32_1 = arith.constant 0 : i32
    return %arg0, %c0_i32, %c0_i32_0 : i32, i32, i32
  }
  func.func @transform_4(%arg0: i32, %arg1: i32) -> (i32, i32, i32) {
    %c0_i32 = arith.constant 0 : i32
    %c0_i32_0 = arith.constant 0 : i32
    return %arg0, %c0_i32, %arg1 : i32, i32, i32
  }
}

module attributes {stable_mosaic.version = 11 : i64} {
  func.func @_conv_stats_kernel(%arg0: i32, %arg1: i32, %arg2: memref<1x16x32xf32, #tpu.memory_space<vmem>>, %arg3: memref<1x16x32xf32, #tpu.memory_space<vmem>>, %arg4: memref<1x32x32xf32, #tpu.memory_space<vmem>>, %arg5: memref<16x16xf32, #tpu.memory_space<vmem>>, %arg6: memref<16x16xf32, #tpu.memory_space<vmem>>, %arg7: memref<16x32xf32, #tpu.memory_space<vmem>>, %arg8: memref<16x1xf32, #tpu.memory_space<vmem>>, %arg9: memref<1x16x32xf32, #tpu.memory_space<vmem>>, %arg10: memref<1x16x1xf32, #tpu.memory_space<vmem>>, %arg11: memref<1x16x1xf32, #tpu.memory_space<vmem>>) attributes {dimension_semantics = [#tpu.dimension_semantics<parallel>, #tpu.dimension_semantics<arbitrary>], iteration_bounds = array<i64: 1, 1>, scalar_prefetch = 0 : i64, scratch_operands = 0 : i64, tpu.core_type = #tpu.core_type<tc>, window_params = [{transform_indices = @transform_0, window_bounds = array<i64: 1, 16, 32>}, {transform_indices = @transform_1, window_bounds = array<i64: 1, 16, 32>}, {transform_indices = @transform_2, window_bounds = array<i64: 1, 32, 32>}, {pipeline_mode = #tpu.pipeline_mode<synchronous>, transform_indices = @transform_3, window_bounds = array<i64: 16, 16>}, {pipeline_mode = #tpu.pipeline_mode<synchronous>, transform_indices = @transform_4, window_bounds = array<i64: 16, 16>}, {pipeline_mode = #tpu.pipeline_mode<synchronous>, transform_indices = @transform_5, window_bounds = array<i64: 16, 32>}, {pipeline_mode = #tpu.pipeline_mode<synchronous>, transform_indices = @transform_6, window_bounds = array<i64: 16, 1>}, {transform_indices = @transform_7, window_bounds = array<i64: 1, 16, 32>}, {transform_indices = @transform_8, window_bounds = array<i64: 1, 16, 1>}, {transform_indices = @transform_9, window_bounds = array<i64: 1, 16, 1>}]} {
    %c0_i32 = arith.constant 0 : i32
    %0 = arith.cmpi eq, %arg1, %c0_i32 : i32
    %1 = arith.extui %0 : i1 to i32
    %c0_i32_0 = arith.constant 0 : i32
    %2 = arith.cmpi ne, %1, %c0_i32_0 : i32
    scf.if %2 {
      %cst_36 = arith.constant 0.000000e+00 : f32
      %40 = vector.broadcast %cst_36 : f32 to vector<1x16x1xf32>
      %c0_37 = arith.constant 0 : index
      %c0_38 = arith.constant 0 : index
      %c0_39 = arith.constant 0 : index
      %41 = vector.load %arg10[%c0_37, %c0_38, %c0_39] : memref<1x16x1xf32, #tpu.memory_space<vmem>>, vector<1x16x1xf32>
      tpu.vector_store %arg10[%c0_37, %c0_38, %c0_39], %40 {strides = array<i32>} : memref<1x16x1xf32, #tpu.memory_space<vmem>>, vector<1x16x1xf32>,
      %cst_40 = arith.constant 0.000000e+00 : f32
      %42 = vector.broadcast %cst_40 : f32 to vector<1x16x1xf32>
      %c0_41 = arith.constant 0 : index
      %c0_42 = arith.constant 0 : index
      %c0_43 = arith.constant 0 : index
      %43 = vector.load %arg11[%c0_41, %c0_42, %c0_43] : memref<1x16x1xf32, #tpu.memory_space<vmem>>, vector<1x16x1xf32>
      tpu.vector_store %arg11[%c0_41, %c0_42, %c0_43], %42 {strides = array<i32>} : memref<1x16x1xf32, #tpu.memory_space<vmem>>, vector<1x16x1xf32>,
    } else {
    }
    %c0 = arith.constant 0 : index
    %c0_1 = arith.constant 0 : index
    %3 = vector.load %arg5[%c0, %c0_1] : memref<16x16xf32, #tpu.memory_space<vmem>>, vector<16x16xf32>
    %c0_2 = arith.constant 0 : index
    %c0_3 = arith.constant 0 : index
    %c0_4 = arith.constant 0 : index
    %4 = vector.load %arg2[%c0_2, %c0_3, %c0_4] : memref<1x16x32xf32, #tpu.memory_space<vmem>>, vector<1x16x32xf32>
    %5 = vector.shape_cast %4 : vector<1x16x32xf32> to vector<16x32xf32>
    %cst = arith.constant dense<0.000000e+00> : vector<16x32xf32>
    %6 = tpu.matmul %3, %5, %cst {dimension_numbers = #tpu.dot_dimension_numbers<[1], [0], [0], [1], [0, 0, 1, 1], [], []>} : vector<16x16xf32>, vector<16x32xf32>, vector<16x32xf32> -> vector<16x32xf32>
    %c0_5 = arith.constant 0 : index
    %c0_6 = arith.constant 0 : index
    %7 = vector.load %arg6[%c0_5, %c0_6] : memref<16x16xf32, #tpu.memory_space<vmem>>, vector<16x16xf32>
    %c0_7 = arith.constant 0 : index
    %c0_8 = arith.constant 0 : index
    %c0_9 = arith.constant 0 : index
    %8 = vector.load %arg3[%c0_7, %c0_8, %c0_9] : memref<1x16x32xf32, #tpu.memory_space<vmem>>, vector<1x16x32xf32>
    %9 = vector.shape_cast %8 : vector<1x16x32xf32> to vector<16x32xf32>
    %cst_10 = arith.constant dense<0.000000e+00> : vector<16x32xf32>
    %10 = tpu.matmul %7, %9, %cst_10 {dimension_numbers = #tpu.dot_dimension_numbers<[1], [0], [0], [1], [0, 0, 1, 1], [], []>} : vector<16x16xf32>, vector<16x32xf32>, vector<16x32xf32> -> vector<16x32xf32>
    %11 = arith.addf %6, %10 : vector<16x32xf32>
    %c0_11 = arith.constant 0 : index
    %c0_12 = arith.constant 0 : index
    %12 = vector.load %arg7[%c0_11, %c0_12] : memref<16x32xf32, #tpu.memory_space<vmem>>, vector<16x32xf32>
    %c0_13 = arith.constant 0 : index
    %c0_14 = arith.constant 0 : index
    %c0_15 = arith.constant 0 : index
    %13 = vector.load %arg4[%c0_13, %c0_14, %c0_15] : memref<1x32x32xf32, #tpu.memory_space<vmem>>, vector<1x32x32xf32>
    %14 = vector.shape_cast %13 : vector<1x32x32xf32> to vector<32x32xf32>
    %cst_16 = arith.constant dense<0.000000e+00> : vector<16x32xf32>
    %15 = tpu.matmul %12, %14, %cst_16 {dimension_numbers = #tpu.dot_dimension_numbers<[1], [0], [0], [1], [0, 0, 1, 1], [], []>} : vector<16x32xf32>, vector<32x32xf32>, vector<16x32xf32> -> vector<16x32xf32>
    %16 = arith.addf %11, %15 : vector<16x32xf32>
    %c0_17 = arith.constant 0 : index
    %c0_18 = arith.constant 0 : index
    %17 = vector.load %arg8[%c0_17, %c0_18] : memref<16x1xf32, #tpu.memory_space<vmem>>, vector<16x1xf32>
    %18 = vector.broadcast %17 : vector<16x1xf32> to vector<16x32xf32>
    %19 = arith.addf %16, %18 : vector<16x32xf32>
    %c0_19 = arith.constant 0 : index
    %c0_20 = arith.constant 0 : index
    %c0_21 = arith.constant 0 : index
    %20 = vector.load %arg9[%c0_19, %c0_20, %c0_21] : memref<1x16x32xf32, #tpu.memory_space<vmem>>, vector<1x16x32xf32>
    %21 = vector.shape_cast %20 : vector<1x16x32xf32> to vector<16x32xf32>
    %22 = vector.shape_cast %19 : vector<16x32xf32> to vector<1x16x32xf32>
    tpu.vector_store %arg9[%c0_19, %c0_20, %c0_21], %22 {strides = array<i32>} : memref<1x16x32xf32, #tpu.memory_space<vmem>>, vector<1x16x32xf32>,
    %c0_22 = arith.constant 0 : index
    %c0_23 = arith.constant 0 : index
    %c0_24 = arith.constant 0 : index
    %23 = vector.load %arg10[%c0_22, %c0_23, %c0_24] : memref<1x16x1xf32, #tpu.memory_space<vmem>>, vector<1x16x1xf32>
    %24 = vector.shape_cast %23 : vector<1x16x1xf32> to vector<16x1xf32>
    %cst_25 = arith.constant dense<0.000000e+00> : vector<16xf32>
    %25 = vector.multi_reduction <add>, %19, %cst_25 [1] : vector<16x32xf32> to vector<16xf32>
    %26 = vector.shape_cast %25 : vector<16xf32> to vector<16x1xf32>
    %27 = arith.addf %24, %26 : vector<16x1xf32>
    %c0_26 = arith.constant 0 : index
    %c0_27 = arith.constant 0 : index
    %c0_28 = arith.constant 0 : index
    %28 = vector.load %arg10[%c0_26, %c0_27, %c0_28] : memref<1x16x1xf32, #tpu.memory_space<vmem>>, vector<1x16x1xf32>
    %29 = vector.shape_cast %28 : vector<1x16x1xf32> to vector<16x1xf32>
    %30 = vector.shape_cast %27 : vector<16x1xf32> to vector<1x16x1xf32>
    tpu.vector_store %arg10[%c0_26, %c0_27, %c0_28], %30 {strides = array<i32>} : memref<1x16x1xf32, #tpu.memory_space<vmem>>, vector<1x16x1xf32>,
    %c0_29 = arith.constant 0 : index
    %c0_30 = arith.constant 0 : index
    %c0_31 = arith.constant 0 : index
    %31 = vector.load %arg11[%c0_29, %c0_30, %c0_31] : memref<1x16x1xf32, #tpu.memory_space<vmem>>, vector<1x16x1xf32>
    %32 = vector.shape_cast %31 : vector<1x16x1xf32> to vector<16x1xf32>
    %33 = arith.mulf %19, %19 : vector<16x32xf32>
    %cst_32 = arith.constant dense<0.000000e+00> : vector<16xf32>
    %34 = vector.multi_reduction <add>, %33, %cst_32 [1] : vector<16x32xf32> to vector<16xf32>
    %35 = vector.shape_cast %34 : vector<16xf32> to vector<16x1xf32>
    %36 = arith.addf %32, %35 : vector<16x1xf32>
    %c0_33 = arith.constant 0 : index
    %c0_34 = arith.constant 0 : index
    %c0_35 = arith.constant 0 : index
    %37 = vector.load %arg11[%c0_33, %c0_34, %c0_35] : memref<1x16x1xf32, #tpu.memory_space<vmem>>, vector<1x16x1xf32>
    %38 = vector.shape_cast %37 : vector<1x16x1xf32> to vector<16x1xf32>
    %39 = vector.shape_cast %36 : vector<16x1xf32> to vector<1x16x1xf32>
    tpu.vector_store %arg11[%c0_33, %c0_34, %c0_35], %39 {strides = array<i32>} : memref<1x16x1xf32, #tpu.memory_space<vmem>>, vector<1x16x1xf32>,
    return
  }
  func.func @transform_0(%arg0: i32, %arg1: i32) -> (i32, i32, i32) {
    %c0_i32 = arith.constant 0 : i32
    %c0_i32_0 = arith.constant 0 : i32
    return %arg0, %c0_i32, %arg1 : i32, i32, i32
  }
  func.func @transform_1(%arg0: i32, %arg1: i32) -> (i32, i32, i32) {
    %c0_i32 = arith.constant 0 : i32
    %c0_i32_0 = arith.constant 0 : i32
    return %arg0, %c0_i32, %arg1 : i32, i32, i32
  }
  func.func @transform_2(%arg0: i32, %arg1: i32) -> (i32, i32, i32) {
    %c0_i32 = arith.constant 0 : i32
    %c0_i32_0 = arith.constant 0 : i32
    return %arg0, %c0_i32, %arg1 : i32, i32, i32
  }
  func.func @transform_3(%arg0: i32, %arg1: i32) -> (i32, i32) {
    %c0_i32 = arith.constant 0 : i32
    %c0_i32_0 = arith.constant 0 : i32
    %c0_i32_1 = arith.constant 0 : i32
    return %c0_i32, %c0_i32_0 : i32, i32
  }
  func.func @transform_4(%arg0: i32, %arg1: i32) -> (i32, i32) {
    %c0_i32 = arith.constant 0 : i32
    %c0_i32_0 = arith.constant 0 : i32
    %c0_i32_1 = arith.constant 0 : i32
    return %c0_i32, %c0_i32_0 : i32, i32
  }
  func.func @transform_5(%arg0: i32, %arg1: i32) -> (i32, i32) {
    %c0_i32 = arith.constant 0 : i32
    %c0_i32_0 = arith.constant 0 : i32
    %c0_i32_1 = arith.constant 0 : i32
    return %c0_i32, %c0_i32_0 : i32, i32
  }
  func.func @transform_6(%arg0: i32, %arg1: i32) -> (i32, i32) {
    %c0_i32 = arith.constant 0 : i32
    %c0_i32_0 = arith.constant 0 : i32
    %c0_i32_1 = arith.constant 0 : i32
    return %c0_i32, %c0_i32_0 : i32, i32
  }
  func.func @transform_7(%arg0: i32, %arg1: i32) -> (i32, i32, i32) {
    %c0_i32 = arith.constant 0 : i32
    %c0_i32_0 = arith.constant 0 : i32
    return %arg0, %c0_i32, %arg1 : i32, i32, i32
  }
  func.func @transform_8(%arg0: i32, %arg1: i32) -> (i32, i32, i32) {
    %c0_i32 = arith.constant 0 : i32
    %c0_i32_0 = arith.constant 0 : i32
    %c0_i32_1 = arith.constant 0 : i32
    return %arg0, %c0_i32, %c0_i32_0 : i32, i32, i32
  }
  func.func @transform_9(%arg0: i32, %arg1: i32) -> (i32, i32, i32) {
    %c0_i32 = arith.constant 0 : i32
    %c0_i32_0 = arith.constant 0 : i32
    %c0_i32_1 = arith.constant 0 : i32
    return %arg0, %c0_i32, %c0_i32_0 : i32, i32, i32
  }
}

module attributes {stable_mosaic.version = 11 : i64} {
  func.func @_norm_act_kernel(%arg0: i32, %arg1: i32, %arg2: memref<1x16x32xf32, #tpu.memory_space<vmem>>, %arg3: memref<1x16x1xf32, #tpu.memory_space<vmem>>, %arg4: memref<1x16x1xf32, #tpu.memory_space<vmem>>, %arg5: memref<1x16x32xf32, #tpu.memory_space<vmem>>) attributes {dimension_semantics = [#tpu.dimension_semantics<parallel>, #tpu.dimension_semantics<parallel>], iteration_bounds = array<i64: 1, 1>, scalar_prefetch = 0 : i64, scratch_operands = 0 : i64, tpu.core_type = #tpu.core_type<tc>, window_params = [{transform_indices = @transform_0, window_bounds = array<i64: 1, 16, 32>}, {transform_indices = @transform_1, window_bounds = array<i64: 1, 16, 1>}, {transform_indices = @transform_2, window_bounds = array<i64: 1, 16, 1>}, {transform_indices = @transform_3, window_bounds = array<i64: 1, 16, 32>}]} {
    %c0 = arith.constant 0 : index
    %c0_0 = arith.constant 0 : index
    %c0_1 = arith.constant 0 : index
    %0 = vector.load %arg2[%c0, %c0_0, %c0_1] : memref<1x16x32xf32, #tpu.memory_space<vmem>>, vector<1x16x32xf32>
    %1 = vector.shape_cast %0 : vector<1x16x32xf32> to vector<16x32xf32>
    %c0_2 = arith.constant 0 : index
    %c0_3 = arith.constant 0 : index
    %c0_4 = arith.constant 0 : index
    %2 = vector.load %arg3[%c0_2, %c0_3, %c0_4] : memref<1x16x1xf32, #tpu.memory_space<vmem>>, vector<1x16x1xf32>
    %3 = vector.shape_cast %2 : vector<1x16x1xf32> to vector<16x1xf32>
    %cst = arith.constant 3.125000e-02 : f32
    %4 = vector.broadcast %cst : f32 to vector<16x1xf32>
    %5 = arith.mulf %3, %4 : vector<16x1xf32>
    %c0_5 = arith.constant 0 : index
    %c0_6 = arith.constant 0 : index
    %c0_7 = arith.constant 0 : index
    %6 = vector.load %arg4[%c0_5, %c0_6, %c0_7] : memref<1x16x1xf32, #tpu.memory_space<vmem>>, vector<1x16x1xf32>
    %7 = vector.shape_cast %6 : vector<1x16x1xf32> to vector<16x1xf32>
    %cst_8 = arith.constant 3.125000e-02 : f32
    %8 = vector.broadcast %cst_8 : f32 to vector<16x1xf32>
    %9 = arith.mulf %7, %8 : vector<16x1xf32>
    %10 = arith.mulf %5, %5 : vector<16x1xf32>
    %11 = arith.subf %9, %10 : vector<16x1xf32>
    %cst_9 = arith.constant 0.000000e+00 : f32
    %12 = vector.broadcast %cst_9 : f32 to vector<16x1xf32>
    %13 = arith.maximumf %11, %12 : vector<16x1xf32>
    %cst_10 = arith.constant 9.99999974E-6 : f32
    %14 = vector.broadcast %cst_10 : f32 to vector<16x1xf32>
    %15 = arith.addf %13, %14 : vector<16x1xf32>
    %16 = math.rsqrt %15 : vector<16x1xf32>
    %17 = vector.broadcast %5 : vector<16x1xf32> to vector<16x32xf32>
    %18 = arith.subf %1, %17 : vector<16x32xf32>
    %19 = vector.broadcast %16 : vector<16x1xf32> to vector<16x32xf32>
    %20 = arith.mulf %18, %19 : vector<16x32xf32>
    %cst_11 = arith.constant 0.000000e+00 : f32
    %21 = vector.broadcast %cst_11 : f32 to vector<16x32xf32>
    %22 = arith.cmpf oge, %20, %21 : vector<16x32xf32>
    %cst_12 = arith.constant 2.000000e-01 : f32
    %23 = vector.broadcast %cst_12 : f32 to vector<16x32xf32>
    %24 = arith.mulf %23, %20 : vector<16x32xf32>
    %25 = arith.select %22, %20, %24 : vector<16x32xi1>, vector<16x32xf32>
    %c0_13 = arith.constant 0 : index
    %c0_14 = arith.constant 0 : index
    %c0_15 = arith.constant 0 : index
    %26 = vector.load %arg5[%c0_13, %c0_14, %c0_15] : memref<1x16x32xf32, #tpu.memory_space<vmem>>, vector<1x16x32xf32>
    %27 = vector.shape_cast %26 : vector<1x16x32xf32> to vector<16x32xf32>
    %28 = vector.shape_cast %25 : vector<16x32xf32> to vector<1x16x32xf32>
    tpu.vector_store %arg5[%c0_13, %c0_14, %c0_15], %28 {strides = array<i32>} : memref<1x16x32xf32, #tpu.memory_space<vmem>>, vector<1x16x32xf32>,
    return
  }
  func.func @transform_0(%arg0: i32, %arg1: i32) -> (i32, i32, i32) {
    %c0_i32 = arith.constant 0 : i32
    %c0_i32_0 = arith.constant 0 : i32
    return %arg0, %c0_i32, %arg1 : i32, i32, i32
  }
  func.func @transform_1(%arg0: i32, %arg1: i32) -> (i32, i32, i32) {
    %c0_i32 = arith.constant 0 : i32
    %c0_i32_0 = arith.constant 0 : i32
    %c0_i32_1 = arith.constant 0 : i32
    return %arg0, %c0_i32, %c0_i32_0 : i32, i32, i32
  }
  func.func @transform_2(%arg0: i32, %arg1: i32) -> (i32, i32, i32) {
    %c0_i32 = arith.constant 0 : i32
    %c0_i32_0 = arith.constant 0 : i32
    %c0_i32_1 = arith.constant 0 : i32
    return %arg0, %c0_i32, %c0_i32_0 : i32, i32, i32
  }
  func.func @transform_3(%arg0: i32, %arg1: i32) -> (i32, i32, i32) {
    %c0_i32 = arith.constant 0 : i32
    %c0_i32_0 = arith.constant 0 : i32
    return %arg0, %c0_i32, %arg1 : i32, i32, i32
  }
}

module attributes {stable_mosaic.version = 11 : i64} {
  func.func @_conv_kernel(%arg0: i32, %arg1: i32, %arg2: memref<1x16x32xf32, #tpu.memory_space<vmem>>, %arg3: memref<16x16xf32, #tpu.memory_space<vmem>>, %arg4: memref<16x1xf32, #tpu.memory_space<vmem>>, %arg5: memref<1x16x32xf32, #tpu.memory_space<vmem>>) attributes {dimension_semantics = [#tpu.dimension_semantics<parallel>, #tpu.dimension_semantics<parallel>], iteration_bounds = array<i64: 1, 1>, scalar_prefetch = 0 : i64, scratch_operands = 0 : i64, tpu.core_type = #tpu.core_type<tc>, window_params = [{transform_indices = @transform_0, window_bounds = array<i64: 1, 16, 32>}, {pipeline_mode = #tpu.pipeline_mode<synchronous>, transform_indices = @transform_1, window_bounds = array<i64: 16, 16>}, {pipeline_mode = #tpu.pipeline_mode<synchronous>, transform_indices = @transform_2, window_bounds = array<i64: 16, 1>}, {transform_indices = @transform_3, window_bounds = array<i64: 1, 16, 32>}]} {
    %c0 = arith.constant 0 : index
    %c0_0 = arith.constant 0 : index
    %0 = vector.load %arg3[%c0, %c0_0] : memref<16x16xf32, #tpu.memory_space<vmem>>, vector<16x16xf32>
    %c0_1 = arith.constant 0 : index
    %c0_2 = arith.constant 0 : index
    %c0_3 = arith.constant 0 : index
    %1 = vector.load %arg2[%c0_1, %c0_2, %c0_3] : memref<1x16x32xf32, #tpu.memory_space<vmem>>, vector<1x16x32xf32>
    %2 = vector.shape_cast %1 : vector<1x16x32xf32> to vector<16x32xf32>
    %cst = arith.constant dense<0.000000e+00> : vector<16x32xf32>
    %3 = tpu.matmul %0, %2, %cst {dimension_numbers = #tpu.dot_dimension_numbers<[1], [0], [0], [1], [0, 0, 1, 1], [], []>} : vector<16x16xf32>, vector<16x32xf32>, vector<16x32xf32> -> vector<16x32xf32>
    %c0_4 = arith.constant 0 : index
    %c0_5 = arith.constant 0 : index
    %4 = vector.load %arg4[%c0_4, %c0_5] : memref<16x1xf32, #tpu.memory_space<vmem>>, vector<16x1xf32>
    %5 = vector.broadcast %4 : vector<16x1xf32> to vector<16x32xf32>
    %6 = arith.addf %3, %5 : vector<16x32xf32>
    %c0_6 = arith.constant 0 : index
    %c0_7 = arith.constant 0 : index
    %c0_8 = arith.constant 0 : index
    %7 = vector.load %arg5[%c0_6, %c0_7, %c0_8] : memref<1x16x32xf32, #tpu.memory_space<vmem>>, vector<1x16x32xf32>
    %8 = vector.shape_cast %7 : vector<1x16x32xf32> to vector<16x32xf32>
    %9 = vector.shape_cast %6 : vector<16x32xf32> to vector<1x16x32xf32>
    tpu.vector_store %arg5[%c0_6, %c0_7, %c0_8], %9 {strides = array<i32>} : memref<1x16x32xf32, #tpu.memory_space<vmem>>, vector<1x16x32xf32>,
    return
  }
  func.func @transform_0(%arg0: i32, %arg1: i32) -> (i32, i32, i32) {
    %c0_i32 = arith.constant 0 : i32
    %c0_i32_0 = arith.constant 0 : i32
    return %arg0, %c0_i32, %arg1 : i32, i32, i32
  }
  func.func @transform_1(%arg0: i32, %arg1: i32) -> (i32, i32) {
    %c0_i32 = arith.constant 0 : i32
    %c0_i32_0 = arith.constant 0 : i32
    %c0_i32_1 = arith.constant 0 : i32
    return %c0_i32, %c0_i32_0 : i32, i32
  }
  func.func @transform_2(%arg0: i32, %arg1: i32) -> (i32, i32) {
    %c0_i32 = arith.constant 0 : i32
    %c0_i32_0 = arith.constant 0 : i32
    %c0_i32_1 = arith.constant 0 : i32
    return %c0_i32, %c0_i32_0 : i32, i32
  }
  func.func @transform_3(%arg0: i32, %arg1: i32) -> (i32, i32, i32) {
    %c0_i32 = arith.constant 0 : i32
    %c0_i32_0 = arith.constant 0 : i32
    return %arg0, %c0_i32, %arg1 : i32, i32, i32
  }
}

module attributes {stable_mosaic.version = 11 : i64} {
  func.func @_attn_kernel(%arg0: i32, %arg1: i32, %arg2: i32, %arg3: memref<1x1x8x32xf32, #tpu.memory_space<vmem>>, %arg4: memref<1x1x8x32xf32, #tpu.memory_space<vmem>>, %arg5: memref<1x1x8x32xf32, #tpu.memory_space<vmem>>, %arg6: memref<1x1x8x32xf32, #tpu.memory_space<vmem>>) attributes {dimension_semantics = [#tpu.dimension_semantics<parallel>, #tpu.dimension_semantics<parallel>, #tpu.dimension_semantics<parallel>], iteration_bounds = array<i64: 1, 2, 1>, scalar_prefetch = 0 : i64, scratch_operands = 0 : i64, tpu.core_type = #tpu.core_type<tc>, window_params = [{transform_indices = @transform_0, window_bounds = array<i64: 1, 1, 8, 32>}, {transform_indices = @transform_1, window_bounds = array<i64: 1, 1, 8, 32>}, {transform_indices = @transform_2, window_bounds = array<i64: 1, 1, 8, 32>}, {transform_indices = @transform_3, window_bounds = array<i64: 1, 1, 8, 32>}]} {
    %c0 = arith.constant 0 : index
    %c0_0 = arith.constant 0 : index
    %c0_1 = arith.constant 0 : index
    %c0_2 = arith.constant 0 : index
    %0 = vector.load %arg3[%c0, %c0_0, %c0_1, %c0_2] : memref<1x1x8x32xf32, #tpu.memory_space<vmem>>, vector<1x1x8x32xf32>
    %1 = vector.shape_cast %0 : vector<1x1x8x32xf32> to vector<8x32xf32>
    %cst = arith.constant 0.353553385 : f32
    %2 = vector.broadcast %cst : f32 to vector<8x32xf32>
    %3 = arith.mulf %1, %2 : vector<8x32xf32>
    %c0_3 = arith.constant 0 : index
    %c0_4 = arith.constant 0 : index
    %c0_5 = arith.constant 0 : index
    %c0_6 = arith.constant 0 : index
    %4 = vector.load %arg4[%c0_3, %c0_4, %c0_5, %c0_6] : memref<1x1x8x32xf32, #tpu.memory_space<vmem>>, vector<1x1x8x32xf32>
    %5 = vector.shape_cast %4 : vector<1x1x8x32xf32> to vector<8x32xf32>
    %c0_7 = arith.constant 0 : index
    %c0_8 = arith.constant 0 : index
    %c0_9 = arith.constant 0 : index
    %c0_10 = arith.constant 0 : index
    %6 = vector.load %arg5[%c0_7, %c0_8, %c0_9, %c0_10] : memref<1x1x8x32xf32, #tpu.memory_space<vmem>>, vector<1x1x8x32xf32>
    %7 = vector.shape_cast %6 : vector<1x1x8x32xf32> to vector<8x32xf32>
    %cst_11 = arith.constant dense<0.000000e+00> : vector<32x32xf32>
    %8 = tpu.matmul %3, %5, %cst_11 {dimension_numbers = #tpu.dot_dimension_numbers<[0], [0], [1], [1], [0, 1, 1, 1], [], []>} : vector<8x32xf32>, vector<8x32xf32>, vector<32x32xf32> -> vector<32x32xf32>
    %cst_12 = arith.constant dense<0xFF800000> : vector<32xf32>
    %9 = vector.multi_reduction <maximumf>, %8, %cst_12 [1] : vector<32x32xf32> to vector<32xf32>
    %10 = vector.shape_cast %9 : vector<32xf32> to vector<32x1xf32>
    %11 = vector.broadcast %10 : vector<32x1xf32> to vector<32x32xf32>
    %12 = arith.subf %8, %11 : vector<32x32xf32>
    %13 = math.exp %12 : vector<32x32xf32>
    %cst_13 = arith.constant dense<0.000000e+00> : vector<32xf32>
    %14 = vector.multi_reduction <add>, %13, %cst_13 [1] : vector<32x32xf32> to vector<32xf32>
    %15 = vector.shape_cast %14 : vector<32xf32> to vector<32x1xf32>
    %16 = tpu.reciprocal %15 {approx = true} : vector<32x1xf32> -> vector<32x1xf32>
    %17 = vector.broadcast %16 : vector<32x1xf32> to vector<32x32xf32>
    %18 = arith.mulf %13, %17 : vector<32x32xf32>
    %cst_14 = arith.constant dense<0.000000e+00> : vector<8x32xf32>
    %19 = tpu.matmul %7, %18, %cst_14 {dimension_numbers = #tpu.dot_dimension_numbers<[1], [1], [0], [0], [0, 0, 1, 0], [], []>} : vector<8x32xf32>, vector<32x32xf32>, vector<8x32xf32> -> vector<8x32xf32>
    %c0_15 = arith.constant 0 : index
    %c0_16 = arith.constant 0 : index
    %c0_17 = arith.constant 0 : index
    %c0_18 = arith.constant 0 : index
    %20 = vector.load %arg6[%c0_15, %c0_16, %c0_17, %c0_18] : memref<1x1x8x32xf32, #tpu.memory_space<vmem>>, vector<1x1x8x32xf32>
    %21 = vector.shape_cast %20 : vector<1x1x8x32xf32> to vector<8x32xf32>
    %22 = vector.shape_cast %19 : vector<8x32xf32> to vector<1x1x8x32xf32>
    tpu.vector_store %arg6[%c0_15, %c0_16, %c0_17, %c0_18], %22 {strides = array<i32>} : memref<1x1x8x32xf32, #tpu.memory_space<vmem>>, vector<1x1x8x32xf32>,
    return
  }
  func.func @transform_0(%arg0: i32, %arg1: i32, %arg2: i32) -> (i32, i32, i32, i32) {
    %c0_i32 = arith.constant 0 : i32
    %c0_i32_0 = arith.constant 0 : i32
    return %arg0, %arg1, %c0_i32, %arg2 : i32, i32, i32, i32
  }
  func.func @transform_1(%arg0: i32, %arg1: i32, %arg2: i32) -> (i32, i32, i32, i32) {
    %c0_i32 = arith.constant 0 : i32
    %c0_i32_0 = arith.constant 0 : i32
    %c0_i32_1 = arith.constant 0 : i32
    return %arg0, %arg1, %c0_i32, %c0_i32_0 : i32, i32, i32, i32
  }
  func.func @transform_2(%arg0: i32, %arg1: i32, %arg2: i32) -> (i32, i32, i32, i32) {
    %c0_i32 = arith.constant 0 : i32
    %c0_i32_0 = arith.constant 0 : i32
    %c0_i32_1 = arith.constant 0 : i32
    return %arg0, %arg1, %c0_i32, %c0_i32_0 : i32, i32, i32, i32
  }
  func.func @transform_3(%arg0: i32, %arg1: i32, %arg2: i32) -> (i32, i32, i32, i32) {
    %c0_i32 = arith.constant 0 : i32
    %c0_i32_0 = arith.constant 0 : i32
    return %arg0, %arg1, %c0_i32, %arg2 : i32, i32, i32, i32
  }
}

module attributes {stable_mosaic.version = 11 : i64} {
  func.func @_conv_stats_kernel(%arg0: i32, %arg1: i32, %arg2: memref<1x16x32xf32, #tpu.memory_space<vmem>>, %arg3: memref<1x16x32xf32, #tpu.memory_space<vmem>>, %arg4: memref<32x16xf32, #tpu.memory_space<vmem>>, %arg5: memref<32x16xf32, #tpu.memory_space<vmem>>, %arg6: memref<32x1xf32, #tpu.memory_space<vmem>>, %arg7: memref<1x32x32xf32, #tpu.memory_space<vmem>>, %arg8: memref<1x32x1xf32, #tpu.memory_space<vmem>>, %arg9: memref<1x32x1xf32, #tpu.memory_space<vmem>>) attributes {dimension_semantics = [#tpu.dimension_semantics<parallel>, #tpu.dimension_semantics<arbitrary>], iteration_bounds = array<i64: 1, 1>, scalar_prefetch = 0 : i64, scratch_operands = 0 : i64, tpu.core_type = #tpu.core_type<tc>, window_params = [{transform_indices = @transform_0, window_bounds = array<i64: 1, 16, 32>}, {transform_indices = @transform_1, window_bounds = array<i64: 1, 16, 32>}, {pipeline_mode = #tpu.pipeline_mode<synchronous>, transform_indices = @transform_2, window_bounds = array<i64: 32, 16>}, {pipeline_mode = #tpu.pipeline_mode<synchronous>, transform_indices = @transform_3, window_bounds = array<i64: 32, 16>}, {pipeline_mode = #tpu.pipeline_mode<synchronous>, transform_indices = @transform_4, window_bounds = array<i64: 32, 1>}, {transform_indices = @transform_5, window_bounds = array<i64: 1, 32, 32>}, {transform_indices = @transform_6, window_bounds = array<i64: 1, 32, 1>}, {transform_indices = @transform_7, window_bounds = array<i64: 1, 32, 1>}]} {
    %c0_i32 = arith.constant 0 : i32
    %0 = arith.cmpi eq, %arg1, %c0_i32 : i32
    %1 = arith.extui %0 : i1 to i32
    %c0_i32_0 = arith.constant 0 : i32
    %2 = arith.cmpi ne, %1, %c0_i32_0 : i32
    scf.if %2 {
      %cst_30 = arith.constant 0.000000e+00 : f32
      %35 = vector.broadcast %cst_30 : f32 to vector<1x32x1xf32>
      %c0_31 = arith.constant 0 : index
      %c0_32 = arith.constant 0 : index
      %c0_33 = arith.constant 0 : index
      %36 = vector.load %arg8[%c0_31, %c0_32, %c0_33] : memref<1x32x1xf32, #tpu.memory_space<vmem>>, vector<1x32x1xf32>
      tpu.vector_store %arg8[%c0_31, %c0_32, %c0_33], %35 {strides = array<i32>} : memref<1x32x1xf32, #tpu.memory_space<vmem>>, vector<1x32x1xf32>,
      %cst_34 = arith.constant 0.000000e+00 : f32
      %37 = vector.broadcast %cst_34 : f32 to vector<1x32x1xf32>
      %c0_35 = arith.constant 0 : index
      %c0_36 = arith.constant 0 : index
      %c0_37 = arith.constant 0 : index
      %38 = vector.load %arg9[%c0_35, %c0_36, %c0_37] : memref<1x32x1xf32, #tpu.memory_space<vmem>>, vector<1x32x1xf32>
      tpu.vector_store %arg9[%c0_35, %c0_36, %c0_37], %37 {strides = array<i32>} : memref<1x32x1xf32, #tpu.memory_space<vmem>>, vector<1x32x1xf32>,
    } else {
    }
    %c0 = arith.constant 0 : index
    %c0_1 = arith.constant 0 : index
    %3 = vector.load %arg4[%c0, %c0_1] : memref<32x16xf32, #tpu.memory_space<vmem>>, vector<32x16xf32>
    %c0_2 = arith.constant 0 : index
    %c0_3 = arith.constant 0 : index
    %c0_4 = arith.constant 0 : index
    %4 = vector.load %arg2[%c0_2, %c0_3, %c0_4] : memref<1x16x32xf32, #tpu.memory_space<vmem>>, vector<1x16x32xf32>
    %5 = vector.shape_cast %4 : vector<1x16x32xf32> to vector<16x32xf32>
    %cst = arith.constant dense<0.000000e+00> : vector<32x32xf32>
    %6 = tpu.matmul %3, %5, %cst {dimension_numbers = #tpu.dot_dimension_numbers<[1], [0], [0], [1], [0, 0, 1, 1], [], []>} : vector<32x16xf32>, vector<16x32xf32>, vector<32x32xf32> -> vector<32x32xf32>
    %c0_5 = arith.constant 0 : index
    %c0_6 = arith.constant 0 : index
    %7 = vector.load %arg5[%c0_5, %c0_6] : memref<32x16xf32, #tpu.memory_space<vmem>>, vector<32x16xf32>
    %c0_7 = arith.constant 0 : index
    %c0_8 = arith.constant 0 : index
    %c0_9 = arith.constant 0 : index
    %8 = vector.load %arg3[%c0_7, %c0_8, %c0_9] : memref<1x16x32xf32, #tpu.memory_space<vmem>>, vector<1x16x32xf32>
    %9 = vector.shape_cast %8 : vector<1x16x32xf32> to vector<16x32xf32>
    %cst_10 = arith.constant dense<0.000000e+00> : vector<32x32xf32>
    %10 = tpu.matmul %7, %9, %cst_10 {dimension_numbers = #tpu.dot_dimension_numbers<[1], [0], [0], [1], [0, 0, 1, 1], [], []>} : vector<32x16xf32>, vector<16x32xf32>, vector<32x32xf32> -> vector<32x32xf32>
    %11 = arith.addf %6, %10 : vector<32x32xf32>
    %c0_11 = arith.constant 0 : index
    %c0_12 = arith.constant 0 : index
    %12 = vector.load %arg6[%c0_11, %c0_12] : memref<32x1xf32, #tpu.memory_space<vmem>>, vector<32x1xf32>
    %13 = vector.broadcast %12 : vector<32x1xf32> to vector<32x32xf32>
    %14 = arith.addf %11, %13 : vector<32x32xf32>
    %c0_13 = arith.constant 0 : index
    %c0_14 = arith.constant 0 : index
    %c0_15 = arith.constant 0 : index
    %15 = vector.load %arg7[%c0_13, %c0_14, %c0_15] : memref<1x32x32xf32, #tpu.memory_space<vmem>>, vector<1x32x32xf32>
    %16 = vector.shape_cast %15 : vector<1x32x32xf32> to vector<32x32xf32>
    %17 = vector.shape_cast %14 : vector<32x32xf32> to vector<1x32x32xf32>
    tpu.vector_store %arg7[%c0_13, %c0_14, %c0_15], %17 {strides = array<i32>} : memref<1x32x32xf32, #tpu.memory_space<vmem>>, vector<1x32x32xf32>,
    %c0_16 = arith.constant 0 : index
    %c0_17 = arith.constant 0 : index
    %c0_18 = arith.constant 0 : index
    %18 = vector.load %arg8[%c0_16, %c0_17, %c0_18] : memref<1x32x1xf32, #tpu.memory_space<vmem>>, vector<1x32x1xf32>
    %19 = vector.shape_cast %18 : vector<1x32x1xf32> to vector<32x1xf32>
    %cst_19 = arith.constant dense<0.000000e+00> : vector<32xf32>
    %20 = vector.multi_reduction <add>, %14, %cst_19 [1] : vector<32x32xf32> to vector<32xf32>
    %21 = vector.shape_cast %20 : vector<32xf32> to vector<32x1xf32>
    %22 = arith.addf %19, %21 : vector<32x1xf32>
    %c0_20 = arith.constant 0 : index
    %c0_21 = arith.constant 0 : index
    %c0_22 = arith.constant 0 : index
    %23 = vector.load %arg8[%c0_20, %c0_21, %c0_22] : memref<1x32x1xf32, #tpu.memory_space<vmem>>, vector<1x32x1xf32>
    %24 = vector.shape_cast %23 : vector<1x32x1xf32> to vector<32x1xf32>
    %25 = vector.shape_cast %22 : vector<32x1xf32> to vector<1x32x1xf32>
    tpu.vector_store %arg8[%c0_20, %c0_21, %c0_22], %25 {strides = array<i32>} : memref<1x32x1xf32, #tpu.memory_space<vmem>>, vector<1x32x1xf32>,
    %c0_23 = arith.constant 0 : index
    %c0_24 = arith.constant 0 : index
    %c0_25 = arith.constant 0 : index
    %26 = vector.load %arg9[%c0_23, %c0_24, %c0_25] : memref<1x32x1xf32, #tpu.memory_space<vmem>>, vector<1x32x1xf32>
    %27 = vector.shape_cast %26 : vector<1x32x1xf32> to vector<32x1xf32>
    %28 = arith.mulf %14, %14 : vector<32x32xf32>
    %cst_26 = arith.constant dense<0.000000e+00> : vector<32xf32>
    %29 = vector.multi_reduction <add>, %28, %cst_26 [1] : vector<32x32xf32> to vector<32xf32>
    %30 = vector.shape_cast %29 : vector<32xf32> to vector<32x1xf32>
    %31 = arith.addf %27, %30 : vector<32x1xf32>
    %c0_27 = arith.constant 0 : index
    %c0_28 = arith.constant 0 : index
    %c0_29 = arith.constant 0 : index
    %32 = vector.load %arg9[%c0_27, %c0_28, %c0_29] : memref<1x32x1xf32, #tpu.memory_space<vmem>>, vector<1x32x1xf32>
    %33 = vector.shape_cast %32 : vector<1x32x1xf32> to vector<32x1xf32>
    %34 = vector.shape_cast %31 : vector<32x1xf32> to vector<1x32x1xf32>
    tpu.vector_store %arg9[%c0_27, %c0_28, %c0_29], %34 {strides = array<i32>} : memref<1x32x1xf32, #tpu.memory_space<vmem>>, vector<1x32x1xf32>,
    return
  }
  func.func @transform_0(%arg0: i32, %arg1: i32) -> (i32, i32, i32) {
    %c0_i32 = arith.constant 0 : i32
    %c0_i32_0 = arith.constant 0 : i32
    return %arg0, %c0_i32, %arg1 : i32, i32, i32
  }
  func.func @transform_1(%arg0: i32, %arg1: i32) -> (i32, i32, i32) {
    %c0_i32 = arith.constant 0 : i32
    %c0_i32_0 = arith.constant 0 : i32
    return %arg0, %c0_i32, %arg1 : i32, i32, i32
  }
  func.func @transform_2(%arg0: i32, %arg1: i32) -> (i32, i32) {
    %c0_i32 = arith.constant 0 : i32
    %c0_i32_0 = arith.constant 0 : i32
    %c0_i32_1 = arith.constant 0 : i32
    return %c0_i32, %c0_i32_0 : i32, i32
  }
  func.func @transform_3(%arg0: i32, %arg1: i32) -> (i32, i32) {
    %c0_i32 = arith.constant 0 : i32
    %c0_i32_0 = arith.constant 0 : i32
    %c0_i32_1 = arith.constant 0 : i32
    return %c0_i32, %c0_i32_0 : i32, i32
  }
  func.func @transform_4(%arg0: i32, %arg1: i32) -> (i32, i32) {
    %c0_i32 = arith.constant 0 : i32
    %c0_i32_0 = arith.constant 0 : i32
    %c0_i32_1 = arith.constant 0 : i32
    return %c0_i32, %c0_i32_0 : i32, i32
  }
  func.func @transform_5(%arg0: i32, %arg1: i32) -> (i32, i32, i32) {
    %c0_i32 = arith.constant 0 : i32
    %c0_i32_0 = arith.constant 0 : i32
    return %arg0, %c0_i32, %arg1 : i32, i32, i32
  }
  func.func @transform_6(%arg0: i32, %arg1: i32) -> (i32, i32, i32) {
    %c0_i32 = arith.constant 0 : i32
    %c0_i32_0 = arith.constant 0 : i32
    %c0_i32_1 = arith.constant 0 : i32
    return %arg0, %c0_i32, %c0_i32_0 : i32, i32, i32
  }
  func.func @transform_7(%arg0: i32, %arg1: i32) -> (i32, i32, i32) {
    %c0_i32 = arith.constant 0 : i32
    %c0_i32_0 = arith.constant 0 : i32
    %c0_i32_1 = arith.constant 0 : i32
    return %arg0, %c0_i32, %c0_i32_0 : i32, i32, i32
  }
}

module attributes {stable_mosaic.version = 11 : i64} {
  func.func @_norm_act_kernel(%arg0: i32, %arg1: i32, %arg2: memref<1x32x32xf32, #tpu.memory_space<vmem>>, %arg3: memref<1x32x1xf32, #tpu.memory_space<vmem>>, %arg4: memref<1x32x1xf32, #tpu.memory_space<vmem>>, %arg5: memref<1x32x32xf32, #tpu.memory_space<vmem>>) attributes {dimension_semantics = [#tpu.dimension_semantics<parallel>, #tpu.dimension_semantics<parallel>], iteration_bounds = array<i64: 1, 1>, scalar_prefetch = 0 : i64, scratch_operands = 0 : i64, tpu.core_type = #tpu.core_type<tc>, window_params = [{transform_indices = @transform_0, window_bounds = array<i64: 1, 32, 32>}, {transform_indices = @transform_1, window_bounds = array<i64: 1, 32, 1>}, {transform_indices = @transform_2, window_bounds = array<i64: 1, 32, 1>}, {transform_indices = @transform_3, window_bounds = array<i64: 1, 32, 32>}]} {
    %c0 = arith.constant 0 : index
    %c0_0 = arith.constant 0 : index
    %c0_1 = arith.constant 0 : index
    %0 = vector.load %arg2[%c0, %c0_0, %c0_1] : memref<1x32x32xf32, #tpu.memory_space<vmem>>, vector<1x32x32xf32>
    %1 = vector.shape_cast %0 : vector<1x32x32xf32> to vector<32x32xf32>
    %c0_2 = arith.constant 0 : index
    %c0_3 = arith.constant 0 : index
    %c0_4 = arith.constant 0 : index
    %2 = vector.load %arg3[%c0_2, %c0_3, %c0_4] : memref<1x32x1xf32, #tpu.memory_space<vmem>>, vector<1x32x1xf32>
    %3 = vector.shape_cast %2 : vector<1x32x1xf32> to vector<32x1xf32>
    %cst = arith.constant 3.125000e-02 : f32
    %4 = vector.broadcast %cst : f32 to vector<32x1xf32>
    %5 = arith.mulf %3, %4 : vector<32x1xf32>
    %c0_5 = arith.constant 0 : index
    %c0_6 = arith.constant 0 : index
    %c0_7 = arith.constant 0 : index
    %6 = vector.load %arg4[%c0_5, %c0_6, %c0_7] : memref<1x32x1xf32, #tpu.memory_space<vmem>>, vector<1x32x1xf32>
    %7 = vector.shape_cast %6 : vector<1x32x1xf32> to vector<32x1xf32>
    %cst_8 = arith.constant 3.125000e-02 : f32
    %8 = vector.broadcast %cst_8 : f32 to vector<32x1xf32>
    %9 = arith.mulf %7, %8 : vector<32x1xf32>
    %10 = arith.mulf %5, %5 : vector<32x1xf32>
    %11 = arith.subf %9, %10 : vector<32x1xf32>
    %cst_9 = arith.constant 0.000000e+00 : f32
    %12 = vector.broadcast %cst_9 : f32 to vector<32x1xf32>
    %13 = arith.maximumf %11, %12 : vector<32x1xf32>
    %cst_10 = arith.constant 9.99999974E-6 : f32
    %14 = vector.broadcast %cst_10 : f32 to vector<32x1xf32>
    %15 = arith.addf %13, %14 : vector<32x1xf32>
    %16 = math.rsqrt %15 : vector<32x1xf32>
    %17 = vector.broadcast %5 : vector<32x1xf32> to vector<32x32xf32>
    %18 = arith.subf %1, %17 : vector<32x32xf32>
    %19 = vector.broadcast %16 : vector<32x1xf32> to vector<32x32xf32>
    %20 = arith.mulf %18, %19 : vector<32x32xf32>
    %cst_11 = arith.constant 0.000000e+00 : f32
    %21 = vector.broadcast %cst_11 : f32 to vector<32x32xf32>
    %22 = arith.maximumf %20, %21 : vector<32x32xf32>
    %c0_12 = arith.constant 0 : index
    %c0_13 = arith.constant 0 : index
    %c0_14 = arith.constant 0 : index
    %23 = vector.load %arg5[%c0_12, %c0_13, %c0_14] : memref<1x32x32xf32, #tpu.memory_space<vmem>>, vector<1x32x32xf32>
    %24 = vector.shape_cast %23 : vector<1x32x32xf32> to vector<32x32xf32>
    %25 = vector.shape_cast %22 : vector<32x32xf32> to vector<1x32x32xf32>
    tpu.vector_store %arg5[%c0_12, %c0_13, %c0_14], %25 {strides = array<i32>} : memref<1x32x32xf32, #tpu.memory_space<vmem>>, vector<1x32x32xf32>,
    return
  }
  func.func @transform_0(%arg0: i32, %arg1: i32) -> (i32, i32, i32) {
    %c0_i32 = arith.constant 0 : i32
    %c0_i32_0 = arith.constant 0 : i32
    return %arg0, %c0_i32, %arg1 : i32, i32, i32
  }
  func.func @transform_1(%arg0: i32, %arg1: i32) -> (i32, i32, i32) {
    %c0_i32 = arith.constant 0 : i32
    %c0_i32_0 = arith.constant 0 : i32
    %c0_i32_1 = arith.constant 0 : i32
    return %arg0, %c0_i32, %c0_i32_0 : i32, i32, i32
  }
  func.func @transform_2(%arg0: i32, %arg1: i32) -> (i32, i32, i32) {
    %c0_i32 = arith.constant 0 : i32
    %c0_i32_0 = arith.constant 0 : i32
    %c0_i32_1 = arith.constant 0 : i32
    return %arg0, %c0_i32, %c0_i32_0 : i32, i32, i32
  }
  func.func @transform_3(%arg0: i32, %arg1: i32) -> (i32, i32, i32) {
    %c0_i32 = arith.constant 0 : i32
    %c0_i32_0 = arith.constant 0 : i32
    return %arg0, %c0_i32, %arg1 : i32, i32, i32
  }
}

module attributes {stable_mosaic.version = 11 : i64} {
  func.func @_conv_kernel(%arg0: i32, %arg1: i32, %arg2: memref<1x32x32xf32, #tpu.memory_space<vmem>>, %arg3: memref<16x32xf32, #tpu.memory_space<vmem>>, %arg4: memref<16x1xf32, #tpu.memory_space<vmem>>, %arg5: memref<1x16x32xf32, #tpu.memory_space<vmem>>) attributes {dimension_semantics = [#tpu.dimension_semantics<parallel>, #tpu.dimension_semantics<parallel>], iteration_bounds = array<i64: 1, 1>, scalar_prefetch = 0 : i64, scratch_operands = 0 : i64, tpu.core_type = #tpu.core_type<tc>, window_params = [{transform_indices = @transform_0, window_bounds = array<i64: 1, 32, 32>}, {pipeline_mode = #tpu.pipeline_mode<synchronous>, transform_indices = @transform_1, window_bounds = array<i64: 16, 32>}, {pipeline_mode = #tpu.pipeline_mode<synchronous>, transform_indices = @transform_2, window_bounds = array<i64: 16, 1>}, {transform_indices = @transform_3, window_bounds = array<i64: 1, 16, 32>}]} {
    %c0 = arith.constant 0 : index
    %c0_0 = arith.constant 0 : index
    %0 = vector.load %arg3[%c0, %c0_0] : memref<16x32xf32, #tpu.memory_space<vmem>>, vector<16x32xf32>
    %c0_1 = arith.constant 0 : index
    %c0_2 = arith.constant 0 : index
    %c0_3 = arith.constant 0 : index
    %1 = vector.load %arg2[%c0_1, %c0_2, %c0_3] : memref<1x32x32xf32, #tpu.memory_space<vmem>>, vector<1x32x32xf32>
    %2 = vector.shape_cast %1 : vector<1x32x32xf32> to vector<32x32xf32>
    %cst = arith.constant dense<0.000000e+00> : vector<16x32xf32>
    %3 = tpu.matmul %0, %2, %cst {dimension_numbers = #tpu.dot_dimension_numbers<[1], [0], [0], [1], [0, 0, 1, 1], [], []>} : vector<16x32xf32>, vector<32x32xf32>, vector<16x32xf32> -> vector<16x32xf32>
    %c0_4 = arith.constant 0 : index
    %c0_5 = arith.constant 0 : index
    %4 = vector.load %arg4[%c0_4, %c0_5] : memref<16x1xf32, #tpu.memory_space<vmem>>, vector<16x1xf32>
    %5 = vector.broadcast %4 : vector<16x1xf32> to vector<16x32xf32>
    %6 = arith.addf %3, %5 : vector<16x32xf32>
    %c0_6 = arith.constant 0 : index
    %c0_7 = arith.constant 0 : index
    %c0_8 = arith.constant 0 : index
    %7 = vector.load %arg5[%c0_6, %c0_7, %c0_8] : memref<1x16x32xf32, #tpu.memory_space<vmem>>, vector<1x16x32xf32>
    %8 = vector.shape_cast %7 : vector<1x16x32xf32> to vector<16x32xf32>
    %9 = vector.shape_cast %6 : vector<16x32xf32> to vector<1x16x32xf32>
    tpu.vector_store %arg5[%c0_6, %c0_7, %c0_8], %9 {strides = array<i32>} : memref<1x16x32xf32, #tpu.memory_space<vmem>>, vector<1x16x32xf32>,
    return
  }
  func.func @transform_0(%arg0: i32, %arg1: i32) -> (i32, i32, i32) {
    %c0_i32 = arith.constant 0 : i32
    %c0_i32_0 = arith.constant 0 : i32
    return %arg0, %c0_i32, %arg1 : i32, i32, i32
  }
  func.func @transform_1(%arg0: i32, %arg1: i32) -> (i32, i32) {
    %c0_i32 = arith.constant 0 : i32
    %c0_i32_0 = arith.constant 0 : i32
    %c0_i32_1 = arith.constant 0 : i32
    return %c0_i32, %c0_i32_0 : i32, i32
  }
  func.func @transform_2(%arg0: i32, %arg1: i32) -> (i32, i32) {
    %c0_i32 = arith.constant 0 : i32
    %c0_i32_0 = arith.constant 0 : i32
    %c0_i32_1 = arith.constant 0 : i32
    return %c0_i32, %c0_i32_0 : i32, i32
  }
  func.func @transform_3(%arg0: i32, %arg1: i32) -> (i32, i32, i32) {
    %c0_i32 = arith.constant 0 : i32
    %c0_i32_0 = arith.constant 0 : i32
    return %arg0, %c0_i32, %arg1 : i32, i32, i32
  }
}

</mosaic_0001>

<bundles_post_ra>
// kernel: neg.3
= control target key start
LH: loop header
LB: loop body
LE: loop exit
PB: predicated region body
PF: predicated region fallthrough
CT: control target
= control target key end

     0   :  { %s72_s0 = inlined_call_operand.vmem [shape: f32[1,32,32], index: 0, kind: input, shape index: {}]   ;;  %s73_s1 = inlined_call_operand.vmem [shape: f32[1,32,32], index: 1, kind: output, shape index: {}]  }
   0x1   :  { %v2_v0 = vld [vmem:[%s72_s0] sm:$0xff]  ;;  %v32_v1 = vld [vmem:[%s72_s0 + $0x8] sm:$0xff]  ;;  %v34_v2 = vld [vmem:[%s72_s0 + $0x10] sm:$0xff] }
   0x2   :  { %v5_v3 = vxor.u32 2147483648, %v2_v0  ;;  %v12_v4 = vxor.u32 2147483648, %v32_v1  ;;  %v20_v5 = vxor.u32 2147483648, %v34_v2  ;;  %v36_v6 = vld [vmem:[%s72_s0 + $0x18] sm:$0xff] }
   0x3   :  { %v28_v7 = vxor.u32 2147483648, %v36_v6 }
   0x4   :  { %7 = vst [vmem:[%s73_s1] sm:$0xff] %v5_v3  ;;  %33 = vst [vmem:[%s73_s1 + $0x8] sm:$0xff] %v12_v4 }
   0x5   :  { %35 = vst [vmem:[%s73_s1 + $0x10] sm:$0xff] %v20_v5  ;;  %37 = vst [vmem:[%s73_s1 + $0x18] sm:$0xff] %v28_v7 }

// kernel: _lambda_.41
= control target key start
LH: loop header
LB: loop body
LE: loop exit
PB: predicated region body
PF: predicated region fallthrough
CT: control target
= control target key end

     0   :  { %vm29_vm0 = vcmask 1042432   ;;  %vm16_vm1 = vcmask 23552   ;;  %vm135_vm2 = vcmask 256000   ;;  %vm159_vm3 = vcmask 261120   ;;  %s238_s1 = inlined_call_operand.vmem [shape: f32[1,3,32], index: 1, kind: input, shape index: {}]   ;;  %s239_s0 = inlined_call_operand.vmem [shape: f32[1,32,3], index: 0, kind: input, shape index: {}]   ;;  %s240_s2 = inlined_call_operand.vmem [shape: f32[1,32,32], index: 2, kind: output, shape index: {}]  }
   0x1   :  { %v15_v0 = vld [vmem:[%s238_s1] sm:$0x7]  ;;  %v13_v2 = vld [vmem:[%s239_s0 + $0x10] sm:$0xff]  ;;  %v12_v5 = vld [vmem:[%s239_s0 + $0x8] sm:$0xff] }
   0x2   :  { %v11_v1 = vld [vmem:[%s239_s0] sm:$0xff]  ;;  %178 = vmatprep.subr.msk.mxu0 %vm29_vm0, %v15_v0  ;;  %186 = vmatprep.subr.msk.mxu1 %vm29_vm0, %v15_v0  ;;  %v120_v4 = vmul.f32 %v13_v2, %v13_v2  ;;  %v14_v6 = vld [vmem:[%s239_s0 + $0x18] sm:$0xff]  ;;  %v119_v8 = vmul.f32 %v12_v5, %v12_v5  ;;  %v134_v13 = vmul.f32 %v15_v0, %v15_v0 }
   0x3   :  { %v118_v3 = vmul.f32 %v11_v1, %v11_v1  ;;  %179 = vmatpush3.msk.msra.mxu0 %vm29_vm0, %v15_v0  ;;  %187 = vmatpush3.msk.msra.mxu1 %vm29_vm0, %v15_v0  ;;  %v121_v7 = vmul.f32 %v14_v6, %v14_v6 }
   0x4   :  { %180 = vmatprep.mubr.msk.f32.mxu0 %vm16_vm1, %v11_v1  ;;  %183 = vmatprep.mubr.msk.f32.mxu1 %vm16_vm1, %v13_v2  ;;  %v128_v9 = vsel %vm16_vm1, %v120_v4, 0.0  ;;  %v125_v12 = vsel %vm16_vm1, %v119_v8, 0.0  ;;  %v136_v14 = vsel %vm135_vm2, %v134_v13, 0.0 }
   0x5   :  { %v122_v10 = vsel %vm16_vm1, %v118_v3, 0.0  ;;  %181 = vmatmul.mubr.msk.f32.vlgmr.msra.gmra.mrb[0].mxu0 %vm16_vm1, %v12_v5  ;;  %184 = vmatmul.mubr.msk.f32.vlgmr.msra.gmra.mrb[0].mxu1 %vm16_vm1, %v14_v6  ;;  %v131_v11 = vsel %vm16_vm1, %v121_v7, 0.0  ;;  %v137_v15 = vrot.slane %v136_v14, 4 }
   0x6   :  { %129 = vadd.xlane.f32.xlu1 %v128_v9  ;;  %123 = vadd.xlane.f32.xlu0 %v122_v10 }
   0x7   :  { %v138_v16 = vadd.f32 %v137_v15, %v136_v14 }
   0x9   :  { %v139_v17 = vrot.slane %v138_v16, 2 }
   0xa   :  { %132 = vadd.xlane.f32.xlu1 %v131_v11  ;;  %126 = vadd.xlane.f32.xlu0 %v125_v12 }
   0xb   :  { %v140_v20 = vadd.f32 %v139_v17, %v138_v16 }
   0xd   :  { %v141_v21 = vrot.slane %v140_v20, 1 }
   0xf   :  { %v142_v29 = vadd.f32 %v141_v21, %v140_v20 }
  0x93   :  { %v130_v18 = vpop.xlane.xlu1 %129  ;;  %v124_v19 = vpop.xlane.xlu0 %123 }
  0x97   :  { %v133_v22 = vpop.xlane.xlu1 %132  ;;  %v127_v23 = vpop.xlane.xlu0 %126 }
  0xd8   :  { %v182_v24 = vpop.f32.mrb[0].mxu0  ;;  %v185_v25 = vpop.f32.mrb[0].mxu1 }
  0xd9   :  { %v144_v26 = vmul.f32 2.0, %v182_v24  ;;  %v146_v27 = vmul.f32 2.0, %v185_v25  ;;  %v99_v28 = vpop.f32.mrb[1].mxu0  ;;  %v109_v30 = vpop.f32.mrb[1].mxu1 }
  0xda   :  { %v143_v31 = vmul.f32 2.0, %v99_v28  ;;  %v145_v32 = vmul.f32 2.0, %v109_v30 }
  0xdb   :  { %v150_v33 = vsub.f32 %v133_v22, %v146_v27  ;;  %v148_v34 = vsub.f32 %v127_v23, %v144_v26 }
  0xdc   :  { %v147_v35 = vsub.f32 %v124_v19, %v143_v31  ;;  %v149_v36 = vsub.f32 %v130_v18, %v145_v32 }
  0xdd   :  { %v154_v37 = vadd.f32 %v150_v33, %v142_v29  ;;  %v152_v38 = vadd.f32 %v148_v34, %v142_v29 }
  0xde   :  { %v151_v39 = vadd.f32 %v147_v35, %v142_v29  ;;  %v153_v40 = vadd.f32 %v149_v36, %v142_v29 }
  0xdf   :  { %v158_v41 = vmax.f32 %v154_v37, 1e-12  ;;  %v156_v42 = vmax.f32 %v152_v38, 1e-12 }
  0xe0   :  { %v155_v43 = vmax.f32 %v151_v39, 1e-12  ;;  %v157_v44 = vmax.f32 %v153_v40, 1e-12 }
  0xe1   :  { %163 = vst.msk [vmem:[%s240_s2 + $0x18] sm:$0xff] %vm159_vm3, %v158_v41  ;;  %161 = vst.msk [vmem:[%s240_s2 + $0x8] sm:$0xff] %vm159_vm3, %v156_v42 }
  0xe2   :  { %160 = vst.msk [vmem:[%s240_s2] sm:$0xff] %vm159_vm3, %v155_v43  ;;  %162 = vst.msk [vmem:[%s240_s2 + $0x10] sm:$0xff] %vm159_vm3, %v157_v44 }

// kernel: _lambda_.42
= control target key start
LH: loop header
LB: loop body
LE: loop exit
PB: predicated region body
PF: predicated region fallthrough
CT: control target
= control target key end

     0   :  { %vm44_vm0 = vcmask 130048   ;;  %v180_v3 = vmov 0   ;;  %vm142_vm1 = vcmask 261120   ;;  %s247_s0 = inlined_call_operand.vmem [shape: f32[1,16,32], index: 0, kind: input, shape index: {}]   ;;  %s248_s1 = inlined_call_operand.vmem [shape: f32[32,16], index: 1, kind: input, shape index: {}]   ;;  %s249_s2 = inlined_call_operand.vmem [shape: f32[32,1], index: 2, kind: input, shape index: {}]   ;;  %s250_s3 = inlined_call_operand.vmem [shape: f32[1,32,32], index: 3, kind: output, shape index: {}]  }
   0x1   :  { %v18_v0 = vld [vmem:[%s247_s0] sm:$0xff]  ;;  %v19_v1 = vld [vmem:[%s247_s0 + $0x8] sm:$0xff]  ;;  %179 = vset.pattern.permute.xlu1 %v180_v3  ;;  %178 = vset.pattern.permute.xlu0 %v180_v3  ;;  %v16_v5 = vld [vmem:[%s248_s1 + $0x10] sm:$0xff] }
   0x2   :  { %v14_v2 = vld [vmem:[%s248_s1] sm:$0xff]  ;;  %v171_v4 = vpack.c.bf16 %v19_v1, %v18_v0  ;;  %168 = vmatprep.mubr.msk.f32.mxu1 %vm44_vm0, %v16_v5  ;;  %v22_v6 = vld [vmem:[%s249_s2 + $0x10] sm:$0xff]  ;;  %v15_v8 = vld [vmem:[%s248_s1 + $0x8] sm:$0xff] }
   0x3   :  { %165 = vmatprep.mubr.msk.f32.mxu0 %vm44_vm0, %v14_v2  ;;  %v20_v7 = vld [vmem:[%s249_s2] sm:$0xff]  ;;  %v17_v9 = vld [vmem:[%s248_s1 + $0x18] sm:$0xff]  ;;  %36 = vperm.xlu1 %179, %v22_v6   ;;  %v21_v11 = vld [vmem:[%s249_s2 + $0x8] sm:$0xff] }
   0x4   :  { %172 = vmatprep.subr.bf16.mxu0 %v171_v4  ;;  %175 = vmatprep.subr.bf16.mxu1 %v171_v4  ;;  %v23_v10 = vld [vmem:[%s249_s2 + $0x18] sm:$0xff] }
   0x5   :  { %174 = vmatpush3.bf16.msra.mxu0 %v171_v4  ;;  %176 = vmatpush3.bf16.msra.mxu1 %v171_v4 }
   0x6   :  { %26 = vperm.xlu0 %178, %v20_v7  }
   0x7   :  { %41 = vperm.xlu1 %179, %v23_v10  }
   0x8   :  { %166 = vmatmul.mubr.msk.f32.vlgmr.msra.gmra.mrb[0].mxu0 %vm44_vm0, %v15_v8  ;;  %169 = vmatmul.mubr.msk.f32.vlgmr.msra.gmra.mrb[0].mxu1 %vm44_vm0, %v17_v9 }
   0xa   :  { %31 = vperm.xlu0 %178, %v21_v11  }
  0x82   :  { %v37_v12 = vpop.permute.xlu1 %36 }
  0x85   :  { %v27_v13 = vpop.permute.xlu0 %26 }
  0x86   :  { %v42_v14 = vpop.permute.xlu1 %41 }
  0x89   :  { %v32_v15 = vpop.permute.xlu0 %31 }
  0xdb   :  { %v167_v16 = vpop.f32.mrb[0].mxu0  ;;  %v170_v17 = vpop.f32.mrb[0].mxu1 }
  0xdc   :  { %v129_v18 = vadd.f32 %v167_v16, %v32_v15  ;;  %v139_v19 = vadd.f32 %v170_v17, %v42_v14  ;;  %v123_v20 = vpop.f32.mrb[1].mxu0  ;;  %v133_v21 = vpop.f32.mrb[1].mxu1 }
  0xdd   :  { %v124_v22 = vadd.f32 %v123_v20, %v27_v13  ;;  %v134_v23 = vadd.f32 %v133_v21, %v37_v12 }
  0xde   :  { %144 = vst.msk [vmem:[%s250_s3 + $0x8] sm:$0xff] %vm142_vm1, %v129_v18  ;;  %146 = vst.msk [vmem:[%s250_s3 + $0x18] sm:$0xff] %vm142_vm1, %v139_v19 }
  0xdf   :  { %143 = vst.msk [vmem:[%s250_s3] sm:$0xff] %vm142_vm1, %v124_v22  ;;  %145 = vst.msk [vmem:[%s250_s3 + $0x10] sm:$0xff] %vm142_vm1, %v134_v23 }

// kernel: _lambda_.44
= control target key start
LH: loop header
LB: loop body
LE: loop exit
PB: predicated region body
PF: predicated region fallthrough
CT: control target
= control target key end

     0   :  { %v180_v0 = vmov 0   ;;  %vm156_vm9 = vcmask 261120   ;;  %s270_s2 = inlined_call_operand.vmem [shape: f32[1,16,1], index: 2, kind: input, shape index: {}]   ;;  %s271_s3 = inlined_call_operand.vmem [shape: f32[1,16,1], index: 3, kind: input, shape index: {}]   ;;  %s272_s0 = inlined_call_operand.vmem [shape: f32[1,16,32], index: 0, kind: input, shape index: {}]   ;;  %s273_s1 = inlined_call_operand.vmem [shape: f32[1,6,16,32], index: 1, kind: input, shape index: {}]   ;;  %s274_s4 = inlined_call_operand.vmem [shape: f32[1,16,32], index: 4, kind: output, shape index: {}]  }
   0x1   :  { %174 = vset.pattern.permute.xlu0 %v180_v0  ;;  %v19_v1 = vld [vmem:[%s270_s2] sm:$0xff]  ;;  %v20_v2 = vld [vmem:[%s270_s2 + $0x8] sm:$0xff]  ;;  %175 = vset.pattern.permute.xlu1 %v180_v0  ;;  %v163_v21 = vld [vmem:[%s273_s1 + $0x10] sm:$0xff] }
   0x2   :  { %v23_v3 = vld [vmem:[%s271_s3] sm:$0xff]  ;;  %v21_v4 = vmul.f32 0.0052083335, %v19_v1  ;;  %v24_v5 = vld [vmem:[%s271_s3 + $0x8] sm:$0xff]  ;;  %v22_v7 = vmul.f32 0.0052083335, %v20_v2 }
   0x3   :  { %v25_v6 = vmul.f32 0.0052083335, %v23_v3  ;;  %v26_v8 = vmul.f32 0.0052083335, %v24_v5  ;;  %v17_v19 = vld [vmem:[%s272_s0] sm:$0xff]  ;;  %v167_v23 = vld [vmem:[%s273_s1 + $0x30] sm:$0xff] }
   0x4   :  { %43 = vperm.xlu0 %174, %v21_v4   ;;  %v27_v9 = vmul.f32 %v21_v4, %v21_v4  ;;  %v28_v10 = vmul.f32 %v22_v7, %v22_v7  ;;  %v37_v20 = vld [vmem:[%s273_s1] sm:$0xff]  ;;  %v171_v25 = vld [vmem:[%s273_s1 + $0x50] sm:$0xff]  ;;  %v74_v28 = vadd.f32 %v163_v21, %v17_v19  ;;  %v108_v30 = vadd.f32 %v167_v23, %v17_v19  ;;  %v18_v33 = vld [vmem:[%s272_s0 + $0x8] sm:$0xff] }
   0x5   :  { %v165_v22 = vld [vmem:[%s273_s1 + $0x20] sm:$0xff]  ;;  %v39_v27 = vadd.f32 %v37_v20, %v17_v19  ;;  %v142_v32 = vadd.f32 %v171_v25, %v17_v19  ;;  %v38_v34 = vld [vmem:[%s273_s1 + $0x8] sm:$0xff]  ;;  %v164_v35 = vld [vmem:[%s273_s1 + $0x18] sm:$0xff] }
   0x6   :  { %v29_v11 = vsub.f32 %v25_v6, %v27_v9  ;;  %v30_v12 = vsub.f32 %v26_v8, %v28_v10  ;;  %v169_v24 = vld [vmem:[%s273_s1 + $0x40] sm:$0xff]  ;;  %v91_v29 = vadd.f32 %v165_v22, %v17_v19  ;;  %v166_v36 = vld [vmem:[%s273_s1 + $0x28] sm:$0xff]  ;;  %v168_v41 = vld [vmem:[%s273_s1 + $0x38] sm:$0xff]  ;;  %v40_v46 = vadd.f32 %v38_v34, %v18_v33 }
   0x7   :  { %v125_v31 = vadd.f32 %v169_v24, %v17_v19  ;;  %v170_v42 = vld [vmem:[%s273_s1 + $0x48] sm:$0xff]  ;;  %v172_v43 = vld [vmem:[%s273_s1 + $0x58] sm:$0xff]  ;;  %v75_v47 = vadd.f32 %v164_v35, %v18_v33  ;;  %v92_v49 = vadd.f32 %v166_v36, %v18_v33  ;;  %v109_v50 = vadd.f32 %v168_v41, %v18_v33 }
   0x8   :  { %v31_v13 = vmax.f32 %v29_v11, 0.0  ;;  %48 = vperm.xlu0 %174, %v22_v7   ;;  %v32_v14 = vmax.f32 %v30_v12, 0.0  ;;  %v126_v51 = vadd.f32 %v170_v42, %v18_v33  ;;  %v143_v52 = vadd.f32 %v172_v43, %v18_v33 }
   0xa   :  { %v33_v15 = vadd.f32 1e-05, %v31_v13  ;;  %v34_v16 = vadd.f32 1e-05, %v32_v14 }
   0xc   :  { %176 = vrsqrt.f32 %v33_v15 }
   0xd   :  { %178 = vrsqrt.f32 %v34_v16 }
  0x16   :  { %v177_v17 = vpop.eup %176 }
  0x17   :  { %55 = vperm.xlu1 %175, %v177_v17   ;;  %v179_v18 = vpop.eup %178 }
  0x1b   :  { %60 = vperm.xlu1 %175, %v179_v18  }
  0x83   :  { %v44_v26 = vpop.permute.xlu0 %43 }
  0x84   :  { %v51_v37 = vsub.f32 %v39_v27, %v44_v26  ;;  %v76_v38 = vsub.f32 %v74_v28, %v44_v26  ;;  %v93_v39 = vsub.f32 %v91_v29, %v44_v26  ;;  %v110_v40 = vsub.f32 %v108_v30, %v44_v26 }
  0x85   :  { %v127_v44 = vsub.f32 %v125_v31, %v44_v26  ;;  %v144_v45 = vsub.f32 %v142_v32, %v44_v26 }
  0x87   :  { %v49_v48 = vpop.permute.xlu0 %48 }
  0x88   :  { %v52_v58 = vsub.f32 %v40_v46, %v49_v48  ;;  %v77_v59 = vsub.f32 %v75_v47, %v49_v48  ;;  %v94_v3 = vsub.f32 %v92_v49, %v49_v48  ;;  %v111_v4 = vsub.f32 %v109_v50, %v49_v48 }
  0x89   :  { %v128_v7 = vsub.f32 %v126_v51, %v49_v48  ;;  %v145_v23 = vsub.f32 %v143_v52, %v49_v48 }
  0x96   :  { %v56_v53 = vpop.permute.xlu1 %55 }
  0x97   :  { %v63_v54 = vmul.f32 %v56_v53, %v51_v37  ;;  %v78_v55 = vmul.f32 %v76_v38, %v56_v53  ;;  %v95_v56 = vmul.f32 %v93_v39, %v56_v53  ;;  %v112_v57 = vmul.f32 %v110_v40, %v56_v53 }
  0x98   :  { %v129_v60 = vmul.f32 %v127_v44, %v56_v53  ;;  %v146_v61 = vmul.f32 %v144_v45, %v56_v53 }
  0x99   :  { %vm65_vm0 = vcmp.ge.f32.partialorder %v63_v54, 0.0  ;;  %v67_v62 = vmul.f32 0.2, %v63_v54  ;;  %vm80_vm1 = vcmp.ge.f32.partialorder %v78_v55, 0.0  ;;  %v82_v63 = vmul.f32 0.2, %v78_v55 }
  0x9a   :  { %vm97_vm2 = vcmp.ge.f32.partialorder %v95_v56, 0.0  ;;  %v99_v0 = vmul.f32 0.2, %v95_v56  ;;  %vm114_vm3 = vcmp.ge.f32.partialorder %v112_v57, 0.0  ;;  %v116_v1 = vmul.f32 0.2, %v112_v57  ;;  %v61_v2 = vpop.permute.xlu1 %60 }
  0x9b   :  { %v69_v5 = vsel %vm65_vm0, %v63_v54, %v67_v62  ;;  %v84_v6 = vsel %vm80_vm1, %v78_v55, %v82_v63  ;;  %vm131_vm4 = vcmp.ge.f32.partialorder %v129_v60, 0.0  ;;  %v133_v9 = vmul.f32 0.2, %v129_v60 }
  0x9c   :  { %v86_v8 = vmax.f32 %v69_v5, %v84_v6  ;;  %v101_v10 = vsel %vm97_vm2, %v95_v56, %v99_v0  ;;  %v118_v11 = vsel %vm114_vm3, %v112_v57, %v116_v1  ;;  %v64_v12 = vmul.f32 %v61_v2, %v52_v58 }
  0x9d   :  { %v79_v13 = vmul.f32 %v77_v59, %v61_v2  ;;  %vm148_vm5 = vcmp.ge.f32.partialorder %v146_v61, 0.0  ;;  %v96_v15 = vmul.f32 %v94_v3, %v61_v2  ;;  %v113_v16 = vmul.f32 %v111_v4, %v61_v2 }
  0x9e   :  { %v103_v14 = vmax.f32 %v86_v8, %v101_v10  ;;  %v150_v17 = vmul.f32 0.2, %v146_v61  ;;  %vm66_vm6 = vcmp.ge.f32.partialorder %v64_v12, 0.0  ;;  %v68_v18 = vmul.f32 0.2, %v64_v12 }
  0x9f   :  { %vm81_vm7 = vcmp.ge.f32.partialorder %v79_v13, 0.0  ;;  %v83_v20 = vmul.f32 0.2, %v79_v13  ;;  %v100_v21 = vmul.f32 0.2, %v96_v15  ;;  %v130_v22 = vmul.f32 %v128_v7, %v61_v2 }
  0xa0   :  { %v120_v19 = vmax.f32 %v103_v14, %v118_v11  ;;  %v135_v24 = vsel %vm131_vm4, %v129_v60, %v133_v9  ;;  %v70_v25 = vsel %vm66_vm6, %v64_v12, %v68_v18  ;;  %vm98_vm8 = vcmp.ge.f32.partialorder %v96_v15, 0.0 }
  0xa1   :  { %v85_v27 = vsel %vm81_vm7, %v79_v13, %v83_v20  ;;  %v117_v28 = vmul.f32 0.2, %v113_v16  ;;  %v152_v29 = vsel %vm148_vm5, %v146_v61, %v150_v17  ;;  %vm115_vm10 = vcmp.ge.f32.partialorder %v113_v16, 0.0 }
  0xa2   :  { %v137_v26 = vmax.f32 %v120_v19, %v135_v24  ;;  %v87_v30 = vmax.f32 %v70_v25, %v85_v27  ;;  %v147_v31 = vmul.f32 %v145_v23, %v61_v2  ;;  %v102_v33 = vsel %vm98_vm8, %v96_v15, %v100_v21 }
  0xa3   :  { %v134_v34 = vmul.f32 0.2, %v130_v22  ;;  %vm132_vm11 = vcmp.ge.f32.partialorder %v130_v22, 0.0  ;;  %v119_v36 = vsel %vm115_vm10, %v113_v16, %v117_v28 }
  0xa4   :  { %v154_v32 = vmax.f32 %v137_v26, %v152_v29  ;;  %v104_v35 = vmax.f32 %v87_v30, %v102_v33  ;;  %v151_v37 = vmul.f32 0.2, %v147_v31  ;;  %vm149_vm12 = vcmp.ge.f32.partialorder %v147_v31, 0.0 }
  0xa5   :  { %v136_v39 = vsel %vm132_vm11, %v130_v22, %v134_v34 }
  0xa6   :  { %157 = vst.msk [vmem:[%s274_s4] sm:$0xff] %vm156_vm9, %v154_v32  ;;  %v121_v38 = vmax.f32 %v104_v35, %v119_v36  ;;  %v153_v41 = vsel %vm149_vm12, %v147_v31, %v151_v37 }
  0xa8   :  { %v138_v40 = vmax.f32 %v121_v38, %v136_v39 }
  0xaa   :  { %v155_v42 = vmax.f32 %v138_v40, %v153_v41 }
  0xac   :  { %158 = vst.msk [vmem:[%s274_s4 + $0x8] sm:$0xff] %vm156_vm9, %v155_v42 }

// kernel: _lambda_.43
= control target key start
LH: loop header
LB: loop body
LE: loop exit
PB: predicated region body
PF: predicated region fallthrough
CT: control target
= control target key end

     0   :  { %vm28_vm0 = vcmask 261120   ;;  %vm17_vm1 = vcmask 7168   ;;  %v190_v62 = vmov 0.0   ;;  %s337_s0 = inlined_call_operand.vmem [shape: f32[1,16,32], index: 0, kind: input, shape index: {}]   ;;  %s338_s1 = inlined_call_operand.vmem [shape: f32[1,6,16,32], index: 1, kind: input, shape index: {}]   ;;  %s339_s2 = inlined_call_operand.vmem [shape: f32[1,16,1], index: 2, kind: output, shape index: {0}]   ;;  %s340_s3 = inlined_call_operand.vmem [shape: f32[1,16,1], index: 3, kind: output, shape index: {1}]  }
   0x1   :  { %v214_v0 = vld [vmem:[%s337_s0] sm:$0xff]  ;;  %v222_v2 = vld [vmem:[%s337_s0 + $0x8] sm:$0xff]  ;;  %v179_v6 = vld [vmem:[%s338_s1 + $0x10] sm:$0xff]  ;;  %18 = vst.msk [vmem:[%s339_s2] sm:$0xff] %vm17_vm1, %v190_v62 }
   0x2   :  { %v24_v1 = vld [vmem:[%s338_s1] sm:$0xff]  ;;  %v25_v4 = vld [vmem:[%s338_s1 + $0x8] sm:$0xff]  ;;  %v180_v10 = vld [vmem:[%s338_s1 + $0x18] sm:$0xff]  ;;  %v46_v13 = vadd.f32 %v179_v6, %v214_v0  ;;  %19 = vst.msk [vmem:[%s339_s2 + $0x8] sm:$0xff] %vm17_vm1, %v190_v62 }
   0x3   :  { %v26_v3 = vadd.f32 %v24_v1, %v214_v0  ;;  %v27_v5 = vadd.f32 %v25_v4, %v222_v2  ;;  %v47_v15 = vadd.f32 %v180_v10, %v222_v2  ;;  %v181_v18 = vld [vmem:[%s338_s1 + $0x20] sm:$0xff]  ;;  %v182_v21 = vld [vmem:[%s338_s1 + $0x28] sm:$0xff]  ;;  %v183_v28 = vld [vmem:[%s338_s1 + $0x30] sm:$0xff]  ;;  %20 = vst.msk [vmem:[%s340_s3] sm:$0xff] %vm17_vm1, %v190_v62 }
   0x4   :  { %v48_v16 = vsel %vm28_vm0, %v46_v13, 0.0  ;;  %v54_v17 = vmul.f32 %v46_v13, %v46_v13  ;;  %v69_v23 = vadd.f32 %v181_v18, %v214_v0  ;;  %v70_v25 = vadd.f32 %v182_v21, %v222_v2  ;;  %v184_v31 = vld [vmem:[%s338_s1 + $0x38] sm:$0xff]  ;;  %v185_v38 = vld [vmem:[%s338_s1 + $0x40] sm:$0xff]  ;;  %v186_v41 = vld [vmem:[%s338_s1 + $0x48] sm:$0xff]  ;;  %21 = vst.msk [vmem:[%s340_s3 + $0x8] sm:$0xff] %vm17_vm1, %v190_v62 }
   0x5   :  { %v29_v7 = vsel %vm28_vm0, %v26_v3, 0.0  ;;  %v35_v8 = vmul.f32 %v26_v3, %v26_v3  ;;  %v36_v9 = vmul.f32 %v27_v5, %v27_v5  ;;  %v32_v12 = vsel %vm28_vm0, %v27_v5, 0.0  ;;  %v187_v48 = vld [vmem:[%s338_s1 + $0x50] sm:$0xff]  ;;  %v188_v51 = vld [vmem:[%s338_s1 + $0x58] sm:$0xff] }
   0x6   :  { %30 = vadd.xlane.f32.xlu0 %v29_v7  ;;  %v51_v19 = vsel %vm28_vm0, %v47_v15, 0.0  ;;  %v55_v20 = vmul.f32 %v47_v15, %v47_v15  ;;  %v56_v22 = vsel %vm28_vm0, %v54_v17, 0.0  ;;  %v71_v26 = vsel %vm28_vm0, %v69_v23, 0.0 }
   0x7   :  { %v37_v11 = vsel %vm28_vm0, %v35_v8, 0.0  ;;  %v40_v14 = vsel %vm28_vm0, %v36_v9, 0.0  ;;  %v77_v27 = vmul.f32 %v69_v23, %v69_v23  ;;  %v74_v29 = vsel %vm28_vm0, %v70_v25, 0.0 }
   0x8   :  { %38 = vadd.xlane.f32.xlu1 %v37_v11  ;;  %v59_v24 = vsel %vm28_vm0, %v55_v20, 0.0  ;;  %v78_v30 = vmul.f32 %v70_v25, %v70_v25  ;;  %v92_v33 = vadd.f32 %v183_v28, %v214_v0  ;;  %v93_v35 = vadd.f32 %v184_v31, %v222_v2 }
   0x9   :  { %v79_v32 = vsel %vm28_vm0, %v77_v27, 0.0  ;;  %v115_v43 = vadd.f32 %v185_v38, %v214_v0  ;;  %v116_v45 = vadd.f32 %v186_v41, %v222_v2  ;;  %v138_v53 = vadd.f32 %v187_v48, %v214_v0 }
   0xa   :  { %33 = vadd.xlane.f32.xlu0 %v32_v12  ;;  %v82_v34 = vsel %vm28_vm0, %v78_v30, 0.0  ;;  %v94_v36 = vsel %vm28_vm0, %v92_v33, 0.0  ;;  %v100_v37 = vmul.f32 %v92_v33, %v92_v33  ;;  %v97_v39 = vsel %vm28_vm0, %v93_v35, 0.0  ;;  %v165_v41 = vld [vmem:[%s340_s3] sm:$0xff] }
   0xb   :  { %v101_v40 = vmul.f32 %v93_v35, %v93_v35  ;;  %v117_v46 = vsel %vm28_vm0, %v115_v43, 0.0  ;;  %v123_v47 = vmul.f32 %v115_v43, %v115_v43  ;;  %v120_v49 = vsel %vm28_vm0, %v116_v45, 0.0  ;;  %v159_v35 = vld [vmem:[%s339_s2 + $0x8] sm:$0xff] }
   0xc   :  { %41 = vadd.xlane.f32.xlu1 %v40_v14  ;;  %v102_v42 = vsel %vm28_vm0, %v100_v37, 0.0  ;;  %v124_v50 = vmul.f32 %v116_v45, %v116_v45  ;;  %v139_v55 = vadd.f32 %v188_v51, %v222_v2  ;;  %v140_v56 = vsel %vm28_vm0, %v138_v53, 0.0 }
   0xd   :  { %v105_v44 = vsel %vm28_vm0, %v101_v40, 0.0  ;;  %v125_v52 = vsel %vm28_vm0, %v123_v47, 0.0  ;;  %v146_v57 = vmul.f32 %v138_v53, %v138_v53 }
   0xe   :  { %49 = vadd.xlane.f32.xlu0 %v48_v16  ;;  %v128_v54 = vsel %vm28_vm0, %v124_v50, 0.0  ;;  %v143_v58 = vsel %vm28_vm0, %v139_v55, 0.0  ;;  %v147_v59 = vmul.f32 %v139_v55, %v139_v55 }
   0xf   :  { %v148_v60 = vsel %vm28_vm0, %v146_v57, 0.0 }
  0x10   :  { %52 = vadd.xlane.f32.xlu1 %v51_v19  ;;  %v151_v61 = vsel %vm28_vm0, %v147_v59, 0.0 }
  0x12   :  { %57 = vadd.xlane.f32.xlu0 %v56_v22 }
  0x14   :  { %60 = vadd.xlane.f32.xlu1 %v59_v24 }
  0x16   :  { %72 = vadd.xlane.f32.xlu0 %v71_v26 }
  0x18   :  { %75 = vadd.xlane.f32.xlu1 %v74_v29  ;;  %v158_v29 = vld [vmem:[%s339_s2] sm:$0xff] }
  0x1a   :  { %80 = vadd.xlane.f32.xlu0 %v79_v32 }
  0x1c   :  { %83 = vadd.xlane.f32.xlu1 %v82_v34 }
  0x1e   :  { %95 = vadd.xlane.f32.xlu0 %v94_v36 }
  0x20   :  { %98 = vadd.xlane.f32.xlu1 %v97_v39 }
  0x22   :  { %103 = vadd.xlane.f32.xlu0 %v102_v42 }
  0x24   :  { %106 = vadd.xlane.f32.xlu1 %v105_v44 }
  0x26   :  { %118 = vadd.xlane.f32.xlu0 %v117_v46  ;;  %v166_v46 = vld [vmem:[%s340_s3 + $0x8] sm:$0xff] }
  0x28   :  { %121 = vadd.xlane.f32.xlu1 %v120_v49 }
  0x2a   :  { %126 = vadd.xlane.f32.xlu0 %v125_v52 }
  0x2c   :  { %129 = vadd.xlane.f32.xlu1 %v128_v54 }
  0x2e   :  { %141 = vadd.xlane.f32.xlu0 %v140_v56 }
  0x30   :  { %144 = vadd.xlane.f32.xlu1 %v143_v58 }
  0x32   :  { %149 = vadd.xlane.f32.xlu0 %v148_v60 }
  0x34   :  { %152 = vadd.xlane.f32.xlu1 %v151_v61 }
  0x93   :  { %v31_v63 = vpop.xlane.xlu0 %30 }
  0x95   :  { %v39_v0 = vpop.xlane.xlu1 %38 }
  0x97   :  { %v34_v1 = vpop.xlane.xlu0 %33 }
  0x99   :  { %v42_v2 = vpop.xlane.xlu1 %41 }
  0x9b   :  { %v50_v3 = vpop.xlane.xlu0 %49 }
  0x9c   :  { %v62_v16 = vadd.f32 %v50_v3, %v31_v63 }
  0x9d   :  { %v53_v4 = vpop.xlane.xlu1 %52 }
  0x9e   :  { %v63_v18 = vadd.f32 %v53_v4, %v34_v1 }
  0x9f   :  { %v58_v5 = vpop.xlane.xlu0 %57 }
  0xa0   :  { %v64_v21 = vadd.f32 %v58_v5, %v39_v0 }
  0xa1   :  { %v61_v6 = vpop.xlane.xlu1 %60 }
  0xa2   :  { %v65_v25 = vadd.f32 %v61_v6, %v42_v2 }
  0xa3   :  { %v73_v7 = vpop.xlane.xlu0 %72 }
  0xa4   :  { %v85_v19 = vadd.f32 %v73_v7, %v62_v16 }
  0xa5   :  { %v76_v8 = vpop.xlane.xlu1 %75 }
  0xa6   :  { %v86_v22 = vadd.f32 %v76_v8, %v63_v18 }
  0xa7   :  { %v81_v9 = vpop.xlane.xlu0 %80 }
  0xa8   :  { %v87_v26 = vadd.f32 %v81_v9, %v64_v21 }
  0xa9   :  { %v84_v10 = vpop.xlane.xlu1 %83 }
  0xaa   :  { %v88_v31 = vadd.f32 %v84_v10, %v65_v25 }
  0xab   :  { %v96_v11 = vpop.xlane.xlu0 %95 }
  0xac   :  { %v108_v23 = vadd.f32 %v96_v11, %v85_v19 }
  0xad   :  { %v99_v12 = vpop.xlane.xlu1 %98 }
  0xae   :  { %v109_v27 = vadd.f32 %v99_v12, %v86_v22 }
  0xaf   :  { %v104_v13 = vpop.xlane.xlu0 %103 }
  0xb0   :  { %v110_v32 = vadd.f32 %v104_v13, %v87_v26 }
  0xb1   :  { %v107_v14 = vpop.xlane.xlu1 %106 }
  0xb2   :  { %v111_v37 = vadd.f32 %v107_v14, %v88_v31 }
  0xb3   :  { %v119_v15 = vpop.xlane.xlu0 %118 }
  0xb4   :  { %v131_v28 = vadd.f32 %v119_v15, %v108_v23 }
  0xb5   :  { %v122_v17 = vpop.xlane.xlu1 %121 }
  0xb6   :  { %v132_v33 = vadd.f32 %v122_v17, %v109_v27 }
  0xb7   :  { %v127_v20 = vpop.xlane.xlu0 %126 }
  0xb8   :  { %v133_v38 = vadd.f32 %v127_v20, %v110_v32 }
  0xb9   :  { %v130_v24 = vpop.xlane.xlu1 %129 }
  0xba   :  { %v134_v43 = vadd.f32 %v130_v24, %v111_v37 }
  0xbb   :  { %v142_v30 = vpop.xlane.xlu0 %141 }
  0xbc   :  { %v154_v34 = vadd.f32 %v142_v30, %v131_v28 }
  0xbd   :  { %v145_v36 = vpop.xlane.xlu1 %144 }
  0xbe   :  { %v160_v39 = vadd.f32 %v158_v29, %v154_v34  ;;  %v155_v40 = vadd.f32 %v145_v36, %v132_v33 }
  0xbf   :  { %v150_v42 = vpop.xlane.xlu0 %149 }
  0xc0   :  { %163 = vst.msk [vmem:[%s339_s2] sm:$0xff] %vm17_vm1, %v160_v39  ;;  %v161_v44 = vadd.f32 %v159_v35, %v155_v40  ;;  %v156_v45 = vadd.f32 %v150_v42, %v133_v38 }
  0xc1   :  { %v153_v47 = vpop.xlane.xlu1 %152 }
  0xc2   :  { %164 = vst.msk [vmem:[%s339_s2 + $0x8] sm:$0xff] %vm17_vm1, %v161_v44  ;;  %v167_v48 = vadd.f32 %v165_v41, %v156_v45  ;;  %v157_v49 = vadd.f32 %v153_v47, %v134_v43 }
  0xc4   :  { %169 = vst.msk [vmem:[%s340_s3] sm:$0xff] %vm17_vm1, %v167_v48  ;;  %v168_v50 = vadd.f32 %v166_v46, %v157_v49 }
  0xc6   :  { %170 = vst.msk [vmem:[%s340_s3 + $0x8] sm:$0xff] %vm17_vm1, %v168_v50 }

// kernel: _lambda_.45
= control target key start
LH: loop header
LB: loop body
LE: loop exit
PB: predicated region body
PF: predicated region fallthrough
CT: control target
= control target key end

     0   :  { %vm72_vm0 = vcmask 130048   ;;  %v258_v3 = vmov 0   ;;  %vm202_vm1 = vcmask 261120   ;;  %s373_s0 = inlined_call_operand.vmem [shape: f32[1,16,32], index: 0, kind: input, shape index: {}]   ;;  %s374_s1 = inlined_call_operand.vmem [shape: f32[64,16], index: 1, kind: input, shape index: {}]   ;;  %s375_s2 = inlined_call_operand.vmem [shape: f32[64,1], index: 2, kind: input, shape index: {}]   ;;  %s376_s3 = inlined_call_operand.vmem [shape: f32[1,64,32], index: 3, kind: output, shape index: {}]  }
   0x1   :  { %v22_v0 = vld [vmem:[%s373_s0] sm:$0xff]  ;;  %v23_v1 = vld [vmem:[%s373_s0 + $0x8] sm:$0xff]  ;;  %257 = vset.pattern.permute.xlu1 %v258_v3  ;;  %256 = vset.pattern.permute.xlu0 %v258_v3  ;;  %v26_v6 = vld [vmem:[%s375_s2 + $0x10] sm:$0xff] }
   0x2   :  { %v14_v2 = vld [vmem:[%s374_s1] sm:$0xff]  ;;  %v249_v4 = vpack.c.bf16 %v23_v1, %v22_v0  ;;  %v15_v8 = vld [vmem:[%s374_s1 + $0x8] sm:$0xff]  ;;  %v16_v10 = vld [vmem:[%s374_s1 + $0x10] sm:$0xff]  ;;  %44 = vperm.xlu1 %257, %v26_v6  }
   0x3   :  { %237 = vmatprep.mubr.msk.f32.mxu0 %vm72_vm0, %v14_v2  ;;  %v18_v5 = vld [vmem:[%s374_s1 + $0x20] sm:$0xff]  ;;  %v19_v9 = vld [vmem:[%s374_s1 + $0x28] sm:$0xff]  ;;  %v20_v11 = vld [vmem:[%s374_s1 + $0x30] sm:$0xff] }
   0x4   :  { %243 = vmatprep.mubr.msk.f32.mxu1 %vm72_vm0, %v18_v5  ;;  %250 = vmatprep.subr.bf16.mxu0 %v249_v4  ;;  %v24_v7 = vld [vmem:[%s375_s2] sm:$0xff]  ;;  %v27_v12 = vld [vmem:[%s375_s2 + $0x18] sm:$0xff]  ;;  %v25_v13 = vld [vmem:[%s375_s2 + $0x8] sm:$0xff] }
   0x5   :  { %253 = vmatprep.subr.bf16.mxu1 %v249_v4  ;;  %252 = vmatpush3.bf16.msra.mxu0 %v249_v4  ;;  %v17_v14 = vld [vmem:[%s374_s1 + $0x18] sm:$0xff]  ;;  %v29_v16 = vld [vmem:[%s375_s2 + $0x28] sm:$0xff]  ;;  %v28_v17 = vld [vmem:[%s375_s2 + $0x20] sm:$0xff] }
   0x6   :  { %254 = vmatpush3.bf16.msra.mxu1 %v249_v4  ;;  %34 = vperm.xlu0 %256, %v24_v7   ;;  %v21_v15 = vld [vmem:[%s374_s1 + $0x38] sm:$0xff]  ;;  %v30_v19 = vld [vmem:[%s375_s2 + $0x30] sm:$0xff] }
   0x7   :  { %49 = vperm.xlu1 %257, %v27_v12   ;;  %v31_v18 = vld [vmem:[%s375_s2 + $0x38] sm:$0xff] }
   0x8   :  { %238 = vmatmul.mubr.msk.f32.vlgmr.msra.gmra.mrb[0].mxu0 %vm72_vm0, %v15_v8 }
   0x9   :  { %244 = vmatmul.mubr.msk.f32.vlgmr.msra.gmra.mrb[0].mxu1 %vm72_vm0, %v19_v9  ;;  %240 = vmatprep.mubr.msk.f32.mxu0 %vm72_vm0, %v16_v10 }
   0xa   :  { %246 = vmatprep.mubr.msk.f32.mxu1 %vm72_vm0, %v20_v11  ;;  %39 = vperm.xlu0 %256, %v25_v13  }
   0xb   :  { %59 = vperm.xlu1 %257, %v29_v16  }
   0xc   :  { %241 = vmatmul.mubr.msk.f32.gmra.mrb[2].mxu0 %vm72_vm0, %v17_v14 }
   0xd   :  { %247 = vmatmul.mubr.msk.f32.gmra.mrb[2].mxu1 %vm72_vm0, %v21_v15 }
   0xe   :  { %54 = vperm.xlu0 %256, %v28_v17  }
   0xf   :  { %69 = vperm.xlu1 %257, %v31_v18  }
  0x12   :  { %64 = vperm.xlu0 %256, %v30_v19  }
  0x81   :  { %v45_v20 = vpop.permute.xlu1 %44 }
  0x85   :  { %v35_v21 = vpop.permute.xlu0 %34 }
  0x86   :  { %v50_v22 = vpop.permute.xlu1 %49 }
  0x89   :  { %v40_v23 = vpop.permute.xlu0 %39 }
  0x8a   :  { %v60_v24 = vpop.permute.xlu1 %59 }
  0x8d   :  { %v55_v25 = vpop.permute.xlu0 %54 }
  0x8e   :  { %v70_v34 = vpop.permute.xlu1 %69 }
  0x91   :  { %v65_v35 = vpop.permute.xlu0 %64 }
  0xdb   :  { %v239_v26 = vpop.f32.mrb[0].mxu0 }
  0xdc   :  { %v245_v27 = vpop.f32.mrb[0].mxu1  ;;  %v169_v28 = vadd.f32 %v239_v26, %v40_v23  ;;  %v163_v30 = vpop.f32.mrb[1].mxu0 }
  0xdd   :  { %v189_v29 = vadd.f32 %v245_v27, %v60_v24  ;;  %v183_v31 = vpop.f32.mrb[1].mxu1  ;;  %v164_v32 = vadd.f32 %v163_v30, %v35_v21 }
  0xde   :  { %v184_v33 = vadd.f32 %v183_v31, %v55_v25  ;;  %204 = vst.msk [vmem:[%s376_s3 + $0x8] sm:$0xff] %vm202_vm1, %v169_v28 }
  0xdf   :  { %208 = vst.msk [vmem:[%s376_s3 + $0x28] sm:$0xff] %vm202_vm1, %v189_v29  ;;  %203 = vst.msk [vmem:[%s376_s3] sm:$0xff] %vm202_vm1, %v164_v32  ;;  %v242_v36 = vpop.f32.mrb[2].mxu0 }
  0xe0   :  { %207 = vst.msk [vmem:[%s376_s3 + $0x20] sm:$0xff] %vm202_vm1, %v184_v33  ;;  %v248_v37 = vpop.f32.mrb[2].mxu1  ;;  %v179_v38 = vadd.f32 %v242_v36, %v50_v22  ;;  %v173_v40 = vpop.f32.mrb[3].mxu0 }
  0xe1   :  { %v199_v39 = vadd.f32 %v248_v37, %v70_v34  ;;  %v193_v41 = vpop.f32.mrb[3].mxu1  ;;  %v174_v42 = vadd.f32 %v173_v40, %v45_v20 }
  0xe2   :  { %v194_v43 = vadd.f32 %v193_v41, %v65_v35  ;;  %206 = vst.msk [vmem:[%s376_s3 + $0x18] sm:$0xff] %vm202_vm1, %v179_v38 }
  0xe3   :  { %210 = vst.msk [vmem:[%s376_s3 + $0x38] sm:$0xff] %vm202_vm1, %v199_v39  ;;  %205 = vst.msk [vmem:[%s376_s3 + $0x10] sm:$0xff] %vm202_vm1, %v174_v42 }
  0xe4   :  { %209 = vst.msk [vmem:[%s376_s3 + $0x30] sm:$0xff] %vm202_vm1, %v194_v43 }

// kernel: _lambda_.46
= control target key start
LH: loop header
LB: loop body
LE: loop exit
PB: predicated region body
PF: predicated region fallthrough
CT: control target
= control target key end

     0   :  { %vm38_vm0 = vcmask 261120   ;;  %vm17_vm1 = vcmask 7168   ;;  %s673_s0 = inlined_call_operand.vmem [shape: f32[1,32,32], index: 0, kind: input, shape index: {}]   ;;  %s674_s1 = inlined_call_operand.vmem [shape: f32[1,6,32,32], index: 1, kind: input, shape index: {}]   ;;  %s675_s2 = inlined_call_operand.vmem [shape: f32[1,32,1], index: 2, kind: output, shape index: {0}]   ;;  %s676_s3 = inlined_call_operand.vmem [shape: f32[1,32,1], index: 3, kind: output, shape index: {1}]  }
   0x1   :  { %v370_v0 = vld [vmem:[%s673_s0 + $0x10] sm:$0xff]  ;;  %v378_v2 = vld [vmem:[%s673_s0] sm:$0xff]  ;;  %v387_v5 = vld [vmem:[%s673_s0 + $0x18] sm:$0xff] }
   0x2   :  { %v32_v1 = vld [vmem:[%s674_s1 + $0x10] sm:$0xff]  ;;  %v30_v4 = vld [vmem:[%s674_s1] sm:$0xff]  ;;  %v33_v6 = vld [vmem:[%s674_s1 + $0x18] sm:$0xff] }
   0x3   :  { %v36_v3 = vadd.f32 %v32_v1, %v370_v0  ;;  %v34_v7 = vadd.f32 %v30_v4, %v378_v2  ;;  %v37_v8 = vadd.f32 %v33_v6, %v387_v5  ;;  %v397_v9 = vld [vmem:[%s673_s0 + $0x8] sm:$0xff]  ;;  %v325_v23 = vld [vmem:[%s674_s1 + $0x20] sm:$0xff]  ;;  %v328_v24 = vld [vmem:[%s674_s1 + $0x38] sm:$0xff] }
   0x4   :  { %v31_v10 = vld [vmem:[%s674_s1 + $0x8] sm:$0xff]  ;;  %v327_v25 = vld [vmem:[%s674_s1 + $0x30] sm:$0xff]  ;;  %v72_v29 = vadd.f32 %v325_v23, %v378_v2  ;;  %v75_v31 = vadd.f32 %v328_v24, %v387_v5  ;;  %v337_v34 = vld [vmem:[%s674_s1 + $0x80] sm:$0xff] }
   0x5   :  { %v45_v11 = vsel %vm38_vm0, %v36_v3, 0.0  ;;  %v35_v12 = vadd.f32 %v31_v10, %v397_v9  ;;  %v39_v13 = vsel %vm38_vm0, %v34_v7, 0.0  ;;  %v48_v14 = vsel %vm38_vm0, %v37_v8, 0.0  ;;  %v326_v22 = vld [vmem:[%s674_s1 + $0x28] sm:$0xff]  ;;  %v340_v35 = vld [vmem:[%s674_s1 + $0x98] sm:$0xff]  ;;  %v339_v36 = vld [vmem:[%s674_s1 + $0x90] sm:$0xff] }
   0x6   :  { %46 = vadd.xlane.f32.xlu1 %v45_v11  ;;  %40 = vadd.xlane.f32.xlu0 %v39_v13  ;;  %v51_v17 = vmul.f32 %v34_v7, %v34_v7  ;;  %v54_v19 = vmul.f32 %v37_v8, %v37_v8  ;;  %v53_v21 = vmul.f32 %v36_v3, %v36_v3  ;;  %v338_v26 = vld [vmem:[%s674_s1 + $0x88] sm:$0xff]  ;;  %v76_v39 = vsel %vm38_vm0, %v72_v29, 0.0  ;;  %v341_v50 = vld [vmem:[%s674_s1 + $0xa0] sm:$0xff]  ;;  %v344_v51 = vld [vmem:[%s674_s1 + $0xb8] sm:$0xff] }
   0x7   :  { %v52_v15 = vmul.f32 %v35_v12, %v35_v12  ;;  %v42_v16 = vsel %vm38_vm0, %v35_v12, 0.0  ;;  %v73_v28 = vadd.f32 %v326_v22, %v397_v9  ;;  %v74_v32 = vadd.f32 %v327_v25, %v370_v0  ;;  %v342_v37 = vld [vmem:[%s674_s1 + $0xa8] sm:$0xff]  ;;  %v343_v56 = vld [vmem:[%s674_s1 + $0xb0] sm:$0xff]  ;;  %v329_v22 = vld [vmem:[%s674_s1 + $0x40] sm:$0xff] }
   0x8   :  { %v55_v20 = vsel %vm38_vm0, %v51_v17, 0.0  ;;  %v64_v27 = vsel %vm38_vm0, %v54_v19, 0.0  ;;  %v61_v30 = vsel %vm38_vm0, %v53_v21, 0.0  ;;  %v208_v33 = vadd.f32 %v338_v26, %v397_v9  ;;  %v330_v19 = vld [vmem:[%s674_s1 + $0x48] sm:$0xff] }
   0x9   :  { %v58_v18 = vsel %vm38_vm0, %v52_v15, 0.0  ;;  %v79_v38 = vsel %vm38_vm0, %v73_v28, 0.0  ;;  %v89_v40 = vmul.f32 %v73_v28, %v73_v28  ;;  %v85_v42 = vsel %vm38_vm0, %v75_v31, 0.0  ;;  %v332_v28 = vld [vmem:[%s674_s1 + $0x58] sm:$0xff] }
   0xa   :  { %49 = vadd.xlane.f32.xlu1 %v48_v14  ;;  %43 = vadd.xlane.f32.xlu0 %v42_v16  ;;  %v446_v41 = vsel %vm38_vm0, %v208_v33, 0.0  ;;  %v88_v43 = vmul.f32 %v72_v29, %v72_v29  ;;  %v207_v44 = vadd.f32 %v337_v34, %v378_v2  ;;  %v210_v45 = vadd.f32 %v340_v35, %v387_v5  ;;  %v331_v29 = vld [vmem:[%s674_s1 + $0x50] sm:$0xff] }
   0xb   :  { %v82_v46 = vsel %vm38_vm0, %v74_v32, 0.0  ;;  %v209_v47 = vadd.f32 %v339_v36, %v370_v0  ;;  %v224_v48 = vmul.f32 %v208_v33, %v208_v33  ;;  %v253_v49 = vadd.f32 %v342_v37, %v397_v9 }
   0xc   :  { %v461_v52 = vsel %vm38_vm0, %v207_v44, 0.0  ;;  %v464_v53 = vsel %vm38_vm0, %v210_v45, 0.0  ;;  %v223_v54 = vmul.f32 %v207_v44, %v207_v44  ;;  %v226_v55 = vmul.f32 %v210_v45, %v210_v45  ;;  %v333_v44 = vld [vmem:[%s674_s1 + $0x60] sm:$0xff] }
   0xd   :  { %v470_v57 = vsel %vm38_vm0, %v209_v47, 0.0  ;;  %v473_v58 = vsel %vm38_vm0, %v224_v48, 0.0  ;;  %v225_v59 = vmul.f32 %v209_v47, %v209_v47  ;;  %v476_v60 = vsel %vm38_vm0, %v253_v49, 0.0 }
   0xe   :  { %59 = vadd.xlane.f32.xlu1 %v58_v18  ;;  %56 = vadd.xlane.f32.xlu0 %v55_v20  ;;  %v479_v61 = vsel %vm38_vm0, %v223_v54, 0.0  ;;  %v482_v62 = vsel %vm38_vm0, %v226_v55, 0.0  ;;  %v252_v63 = vadd.f32 %v341_v50, %v378_v2  ;;  %v255_v1 = vadd.f32 %v344_v51, %v387_v5  ;;  %v335_v50 = vld [vmem:[%s674_s1 + $0x70] sm:$0xff] }
   0xf   :  { %v91_v3 = vmul.f32 %v75_v31, %v75_v31  ;;  %v487_v4 = vsel %vm38_vm0, %v225_v59, 0.0  ;;  %v254_v6 = vadd.f32 %v343_v56, %v370_v0  ;;  %v269_v7 = vmul.f32 %v253_v49, %v253_v49  ;;  %v336_v49 = vld [vmem:[%s674_s1 + $0x78] sm:$0xff] }
  0x10   :  { %v491_v8 = vsel %vm38_vm0, %v252_v63, 0.0  ;;  %v494_v10 = vsel %vm38_vm0, %v255_v1, 0.0  ;;  %v268_v11 = vmul.f32 %v252_v63, %v252_v63  ;;  %v271_v12 = vmul.f32 %v255_v1, %v255_v1 }
  0x11   :  { %v95_v13 = vsel %vm38_vm0, %v89_v40, 0.0  ;;  %v498_v14 = vsel %vm38_vm0, %v254_v6, 0.0  ;;  %v501_v15 = vsel %vm38_vm0, %v269_v7, 0.0  ;;  %v270_v16 = vmul.f32 %v254_v6, %v254_v6 }
  0x12   :  { %65 = vadd.xlane.f32.xlu1 %v64_v27  ;;  %62 = vadd.xlane.f32.xlu0 %v61_v30  ;;  %v92_v17 = vsel %vm38_vm0, %v88_v43, 0.0  ;;  %v90_v18 = vmul.f32 %v74_v32, %v74_v32  ;;  %v508_v20 = vsel %vm38_vm0, %v268_v11, 0.0  ;;  %v511_v21 = vsel %vm38_vm0, %v271_v12, 0.0  ;;  %v334_v43 = vld [vmem:[%s674_s1 + $0x68] sm:$0xff] }
  0x13   :  { %v517_v23 = vsel %vm38_vm0, %v270_v16, 0.0  ;;  %v101_v24 = vsel %vm38_vm0, %v91_v3, 0.0  ;;  %v118_v25 = vadd.f32 %v330_v19, %v397_v9  ;;  %v117_v27 = vadd.f32 %v329_v22, %v378_v2 }
  0x14   :  { %v98_v26 = vsel %vm38_vm0, %v90_v18, 0.0  ;;  %v120_v31 = vadd.f32 %v332_v28, %v387_v5  ;;  %v119_v33 = vadd.f32 %v331_v29, %v370_v0  ;;  %v162_v48 = vadd.f32 %v333_v44, %v378_v2 }
  0x15   :  { %v124_v30 = vsel %vm38_vm0, %v118_v25, 0.0  ;;  %v121_v32 = vsel %vm38_vm0, %v117_v27, 0.0  ;;  %v134_v35 = vmul.f32 %v118_v25, %v118_v25  ;;  %v133_v37 = vmul.f32 %v117_v27, %v117_v27 }
  0x16   :  { %80 = vadd.xlane.f32.xlu1 %v79_v38  ;;  %77 = vadd.xlane.f32.xlu0 %v76_v39  ;;  %v130_v34 = vsel %vm38_vm0, %v120_v31, 0.0  ;;  %v127_v36 = vsel %vm38_vm0, %v119_v33, 0.0  ;;  %v136_v39 = vmul.f32 %v120_v31, %v120_v31  ;;  %v165_v54 = vadd.f32 %v336_v49, %v387_v5 }
  0x17   :  { %v140_v38 = vsel %vm38_vm0, %v134_v35, 0.0  ;;  %v137_v40 = vsel %vm38_vm0, %v133_v37, 0.0  ;;  %v164_v55 = vadd.f32 %v335_v50, %v370_v0  ;;  %v178_v63 = vmul.f32 %v162_v48, %v162_v48 }
  0x18   :  { %v146_v45 = vsel %vm38_vm0, %v136_v39, 0.0  ;;  %v175_v2 = vsel %vm38_vm0, %v165_v54, 0.0  ;;  %v181_v3 = vmul.f32 %v165_v54, %v165_v54 }
  0x19   :  { %v172_v59 = vsel %vm38_vm0, %v164_v55, 0.0  ;;  %v182_v6 = vsel %vm38_vm0, %v178_v63, 0.0  ;;  %v180_v5 = vmul.f32 %v164_v55, %v164_v55 }
  0x1a   :  { %86 = vadd.xlane.f32.xlu1 %v85_v42  ;;  %83 = vadd.xlane.f32.xlu0 %v82_v46  ;;  %v135_v42 = vmul.f32 %v119_v33, %v119_v33  ;;  %v163_v46 = vadd.f32 %v334_v43, %v397_v9  ;;  %v166_v9 = vsel %vm38_vm0, %v162_v48, 0.0  ;;  %v191_v0 = vsel %vm38_vm0, %v181_v3, 0.0 }
  0x1b   :  { %v188_v7 = vsel %vm38_vm0, %v180_v5, 0.0 }
  0x1c   :  { %v143_v47 = vsel %vm38_vm0, %v135_v42, 0.0  ;;  %v169_v51 = vsel %vm38_vm0, %v163_v46, 0.0  ;;  %v179_v56 = vmul.f32 %v163_v46, %v163_v46 }
  0x1e   :  { %96 = vadd.xlane.f32.xlu1 %v95_v13  ;;  %93 = vadd.xlane.f32.xlu0 %v92_v17  ;;  %v185_v1 = vsel %vm38_vm0, %v179_v56, 0.0 }
  0x22   :  { %102 = vadd.xlane.f32.xlu1 %v101_v24  ;;  %99 = vadd.xlane.f32.xlu0 %v98_v26 }
  0x26   :  { %125 = vadd.xlane.f32.xlu1 %v124_v30  ;;  %122 = vadd.xlane.f32.xlu0 %v121_v32 }
  0x2a   :  { %131 = vadd.xlane.f32.xlu1 %v130_v34  ;;  %128 = vadd.xlane.f32.xlu0 %v127_v36 }
  0x2e   :  { %141 = vadd.xlane.f32.xlu1 %v140_v38  ;;  %138 = vadd.xlane.f32.xlu0 %v137_v40 }
  0x32   :  { %147 = vadd.xlane.f32.xlu1 %v146_v45  ;;  %144 = vadd.xlane.f32.xlu0 %v143_v47 }
  0x36   :  { %170 = vadd.xlane.f32.xlu1 %v169_v51  ;;  %167 = vadd.xlane.f32.xlu0 %v166_v9 }
  0x3a   :  { %176 = vadd.xlane.f32.xlu1 %v175_v2  ;;  %173 = vadd.xlane.f32.xlu0 %v172_v59 }
  0x3e   :  { %186 = vadd.xlane.f32.xlu1 %v185_v1  ;;  %183 = vadd.xlane.f32.xlu0 %v182_v6 }
  0x42   :  { %192 = vadd.xlane.f32.xlu1 %v191_v0  ;;  %189 = vadd.xlane.f32.xlu0 %v188_v7 }
  0x46   :  { %215 = vadd.xlane.f32.xlu1 %v446_v41  ;;  %212 = vadd.xlane.f32.xlu0 %v461_v52  ;;  %v346_v41 = vmov 0.0  }
  0x47   :  { %19 = vst.msk [vmem:[%s675_s2 + $0x8] sm:$0xff] %vm17_vm1, %v346_v41  ;;  %18 = vst.msk [vmem:[%s675_s2] sm:$0xff] %vm17_vm1, %v346_v41 }
  0x48   :  { %20 = vst.msk [vmem:[%s675_s2 + $0x10] sm:$0xff] %vm17_vm1, %v346_v41  ;;  %21 = vst.msk [vmem:[%s675_s2 + $0x18] sm:$0xff] %vm17_vm1, %v346_v41 }
  0x49   :  { %23 = vst.msk [vmem:[%s676_s3 + $0x8] sm:$0xff] %vm17_vm1, %v346_v41  ;;  %22 = vst.msk [vmem:[%s676_s3] sm:$0xff] %vm17_vm1, %v346_v41 }
  0x4a   :  { %221 = vadd.xlane.f32.xlu1 %v464_v53  ;;  %218 = vadd.xlane.f32.xlu0 %v470_v57  ;;  %24 = vst.msk [vmem:[%s676_s3 + $0x10] sm:$0xff] %vm17_vm1, %v346_v41  ;;  %25 = vst.msk [vmem:[%s676_s3 + $0x18] sm:$0xff] %vm17_vm1, %v346_v41 }
  0x4e   :  { %231 = vadd.xlane.f32.xlu1 %v473_v58  ;;  %228 = vadd.xlane.f32.xlu0 %v479_v61  ;;  %v293_v55 = vld [vmem:[%s675_s2 + $0x8] sm:$0xff]  ;;  %v292_v1 = vld [vmem:[%s675_s2] sm:$0xff] }
  0x52   :  { %237 = vadd.xlane.f32.xlu1 %v482_v62  ;;  %234 = vadd.xlane.f32.xlu0 %v487_v4 }
  0x56   :  { %260 = vadd.xlane.f32.xlu1 %v476_v60  ;;  %257 = vadd.xlane.f32.xlu0 %v491_v8 }
  0x5a   :  { %266 = vadd.xlane.f32.xlu1 %v494_v10  ;;  %263 = vadd.xlane.f32.xlu0 %v498_v14 }
  0x5e   :  { %276 = vadd.xlane.f32.xlu1 %v501_v15  ;;  %273 = vadd.xlane.f32.xlu0 %v508_v20 }
  0x62   :  { %282 = vadd.xlane.f32.xlu1 %v511_v21  ;;  %279 = vadd.xlane.f32.xlu0 %v517_v23 }
  0x93   :  { %v47_v52 = vpop.xlane.xlu1 %46  ;;  %v41_v53 = vpop.xlane.xlu0 %40 }
  0x97   :  { %v50_v57 = vpop.xlane.xlu1 %49  ;;  %v44_v58 = vpop.xlane.xlu0 %43 }
  0x9b   :  { %v60_v60 = vpop.xlane.xlu1 %59  ;;  %v57_v61 = vpop.xlane.xlu0 %56 }
  0x9f   :  { %v611_v62 = vpop.xlane.xlu1 %65  ;;  %v613_v4 = vpop.xlane.xlu0 %62 }
  0xa3   :  { %v81_v8 = vpop.xlane.xlu1 %80  ;;  %v78_v10 = vpop.xlane.xlu0 %77 }
  0xa4   :  { %v105_v38 = vadd.f32 %v81_v8, %v44_v58  ;;  %v104_v40 = vadd.f32 %v78_v10, %v41_v53 }
  0xa7   :  { %v87_v11 = vpop.xlane.xlu1 %86  ;;  %v84_v12 = vpop.xlane.xlu0 %83 }
  0xa8   :  { %v107_v45 = vadd.f32 %v87_v11, %v50_v57  ;;  %v106_v48 = vadd.f32 %v84_v12, %v47_v52  ;;  %v294_v12 = vld [vmem:[%s675_s2 + $0x10] sm:$0xff] }
  0xab   :  { %v97_v13 = vpop.xlane.xlu1 %96  ;;  %v94_v14 = vpop.xlane.xlu0 %93 }
  0xac   :  { %v109_v56 = vadd.f32 %v97_v13, %v60_v60  ;;  %v108_v6 = vadd.f32 %v94_v14, %v57_v61  ;;  %v295_v60 = vld [vmem:[%s675_s2 + $0x18] sm:$0xff] }
  0xaf   :  { %v103_v15 = vpop.xlane.xlu1 %102  ;;  %v100_v16 = vpop.xlane.xlu0 %99 }
  0xb0   :  { %v111_v10 = vadd.f32 %v103_v15, %v611_v62  ;;  %v110_v14 = vadd.f32 %v100_v16, %v613_v4  ;;  %v305_v16 = vld [vmem:[%s676_s3] sm:$0xff] }
  0xb3   :  { %v126_v17 = vpop.xlane.xlu1 %125  ;;  %v123_v18 = vpop.xlane.xlu0 %122 }
  0xb4   :  { %v150_v42 = vadd.f32 %v126_v17, %v105_v38  ;;  %v149_v43 = vadd.f32 %v123_v18, %v104_v40 }
  0xb7   :  { %v132_v19 = vpop.xlane.xlu1 %131  ;;  %v129_v20 = vpop.xlane.xlu0 %128 }
  0xb8   :  { %v152_v50 = vadd.f32 %v132_v19, %v107_v45  ;;  %v151_v54 = vadd.f32 %v129_v20, %v106_v48 }
  0xbb   :  { %v142_v21 = vpop.xlane.xlu1 %141  ;;  %v139_v22 = vpop.xlane.xlu0 %138 }
  0xbc   :  { %v154_v7 = vadd.f32 %v142_v21, %v109_v56  ;;  %v153_v53 = vadd.f32 %v139_v22, %v108_v6 }
  0xbf   :  { %v148_v23 = vpop.xlane.xlu1 %147  ;;  %v145_v24 = vpop.xlane.xlu0 %144 }
  0xc0   :  { %v156_v15 = vadd.f32 %v148_v23, %v111_v10  ;;  %v155_v20 = vadd.f32 %v145_v24, %v110_v14 }
  0xc3   :  { %v171_v25 = vpop.xlane.xlu1 %170  ;;  %v168_v26 = vpop.xlane.xlu0 %167 }
  0xc4   :  { %v195_v46 = vadd.f32 %v171_v25, %v150_v42  ;;  %v194_v49 = vadd.f32 %v168_v26, %v149_v43  ;;  %v306_v25 = vld [vmem:[%s676_s3 + $0x8] sm:$0xff] }
  0xc7   :  { %v177_v27 = vpop.xlane.xlu1 %176  ;;  %v174_v28 = vpop.xlane.xlu0 %173 }
  0xc8   :  { %v197_v59 = vadd.f32 %v177_v27, %v152_v50  ;;  %v196_v5 = vadd.f32 %v174_v28, %v151_v54 }
  0xcb   :  { %v187_v29 = vpop.xlane.xlu1 %186  ;;  %v184_v30 = vpop.xlane.xlu0 %183 }
  0xcc   :  { %v199_v11 = vadd.f32 %v187_v29, %v154_v7  ;;  %v198_v17 = vadd.f32 %v184_v30, %v153_v53 }
  0xcf   :  { %v193_v31 = vpop.xlane.xlu1 %192  ;;  %v190_v32 = vpop.xlane.xlu0 %189 }
  0xd0   :  { %v201_v27 = vadd.f32 %v193_v31, %v156_v15  ;;  %v200_v24 = vadd.f32 %v190_v32, %v155_v20 }
  0xd3   :  { %v216_v33 = vpop.xlane.xlu1 %215  ;;  %v213_v34 = vpop.xlane.xlu0 %212 }
  0xd4   :  { %v240_v51 = vadd.f32 %v216_v33, %v195_v46  ;;  %v239_v9 = vadd.f32 %v213_v34, %v194_v49  ;;  %v308_v34 = vld [vmem:[%s676_s3 + $0x18] sm:$0xff] }
  0xd7   :  { %v222_v35 = vpop.xlane.xlu1 %221  ;;  %v219_v36 = vpop.xlane.xlu0 %218 }
  0xd8   :  { %v242_v41 = vadd.f32 %v222_v35, %v197_v59  ;;  %v241_v57 = vadd.f32 %v219_v36, %v196_v5  ;;  %v307_v36 = vld [vmem:[%s676_s3 + $0x10] sm:$0xff] }
  0xdb   :  { %v232_v37 = vpop.xlane.xlu1 %231  ;;  %v229_v39 = vpop.xlane.xlu0 %228 }
  0xdc   :  { %v244_v18 = vadd.f32 %v232_v37, %v199_v11  ;;  %v243_v21 = vadd.f32 %v229_v39, %v198_v17 }
  0xdf   :  { %v238_v44 = vpop.xlane.xlu1 %237  ;;  %v235_v47 = vpop.xlane.xlu0 %234 }
  0xe0   :  { %v246_v29 = vadd.f32 %v238_v44, %v201_v27  ;;  %v245_v31 = vadd.f32 %v235_v47, %v200_v24 }
  0xe3   :  { %v261_v2 = vpop.xlane.xlu1 %260  ;;  %v258_v3 = vpop.xlane.xlu0 %257 }
  0xe4   :  { %v285_v63 = vadd.f32 %v261_v2, %v240_v51  ;;  %v284_v0 = vadd.f32 %v258_v3, %v239_v9 }
  0xe6   :  { %v297_v52 = vadd.f32 %v293_v55, %v285_v63  ;;  %v296_v58 = vadd.f32 %v292_v1, %v284_v0 }
  0xe7   :  { %v267_v8 = vpop.xlane.xlu1 %266  ;;  %v264_v13 = vpop.xlane.xlu0 %263 }
  0xe8   :  { %302 = vst.msk [vmem:[%s675_s2 + $0x8] sm:$0xff] %vm17_vm1, %v297_v52  ;;  %v287_v61 = vadd.f32 %v267_v8, %v242_v41  ;;  %301 = vst.msk [vmem:[%s675_s2] sm:$0xff] %vm17_vm1, %v296_v58  ;;  %v286_v62 = vadd.f32 %v264_v13, %v241_v57 }
  0xea   :  { %v299_v19 = vadd.f32 %v295_v60, %v287_v61  ;;  %v298_v22 = vadd.f32 %v294_v12, %v286_v62 }
  0xeb   :  { %v277_v26 = vpop.xlane.xlu1 %276  ;;  %v274_v23 = vpop.xlane.xlu0 %273 }
  0xec   :  { %304 = vst.msk [vmem:[%s675_s2 + $0x18] sm:$0xff] %vm17_vm1, %v299_v19  ;;  %v289_v4 = vadd.f32 %v277_v26, %v244_v18  ;;  %303 = vst.msk [vmem:[%s675_s2 + $0x10] sm:$0xff] %vm17_vm1, %v298_v22  ;;  %v288_v28 = vadd.f32 %v274_v23, %v243_v21 }
  0xee   :  { %v310_v30 = vadd.f32 %v306_v25, %v289_v4  ;;  %v309_v33 = vadd.f32 %v305_v16, %v288_v28 }
  0xef   :  { %v283_v35 = vpop.xlane.xlu1 %282  ;;  %v280_v37 = vpop.xlane.xlu0 %279 }
  0xf0   :  { %314 = vst.msk [vmem:[%s676_s3 + $0x8] sm:$0xff] %vm17_vm1, %v310_v30  ;;  %v291_v32 = vadd.f32 %v283_v35, %v246_v29  ;;  %313 = vst.msk [vmem:[%s676_s3] sm:$0xff] %vm17_vm1, %v309_v33  ;;  %v290_v38 = vadd.f32 %v280_v37, %v245_v31 }
  0xf2   :  { %v312_v39 = vadd.f32 %v308_v34, %v291_v32  ;;  %v311_v40 = vadd.f32 %v307_v36, %v290_v38 }
  0xf4   :  { %316 = vst.msk [vmem:[%s676_s3 + $0x18] sm:$0xff] %vm17_vm1, %v312_v39  ;;  %315 = vst.msk [vmem:[%s676_s3 + $0x10] sm:$0xff] %vm17_vm1, %v311_v40 }

// kernel: _lambda_.47
= control target key start
LH: loop header
LB: loop body
LE: loop exit
PB: predicated region body
PF: predicated region fallthrough
CT: control target
= control target key end

     0   :  { %v330_v0 = vmov 0   ;;  %vm290_vm5 = vcmask 261120   ;;  %s579_s2 = inlined_call_operand.vmem [shape: f32[1,32,1], index: 2, kind: input, shape index: {}]   ;;  %s580_s3 = inlined_call_operand.vmem [shape: f32[1,32,1], index: 3, kind: input, shape index: {}]   ;;  %s581_s0 = inlined_call_operand.vmem [shape: f32[1,32,32], index: 0, kind: input, shape index: {}]   ;;  %s582_s1 = inlined_call_operand.vmem [shape: f32[1,6,32,32], index: 1, kind: input, shape index: {}]   ;;  %s583_s4 = inlined_call_operand.vmem [shape: f32[1,32,32], index: 4, kind: output, shape index: {}]  }
   0x1   :  { %321 = vset.pattern.permute.xlu1 %v330_v0  ;;  %320 = vset.pattern.permute.xlu0 %v330_v0  ;;  %v23_v1 = vld [vmem:[%s579_s2 + $0x10] sm:$0xff]  ;;  %v21_v3 = vld [vmem:[%s579_s2] sm:$0xff]  ;;  %v24_v8 = vld [vmem:[%s579_s2 + $0x18] sm:$0xff] }
   0x2   :  { %v31_v2 = vld [vmem:[%s580_s3 + $0x10] sm:$0xff]  ;;  %v27_v4 = vmul.f32 0.0052083335, %v23_v1  ;;  %v25_v6 = vmul.f32 0.0052083335, %v21_v3  ;;  %v29_v7 = vld [vmem:[%s580_s3] sm:$0xff] }
   0x3   :  { %v35_v5 = vmul.f32 0.0052083335, %v31_v2  ;;  %v32_v9 = vld [vmem:[%s580_s3 + $0x18] sm:$0xff]  ;;  %v33_v11 = vmul.f32 0.0052083335, %v29_v7  ;;  %v22_v14 = vld [vmem:[%s579_s2 + $0x8] sm:$0xff] }
   0x4   :  { %77 = vperm.xlu1 %321, %v27_v4   ;;  %v39_v10 = vmul.f32 %v27_v4, %v27_v4  ;;  %67 = vperm.xlu0 %320, %v25_v6   ;;  %v37_v12 = vmul.f32 %v25_v6, %v25_v6  ;;  %v28_v13 = vmul.f32 0.0052083335, %v24_v8  ;;  %v30_v15 = vld [vmem:[%s580_s3 + $0x8] sm:$0xff]  ;;  %v36_v16 = vmul.f32 0.0052083335, %v32_v9  ;;  %v17_v37 = vld [vmem:[%s581_s0] sm:$0xff] }
   0x5   :  { %v26_v17 = vmul.f32 0.0052083335, %v22_v14  ;;  %v34_v18 = vmul.f32 0.0052083335, %v30_v15  ;;  %v57_v38 = vld [vmem:[%s582_s1] sm:$0xff]  ;;  %v18_v44 = vld [vmem:[%s581_s0 + $0x8] sm:$0xff] }
   0x6   :  { %v43_v19 = vsub.f32 %v35_v5, %v39_v10  ;;  %v41_v20 = vsub.f32 %v33_v11, %v37_v12  ;;  %v40_v21 = vmul.f32 %v28_v13, %v28_v13  ;;  %v299_v39 = vld [vmem:[%s582_s1 + $0x20] sm:$0xff]  ;;  %v58_v45 = vld [vmem:[%s582_s1 + $0x8] sm:$0xff]  ;;  %v20_v51 = vld [vmem:[%s581_s0 + $0x18] sm:$0xff]  ;;  %v61_v56 = vadd.f32 %v57_v38, %v17_v37 }
   0x7   :  { %v38_v22 = vmul.f32 %v26_v17, %v26_v17  ;;  %v303_v40 = vld [vmem:[%s582_s1 + $0x40] sm:$0xff]  ;;  %v300_v46 = vld [vmem:[%s582_s1 + $0x28] sm:$0xff]  ;;  %v60_v53 = vld [vmem:[%s582_s1 + $0x18] sm:$0xff]  ;;  %v436_v57 = vadd.f32 %v299_v39, %v17_v37  ;;  %v62_v3 = vadd.f32 %v58_v45, %v18_v44 }
   0x8   :  { %v47_v23 = vmax.f32 %v43_v19, 0.0  ;;  %v45_v24 = vmax.f32 %v41_v20, 0.0  ;;  %v44_v25 = vsub.f32 %v36_v16, %v40_v21  ;;  %82 = vperm.xlu1 %321, %v28_v13   ;;  %72 = vperm.xlu0 %320, %v26_v17   ;;  %v307_v41 = vld [vmem:[%s582_s1 + $0x60] sm:$0xff]  ;;  %v304_v47 = vld [vmem:[%s582_s1 + $0x48] sm:$0xff]  ;;  %v302_v54 = vld [vmem:[%s582_s1 + $0x38] sm:$0xff]  ;;  %v438_v58 = vadd.f32 %v303_v40, %v17_v37 }
   0x9   :  { %v42_v26 = vsub.f32 %v34_v18, %v38_v22  ;;  %v311_v42 = vld [vmem:[%s582_s1 + $0x80] sm:$0xff]  ;;  %v308_v48 = vld [vmem:[%s582_s1 + $0x68] sm:$0xff]  ;;  %v306_v55 = vld [vmem:[%s582_s1 + $0x58] sm:$0xff]  ;;  %v440_v59 = vadd.f32 %v307_v41, %v17_v37  ;;  %v131_v4 = vadd.f32 %v300_v46, %v18_v44  ;;  %v164_v8 = vadd.f32 %v304_v47, %v18_v44 }
   0xa   :  { %v51_v27 = vadd.f32 1e-05, %v47_v23  ;;  %v49_v28 = vadd.f32 1e-05, %v45_v24  ;;  %v48_v29 = vmax.f32 %v44_v25, 0.0  ;;  %v315_v43 = vld [vmem:[%s582_s1 + $0xa0] sm:$0xff]  ;;  %v229_v1 = vadd.f32 %v311_v42, %v17_v37 }
   0xb   :  { %v46_v30 = vmax.f32 %v42_v26, 0.0  ;;  %v312_v49 = vld [vmem:[%s582_s1 + $0x88] sm:$0xff]  ;;  %v310_v60 = vld [vmem:[%s582_s1 + $0x78] sm:$0xff]  ;;  %v19_v61 = vld [vmem:[%s581_s0 + $0x10] sm:$0xff]  ;;  %v456_v2 = vadd.f32 %v315_v43, %v17_v37  ;;  %v197_v9 = vadd.f32 %v308_v48, %v18_v44  ;;  %v476_v15 = vadd.f32 %v60_v53, %v20_v51 }
   0xc   :  { %322 = vrsqrt.f32 %v49_v28  ;;  %v52_v31 = vadd.f32 1e-05, %v48_v29  ;;  %v316_v50 = vld [vmem:[%s582_s1 + $0xa8] sm:$0xff]  ;;  %v59_v62 = vld [vmem:[%s582_s1 + $0x10] sm:$0xff]  ;;  %v230_v10 = vadd.f32 %v312_v49, %v18_v44  ;;  %v314_v12 = vld [vmem:[%s582_s1 + $0x98] sm:$0xff]  ;;  %v478_v16 = vadd.f32 %v302_v54, %v20_v51 }
   0xd   :  { %v50_v32 = vadd.f32 1e-05, %v46_v30  ;;  %324 = vrsqrt.f32 %v51_v27  ;;  %v301_v63 = vld [vmem:[%s582_s1 + $0x30] sm:$0xff]  ;;  %v263_v11 = vadd.f32 %v316_v50, %v18_v44  ;;  %v318_v13 = vld [vmem:[%s582_s1 + $0xb8] sm:$0xff]  ;;  %v480_v17 = vadd.f32 %v59_v62, %v19_v61 }
   0xe   :  { %v305_v5 = vld [vmem:[%s582_s1 + $0x50] sm:$0xff]  ;;  %v482_v18 = vadd.f32 %v301_v63, %v19_v61  ;;  %v484_v19 = vadd.f32 %v306_v55, %v20_v51  ;;  %v492_v24 = vadd.f32 %v310_v60, %v20_v51  ;;  %v494_v25 = vadd.f32 %v314_v12, %v20_v51 }
   0xf   :  { %326 = vrsqrt.f32 %v50_v32  ;;  %v309_v6 = vld [vmem:[%s582_s1 + $0x70] sm:$0xff]  ;;  %v486_v20 = vadd.f32 %v305_v5, %v19_v61  ;;  %v496_v26 = vadd.f32 %v318_v13, %v20_v51 }
  0x10   :  { %328 = vrsqrt.f32 %v52_v31  ;;  %v313_v7 = vld [vmem:[%s582_s1 + $0x90] sm:$0xff]  ;;  %v488_v21 = vadd.f32 %v309_v6, %v19_v61 }
  0x11   :  { %v317_v14 = vld [vmem:[%s582_s1 + $0xb0] sm:$0xff]  ;;  %v490_v22 = vadd.f32 %v313_v7, %v19_v61 }
  0x12   :  { %v498_v27 = vadd.f32 %v317_v14, %v19_v61 }
  0x16   :  { %v323_v33 = vpop.eup %322 }
  0x17   :  { %v325_v34 = vpop.eup %324  ;;  %91 = vperm.xlu0 %320, %v323_v33  }
  0x19   :  { %v327_v35 = vpop.eup %326 }
  0x1a   :  { %96 = vperm.xlu1 %321, %v327_v35   ;;  %v329_v36 = vpop.eup %328 }
  0x1b   :  { %101 = vperm.xlu0 %320, %v325_v34  }
  0x1e   :  { %106 = vperm.xlu1 %321, %v329_v36  }
  0x83   :  { %v425_v52 = vpop.permute.xlu0 %67  ;;  %v454_v0 = vpop.permute.xlu1 %77 }
  0x84   :  { %v85_v28 = vsub.f32 %v61_v56, %v425_v52  ;;  %v134_v29 = vsub.f32 %v436_v57, %v425_v52  ;;  %v167_v30 = vsub.f32 %v438_v58, %v425_v52  ;;  %v200_v31 = vsub.f32 %v440_v59, %v425_v52 }
  0x85   :  { %v233_v32 = vsub.f32 %v229_v1, %v425_v52  ;;  %v266_v33 = vsub.f32 %v456_v2, %v425_v52  ;;  %v87_v35 = vsub.f32 %v480_v17, %v454_v0  ;;  %v136_v36 = vsub.f32 %v482_v18, %v454_v0 }
  0x86   :  { %v169_v38 = vsub.f32 %v486_v20, %v454_v0  ;;  %v202_v39 = vsub.f32 %v488_v21, %v454_v0  ;;  %v235_v40 = vsub.f32 %v490_v22, %v454_v0 }
  0x87   :  { %v73_v23 = vpop.permute.xlu0 %72  ;;  %v510_v34 = vpop.permute.xlu1 %82 }
  0x88   :  { %v86_v37 = vsub.f32 %v62_v3, %v73_v23  ;;  %v135_v41 = vsub.f32 %v131_v4, %v73_v23  ;;  %v168_v42 = vsub.f32 %v164_v8, %v73_v23  ;;  %v201_v43 = vsub.f32 %v197_v9, %v73_v23 }
  0x89   :  { %v234_v44 = vsub.f32 %v230_v10, %v73_v23  ;;  %v267_v45 = vsub.f32 %v263_v11, %v73_v23  ;;  %v88_v47 = vsub.f32 %v476_v15, %v510_v34  ;;  %v137_v48 = vsub.f32 %v478_v16, %v510_v34 }
  0x8a   :  { %v170_v49 = vsub.f32 %v484_v19, %v510_v34  ;;  %v203_v51 = vsub.f32 %v492_v24, %v510_v34  ;;  %v236_v52 = vsub.f32 %v494_v25, %v510_v34  ;;  %v269_v53 = vsub.f32 %v496_v26, %v510_v34 }
  0x96   :  { %v92_v46 = vpop.permute.xlu0 %91 }
  0x97   :  { %v109_v50 = vmul.f32 %v92_v46, %v85_v28  ;;  %v138_v55 = vmul.f32 %v134_v29, %v92_v46  ;;  %v171_v56 = vmul.f32 %v167_v30, %v92_v46  ;;  %v204_v57 = vmul.f32 %v200_v31, %v92_v46 }
  0x98   :  { %v237_v58 = vmul.f32 %v233_v32, %v92_v46  ;;  %v270_v10 = vmul.f32 %v266_v33, %v92_v46 }
  0x99   :  { %v97_v54 = vpop.permute.xlu1 %96  ;;  %vm113_vm0 = vcmp.ge.f32.partialorder %v109_v50, 0.0  ;;  %v117_v2 = vmul.f32 0.2, %v109_v50  ;;  %vm142_vm8 = vcmp.ge.f32.partialorder %v138_v55, 0.0  ;;  %v146_v23 = vmul.f32 0.2, %v138_v55 }
  0x9a   :  { %v110_v59 = vmul.f32 %v97_v54, %v86_v37  ;;  %v139_v60 = vmul.f32 %v135_v41, %v97_v54  ;;  %v172_v61 = vmul.f32 %v168_v42, %v97_v54  ;;  %v205_v62 = vmul.f32 %v201_v43, %v97_v54 }
  0x9b   :  { %v238_v63 = vmul.f32 %v234_v44, %v97_v54  ;;  %v271_v1 = vmul.f32 %v267_v45, %v97_v54  ;;  %v121_v15 = vsel %vm113_vm0, %v109_v50, %v117_v2  ;;  %vm175_vm9 = vcmp.ge.f32.partialorder %v171_v56, 0.0 }
  0x9c   :  { %vm114_vm1 = vcmp.ge.f32.partialorder %v110_v59, 0.0  ;;  %v118_v3 = vmul.f32 0.2, %v110_v59  ;;  %vm143_vm2 = vcmp.ge.f32.partialorder %v139_v60, 0.0  ;;  %v147_v4 = vmul.f32 0.2, %v139_v60 }
  0x9d   :  { %vm176_vm3 = vcmp.ge.f32.partialorder %v172_v61, 0.0  ;;  %v180_v5 = vmul.f32 0.2, %v172_v61  ;;  %vm209_vm4 = vcmp.ge.f32.partialorder %v205_v62, 0.0  ;;  %v213_v6 = vmul.f32 0.2, %v205_v62  ;;  %v107_v31 = vpop.permute.xlu1 %106 }
  0x9e   :  { %v122_v7 = vsel %vm114_vm1, %v110_v59, %v118_v3  ;;  %v151_v8 = vsel %vm143_vm2, %v139_v60, %v147_v4  ;;  %v246_v9 = vmul.f32 0.2, %v238_v63  ;;  %vm242_vm6 = vcmp.ge.f32.partialorder %v238_v63, 0.0 }
  0x9f   :  { %v155_v11 = vmax.f32 %v122_v7, %v151_v8  ;;  %v184_v12 = vsel %vm176_vm3, %v172_v61, %v180_v5  ;;  %vm275_vm7 = vcmp.ge.f32.partialorder %v271_v1, 0.0  ;;  %v217_v13 = vsel %vm209_vm4, %v205_v62, %v213_v6 }
  0xa0   :  { %v279_v14 = vmul.f32 0.2, %v271_v1  ;;  %v179_v24 = vmul.f32 0.2, %v171_v56  ;;  %v250_v28 = vsel %vm242_vm6, %v238_v63, %v246_v9  ;;  %vm208_vm10 = vcmp.ge.f32.partialorder %v204_v57, 0.0 }
  0xa1   :  { %v188_v16 = vmax.f32 %v155_v11, %v184_v12  ;;  %v212_v30 = vmul.f32 0.2, %v204_v57  ;;  %v150_v33 = vsel %vm142_vm8, %v138_v55, %v146_v23  ;;  %vm241_vm11 = vcmp.ge.f32.partialorder %v237_v58, 0.0 }
  0xa2   :  { %v283_v29 = vsel %vm275_vm7, %v271_v1, %v279_v14  ;;  %v245_v37 = vmul.f32 0.2, %v237_v58  ;;  %v154_v41 = vmax.f32 %v121_v15, %v150_v33  ;;  %v183_v42 = vsel %vm175_vm9, %v171_v56, %v179_v24 }
  0xa3   :  { %v221_v32 = vmax.f32 %v188_v16, %v217_v13  ;;  %v216_v43 = vsel %vm208_vm10, %v204_v57, %v212_v30  ;;  %vm274_vm12 = vcmp.ge.f32.partialorder %v270_v10, 0.0  ;;  %v278_v45 = vmul.f32 0.2, %v270_v10 }
  0xa4   :  { %v112_v46 = vmul.f32 %v107_v31, %v88_v47  ;;  %v141_v50 = vmul.f32 %v137_v48, %v107_v31  ;;  %v187_v54 = vmax.f32 %v154_v41, %v183_v42  ;;  %v249_v59 = vsel %vm241_vm11, %v237_v58, %v245_v37 }
  0xa5   :  { %v254_v44 = vmax.f32 %v221_v32, %v250_v28  ;;  %v174_v60 = vmul.f32 %v170_v49, %v107_v31  ;;  %v207_v61 = vmul.f32 %v203_v51, %v107_v31  ;;  %v240_v19 = vmul.f32 %v236_v52, %v107_v31  ;;  %v102_v49 = vpop.permute.xlu0 %101 }
  0xa6   :  { %vm116_vm13 = vcmp.ge.f32.partialorder %v112_v46, 0.0  ;;  %v120_v55 = vmul.f32 0.2, %v112_v46  ;;  %vm145_vm14 = vcmp.ge.f32.partialorder %v141_v50, 0.0  ;;  %v220_v63 = vmax.f32 %v187_v54, %v216_v43 }
  0xa7   :  { %v287_v62 = vmax.f32 %v254_v44, %v283_v29  ;;  %v149_v1 = vmul.f32 0.2, %v141_v50  ;;  %vm178_vm15 = vcmp.ge.f32.partialorder %v174_v60, 0.0  ;;  %v182_v56 = vmul.f32 0.2, %v174_v60 }
  0xa8   :  { %v124_v47 = vsel %vm116_vm13, %v112_v46, %v120_v55  ;;  %vm211_vm0 = vcmp.ge.f32.partialorder %v207_v61, 0.0  ;;  %v215_v48 = vmul.f32 0.2, %v207_v61  ;;  %v253_v51 = vmax.f32 %v220_v63, %v249_v59 }
  0xa9   :  { %292 = vst.msk [vmem:[%s583_s4 + $0x8] sm:$0xff] %vm290_vm5, %v287_v62  ;;  %v153_v57 = vsel %vm145_vm14, %v141_v50, %v149_v1  ;;  %v273_v58 = vmul.f32 %v269_v53, %v107_v31  ;;  %v268_v2 = vsub.f32 %v498_v27, %v454_v0  ;;  %v282_v3 = vsel %vm274_vm12, %v270_v10, %v278_v45 }
  0xaa   :  { %v157_v4 = vmax.f32 %v124_v47, %v153_v57  ;;  %v186_v5 = vsel %vm178_vm15, %v174_v60, %v182_v56  ;;  %v248_v6 = vmul.f32 0.2, %v240_v19  ;;  %v286_v7 = vmax.f32 %v253_v51, %v282_v3 }
  0xab   :  { %v219_v8 = vsel %vm211_vm0, %v207_v61, %v215_v48  ;;  %vm244_vm1 = vcmp.ge.f32.partialorder %v240_v19, 0.0  ;;  %v111_v25 = vmul.f32 %v102_v49, %v87_v35  ;;  %vm277_vm2 = vcmp.ge.f32.partialorder %v273_v58, 0.0 }
  0xac   :  { %v190_v52 = vmax.f32 %v157_v4, %v186_v5  ;;  %v140_v26 = vmul.f32 %v136_v36, %v102_v49  ;;  %v173_v27 = vmul.f32 %v169_v38, %v102_v49  ;;  %291 = vst.msk [vmem:[%s583_s4] sm:$0xff] %vm290_vm5, %v286_v7  ;;  %v281_v34 = vmul.f32 0.2, %v273_v58 }
  0xad   :  { %vm115_vm3 = vcmp.ge.f32.partialorder %v111_v25, 0.0  ;;  %v119_v53 = vmul.f32 0.2, %v111_v25  ;;  %v206_v17 = vmul.f32 %v202_v39, %v102_v49  ;;  %v252_v9 = vsel %vm244_vm1, %v240_v19, %v248_v6 }
  0xae   :  { %v223_v35 = vmax.f32 %v190_v52, %v219_v8  ;;  %vm144_vm4 = vcmp.ge.f32.partialorder %v140_v26, 0.0  ;;  %v148_v18 = vmul.f32 0.2, %v140_v26  ;;  %vm177_vm6 = vcmp.ge.f32.partialorder %v173_v27, 0.0 }
  0xaf   :  { %v123_v36 = vsel %vm115_vm3, %v111_v25, %v119_v53  ;;  %v181_v20 = vmul.f32 0.2, %v173_v27  ;;  %v214_v38 = vmul.f32 0.2, %v206_v17  ;;  %v239_v12 = vmul.f32 %v235_v40, %v102_v49 }
  0xb0   :  { %v256_v10 = vmax.f32 %v223_v35, %v252_v9  ;;  %v152_v11 = vsel %vm144_vm4, %v140_v26, %v148_v18  ;;  %v272_v13 = vmul.f32 %v268_v2, %v102_v49  ;;  %v285_v14 = vsel %vm277_vm2, %v273_v58, %v281_v34 }
  0xb1   :  { %v156_v15 = vmax.f32 %v123_v36, %v152_v11  ;;  %vm210_vm7 = vcmp.ge.f32.partialorder %v206_v17, 0.0  ;;  %v185_v39 = vsel %vm177_vm6, %v173_v27, %v181_v20  ;;  %v247_v16 = vmul.f32 0.2, %v239_v12 }
  0xb2   :  { %v289_v21 = vmax.f32 %v256_v10, %v285_v14  ;;  %vm243_vm8 = vcmp.ge.f32.partialorder %v239_v12, 0.0  ;;  %v218_v24 = vsel %vm210_vm7, %v206_v17, %v214_v38  ;;  %v280_v28 = vmul.f32 0.2, %v272_v13 }
  0xb3   :  { %v189_v23 = vmax.f32 %v156_v15, %v185_v39  ;;  %vm276_vm9 = vcmp.ge.f32.partialorder %v272_v13, 0.0  ;;  %v251_v0 = vsel %vm243_vm8, %v239_v12, %v247_v16 }
  0xb4   :  { %294 = vst.msk [vmem:[%s583_s4 + $0x18] sm:$0xff] %vm290_vm5, %v289_v21  ;;  %v284_v40 = vsel %vm276_vm9, %v272_v13, %v280_v28 }
  0xb5   :  { %v222_v29 = vmax.f32 %v189_v23, %v218_v24 }
  0xb7   :  { %v255_v22 = vmax.f32 %v222_v29, %v251_v0 }
  0xb9   :  { %v288_v30 = vmax.f32 %v255_v22, %v284_v40 }
  0xbb   :  { %293 = vst.msk [vmem:[%s583_s4 + $0x10] sm:$0xff] %vm290_vm5, %v288_v30 }

// kernel: _lambda_.48
= control target key start
LH: loop header
LB: loop body
LE: loop exit
PB: predicated region body
PF: predicated region fallthrough
CT: control target
= control target key end

     0   :  { %vm46_vm0 = vcmask 130048   ;;  %v422_v3 = vmov 0   ;;  %vm215_vm1 = vcmask 261120   ;;  %vm33_vm2 = vcmask 7168   ;;  %s584_s1 = inlined_call_operand.vmem [shape: f32[1,16,32], index: 1, kind: input, shape index: {}]   ;;  %s585_s4 = inlined_call_operand.vmem [shape: f32[16,16], index: 4, kind: input, shape index: {}]   ;;  %s586_s0 = inlined_call_operand.vmem [shape: f32[1,16,32], index: 0, kind: input, shape index: {}]   ;;  %s587_s2 = inlined_call_operand.vmem [shape: f32[1,32,32], index: 2, kind: input, shape index: {}]   ;;  %s588_s5 = inlined_call_operand.vmem [shape: f32[16,32], index: 5, kind: input, shape index: {}]   ;;  %s589_s3 = inlined_call_operand.vmem [shape: f32[16,16], index: 3, kind: input, shape index: {}]   ;;  %s590_s6 = inlined_call_operand.vmem [shape: f32[16,1], index: 6, kind: input, shape index: {}]   ;;  %s591_s8 = inlined_call_operand.vmem [shape: f32[1,16,1], index: 8, kind: output, shape index: {1}]   ;;  %s592_s7 = inlined_call_operand.vmem [shape: f32[1,16,32], index: 7, kind: output, shape index: {0}]   ;;  %s593_s9 = inlined_call_operand.vmem [shape: f32[1,16,1], index: 9, kind: output, shape index: {2}]  }
   0x1   :  { %v44_v0 = vld [vmem:[%s584_s1] sm:$0xff]  ;;  %v45_v1 = vld [vmem:[%s584_s1 + $0x8] sm:$0xff]  ;;  %421 = vset.pattern.permute.xlu0 %v422_v3  ;;  %v213_v10 = vld [vmem:[%s587_s2 + $0x10] sm:$0xff]  ;;  %v423_v21 = vmov 0.0  }
   0x2   :  { %v42_v2 = vld [vmem:[%s585_s4] sm:$0xff]  ;;  %v399_v4 = vpack.c.bf16 %v45_v1, %v44_v0  ;;  %v41_v6 = vld [vmem:[%s586_s0 + $0x8] sm:$0xff]  ;;  %v214_v12 = vld [vmem:[%s587_s2 + $0x18] sm:$0xff]  ;;  %35 = vst.msk [vmem:[%s591_s8 + $0x8] sm:$0xff] %vm33_vm2, %v423_v21 }
   0x3   :  { %378 = vmatprep.mubr.msk.f32.mxu0 %vm46_vm0, %v42_v2  ;;  %v40_v5 = vld [vmem:[%s586_s0] sm:$0xff]  ;;  %v212_v9 = vld [vmem:[%s587_s2 + $0x8] sm:$0xff]  ;;  %v411_v14 = vpack.c.bf16 %v214_v12, %v213_v10  ;;  %34 = vst.msk [vmem:[%s591_s8] sm:$0xff] %vm33_vm2, %v423_v21  ;;  %36 = vst.msk [vmem:[%s593_s9] sm:$0xff] %vm33_vm2, %v423_v21 }
   0x4   :  { %v403_v7 = vpack.c.bf16 %v41_v6, %v40_v5  ;;  %v211_v8 = vld [vmem:[%s587_s2] sm:$0xff]  ;;  %400 = vmatprep.subr.bf16.mxu0 %v399_v4  ;;  %v43_v13 = vld [vmem:[%s585_s4 + $0x8] sm:$0xff]  ;;  %37 = vst.msk [vmem:[%s593_s9 + $0x8] sm:$0xff] %vm33_vm2, %v423_v21 }
   0x5   :  { %v407_v11 = vpack.c.bf16 %v212_v9, %v211_v8  ;;  %402 = vmatpush3.bf16.msra.mxu0 %v399_v4  ;;  %v209_v15 = vld [vmem:[%s588_s5] sm:$0xff]  ;;  %v210_v18 = vld [vmem:[%s588_s5 + $0x8] sm:$0xff] }
   0x6   :  { %404 = vmatprep.subr.bf16.mxu0 %v403_v7  ;;  %v38_v16 = vld [vmem:[%s589_s3] sm:$0xff]  ;;  %396 = vmatprep.mubr.msk.f32.mxu1 %vm215_vm1, %v209_v15  ;;  %v300_v19 = vld [vmem:[%s590_s6 + $0x8] sm:$0xff] }
   0x7   :  { %408 = vmatprep.subr.bf16.mxu1 %v407_v11  ;;  %v299_v17 = vld [vmem:[%s590_s6] sm:$0xff]  ;;  %v39_v20 = vld [vmem:[%s589_s3 + $0x8] sm:$0xff] }
   0x8   :  { %410 = vmatpush3.bf16.msra.mxu1 %v407_v11  ;;  %379 = vmatmul.mubr.msk.f32.vlgmr.msra.gmra.mrb[0].mxu0 %vm46_vm0, %v43_v13 }
   0x9   :  { %412 = vmatprep.subr.bf16.mxu1 %v411_v14  ;;  %406 = vmatpush3.bf16.msra.mxu0 %v403_v7  ;;  %v316_v38 = vld [vmem:[%s591_s8 + $0x8] sm:$0xff] }
   0xa   :  { %385 = vmatprep.mubr.msk.f32.mxu0 %vm46_vm0, %v38_v16  ;;  %303 = vperm.xlu0 %421, %v299_v17   ;;  %v328_v41 = vld [vmem:[%s593_s9] sm:$0xff] }
   0xb   :  { %v315_v42 = vld [vmem:[%s591_s8] sm:$0xff]  ;;  %v329_v47 = vld [vmem:[%s593_s9 + $0x8] sm:$0xff] }
   0xc   :  { %414 = vmatpush3.bf16.msra.mxu1 %v411_v14 }
   0xe   :  { %308 = vperm.xlu0 %421, %v300_v19  }
   0xf   :  { %397 = vmatmul.mubr.msk.f32.vlgmr.msra.gmra.mrb[0].mxu1 %vm215_vm1, %v210_v18 }
  0x10   :  { %386 = vmatmul.mubr.msk.f32.vlgmr.msra.gmra.mrb[0].mxu0 %vm46_vm0, %v39_v20 }
  0x89   :  { %v304_v22 = vpop.permute.xlu0 %303 }
  0x8d   :  { %v309_v28 = vpop.permute.xlu0 %308 }
  0xe2   :  { %v398_v23 = vpop.f32.mrb[0].mxu1 }
  0xe3   :  { %v288_v24 = vpop.f32.mrb[1].mxu1  ;;  %v387_v25 = vpop.f32.mrb[0].mxu0 }
  0xe4   :  { %v415_v26 = vadd.f32 %v398_v23, %v387_v25  ;;  %v200_v27 = vpop.f32.mrb[1].mxu0 }
  0xe5   :  { %v416_v29 = vadd.f32 %v288_v24, %v200_v27 }
  0xe6   :  { %v312_v30 = vadd.f32 %v415_v26, %v309_v28 }
  0xe7   :  { %v311_v31 = vadd.f32 %v416_v29, %v304_v22 }
  0xe8   :  { %314 = vst.msk [vmem:[%s592_s7 + $0x8] sm:$0xff] %vm215_vm1, %v312_v30  ;;  %v320_v32 = vsel %vm215_vm1, %v312_v30, 0.0  ;;  %v331_v36 = vmul.f32 %v312_v30, %v312_v30 }
  0xe9   :  { %313 = vst.msk [vmem:[%s592_s7] sm:$0xff] %vm215_vm1, %v311_v31  ;;  %321 = vadd.xlane.f32.xlu1 %v320_v32  ;;  %v330_v33 = vmul.f32 %v311_v31, %v311_v31  ;;  %v317_v35 = vsel %vm215_vm1, %v311_v31, 0.0 }
  0xea   :  { %v335_v37 = vsel %vm215_vm1, %v331_v36, 0.0 }
  0xeb   :  { %v332_v34 = vsel %vm215_vm1, %v330_v33, 0.0 }
  0xec   :  { %333 = vadd.xlane.f32.xlu0 %v332_v34 }
  0xed   :  { %318 = vadd.xlane.f32.xlu1 %v317_v35 }
  0xf1   :  { %336 = vadd.xlane.f32.xlu1 %v335_v37 }
 0x176   :  { %v322_v39 = vpop.xlane.xlu1 %321 }
 0x177   :  { %v324_v40 = vadd.f32 %v322_v39, %v316_v38 }
 0x179   :  { %327 = vst.msk [vmem:[%s591_s8 + $0x8] sm:$0xff] %vm33_vm2, %v324_v40  ;;  %v334_v43 = vpop.xlane.xlu0 %333 }
 0x17a   :  { %v338_v44 = vadd.f32 %v334_v43, %v328_v41  ;;  %v319_v45 = vpop.xlane.xlu1 %318 }
 0x17b   :  { %v323_v46 = vadd.f32 %v319_v45, %v315_v42 }
 0x17c   :  { %340 = vst.msk [vmem:[%s593_s9] sm:$0xff] %vm33_vm2, %v338_v44 }
 0x17d   :  { %326 = vst.msk [vmem:[%s591_s8] sm:$0xff] %vm33_vm2, %v323_v46 }
 0x17e   :  { %v337_v48 = vpop.xlane.xlu1 %336 }
 0x17f   :  { %v339_v49 = vadd.f32 %v337_v48, %v329_v47 }
 0x181   :  { %341 = vst.msk [vmem:[%s593_s9 + $0x8] sm:$0xff] %vm33_vm2, %v339_v49 }

// kernel: _lambda_.49
= control target key start
LH: loop header
LB: loop body
LE: loop exit
PB: predicated region body
PF: predicated region fallthrough
CT: control target
= control target key end

     0   :  { %v78_v0 = vmov 0   ;;  %vm64_vm0 = vcmask 261120   ;;  %s123_s1 = inlined_call_operand.vmem [shape: f32[1,16,1], index: 1, kind: input, shape index: {}]   ;;  %s124_s2 = inlined_call_operand.vmem [shape: f32[1,16,1], index: 2, kind: input, shape index: {}]   ;;  %s125_s0 = inlined_call_operand.vmem [shape: f32[1,16,32], index: 0, kind: input, shape index: {}]   ;;  %s126_s3 = inlined_call_operand.vmem [shape: f32[1,16,32], index: 3, kind: output, shape index: {}]  }
   0x1   :  { %72 = vset.pattern.permute.xlu0 %v78_v0  ;;  %v16_v1 = vld [vmem:[%s123_s1] sm:$0xff]  ;;  %v17_v2 = vld [vmem:[%s123_s1 + $0x8] sm:$0xff]  ;;  %73 = vset.pattern.permute.xlu1 %v78_v0 }
   0x2   :  { %v20_v3 = vld [vmem:[%s124_s2] sm:$0xff]  ;;  %v18_v4 = vmul.f32 0.03125, %v16_v1  ;;  %v21_v5 = vld [vmem:[%s124_s2 + $0x8] sm:$0xff]  ;;  %v19_v7 = vmul.f32 0.03125, %v17_v2 }
   0x3   :  { %v22_v6 = vmul.f32 0.03125, %v20_v3  ;;  %v23_v8 = vmul.f32 0.03125, %v21_v5  ;;  %v14_v20 = vld [vmem:[%s125_s0] sm:$0xff]  ;;  %v15_v23 = vld [vmem:[%s125_s0 + $0x8] sm:$0xff] }
   0x4   :  { %36 = vperm.xlu0 %72, %v18_v4   ;;  %v24_v9 = vmul.f32 %v18_v4, %v18_v4  ;;  %v25_v10 = vmul.f32 %v19_v7, %v19_v7 }
   0x6   :  { %v26_v11 = vsub.f32 %v22_v6, %v24_v9  ;;  %v27_v12 = vsub.f32 %v23_v8, %v25_v10 }
   0x8   :  { %v28_v13 = vmax.f32 %v26_v11, 0.0  ;;  %v29_v14 = vmax.f32 %v27_v12, 0.0  ;;  %41 = vperm.xlu0 %72, %v19_v7  }
   0xa   :  { %v30_v15 = vadd.f32 1e-05, %v28_v13  ;;  %v31_v16 = vadd.f32 1e-05, %v29_v14 }
   0xc   :  { %74 = vrsqrt.f32 %v30_v15 }
   0xd   :  { %76 = vrsqrt.f32 %v31_v16 }
  0x16   :  { %v75_v17 = vpop.eup %74 }
  0x17   :  { %48 = vperm.xlu1 %73, %v75_v17   ;;  %v77_v18 = vpop.eup %76 }
  0x1b   :  { %53 = vperm.xlu1 %73, %v77_v18  }
  0x83   :  { %v37_v19 = vpop.permute.xlu0 %36 }
  0x84   :  { %v44_v21 = vsub.f32 %v14_v20, %v37_v19 }
  0x87   :  { %v42_v22 = vpop.permute.xlu0 %41 }
  0x88   :  { %v45_v26 = vsub.f32 %v15_v23, %v42_v22 }
  0x96   :  { %v49_v24 = vpop.permute.xlu1 %48 }
  0x97   :  { %v56_v25 = vmul.f32 %v49_v24, %v44_v21 }
  0x99   :  { %vm58_vm1 = vcmp.ge.f32.partialorder %v56_v25, 0.0  ;;  %v60_v27 = vmul.f32 0.2, %v56_v25 }
  0x9a   :  { %v54_v28 = vpop.permute.xlu1 %53 }
  0x9b   :  { %v62_v29 = vsel %vm58_vm1, %v56_v25, %v60_v27  ;;  %v57_v30 = vmul.f32 %v54_v28, %v45_v26 }
  0x9c   :  { %65 = vst.msk [vmem:[%s126_s3] sm:$0xff] %vm64_vm0, %v62_v29 }
  0x9d   :  { %vm59_vm2 = vcmp.ge.f32.partialorder %v57_v30, 0.0  ;;  %v61_v31 = vmul.f32 0.2, %v57_v30 }
  0x9f   :  { %v63_v32 = vsel %vm59_vm2, %v57_v30, %v61_v31 }
  0xa0   :  { %66 = vst.msk [vmem:[%s126_s3 + $0x8] sm:$0xff] %vm64_vm0, %v63_v32 }

// kernel: _lambda_.57
= control target key start
LH: loop header
LB: loop body
LE: loop exit
PB: predicated region body
PF: predicated region fallthrough
CT: control target
= control target key end

     0   :  { %vm30_vm0 = vcmask 130048   ;;  %v138_v3 = vmov 0   ;;  %vm112_vm1 = vcmask 261120   ;;  %s185_s0 = inlined_call_operand.vmem [shape: f32[1,16,32], index: 0, kind: input, shape index: {}]   ;;  %s186_s1 = inlined_call_operand.vmem [shape: f32[16,16], index: 1, kind: input, shape index: {}]   ;;  %s187_s2 = inlined_call_operand.vmem [shape: f32[16,1], index: 2, kind: input, shape index: {}]   ;;  %s188_s3 = inlined_call_operand.vmem [shape: f32[1,16,32], index: 3, kind: output, shape index: {}]  }
   0x1   :  { %v16_v0 = vld [vmem:[%s185_s0] sm:$0xff]  ;;  %v17_v1 = vld [vmem:[%s185_s0 + $0x8] sm:$0xff]  ;;  %137 = vset.pattern.permute.xlu0 %v138_v3 }
   0x2   :  { %v14_v2 = vld [vmem:[%s186_s1] sm:$0xff]  ;;  %v132_v4 = vpack.c.bf16 %v17_v1, %v16_v0  ;;  %v19_v6 = vld [vmem:[%s187_s2 + $0x8] sm:$0xff] }
   0x3   :  { %129 = vmatprep.mubr.msk.f32.mxu0 %vm30_vm0, %v14_v2  ;;  %v18_v5 = vld [vmem:[%s187_s2] sm:$0xff]  ;;  %v15_v7 = vld [vmem:[%s186_s1 + $0x8] sm:$0xff] }
   0x4   :  { %22 = vperm.xlu0 %137, %v18_v5   ;;  %133 = vmatprep.subr.bf16.mxu0 %v132_v4 }
   0x5   :  { %135 = vmatpush3.bf16.msra.mxu0 %v132_v4 }
   0x8   :  { %27 = vperm.xlu0 %137, %v19_v6   ;;  %130 = vmatmul.mubr.msk.f32.vlgmr.msra.gmra.mrb[0].mxu0 %vm30_vm0, %v15_v7 }
  0x83   :  { %v23_v8 = vpop.permute.xlu0 %22 }
  0x87   :  { %v28_v9 = vpop.permute.xlu0 %27 }
  0xdb   :  { %v131_v10 = vpop.f32.mrb[0].mxu0 }
  0xdc   :  { %v109_v11 = vadd.f32 %v131_v10, %v28_v9  ;;  %v103_v12 = vpop.f32.mrb[1].mxu0 }
  0xdd   :  { %v104_v13 = vadd.f32 %v103_v12, %v23_v8 }
  0xde   :  { %114 = vst.msk [vmem:[%s188_s3 + $0x8] sm:$0xff] %vm112_vm1, %v109_v11 }
  0xdf   :  { %113 = vst.msk [vmem:[%s188_s3] sm:$0xff] %vm112_vm1, %v104_v13 }

// kernel: _lambda_.52
= control target key start
LH: loop header
LB: loop body
LE: loop exit
PB: predicated region body
PF: predicated region fallthrough
CT: control target
= control target key end

     0   :  { %s837_s12 = smov 0   ;;  %s839_s13 = smov 0   ;;  %s894_s0 = inlined_call_operand.vmem [shape: f32[1,2,8,32], index: 0, kind: input, shape index: {}]   ;;  %s895_s1 = inlined_call_operand.vmem [shape: f32[1,2,8,32], index: 1, kind: input, shape index: {}]   ;;  %s896_s2 = inlined_call_operand.vmem [shape: f32[1,2,8,32], index: 2, kind: input, shape index: {}]   ;;  %s897_s3 = inlined_call_operand.vmem [shape: f32[1,2,8,32], index: 3, kind: output, shape index: {}]  }
   0x1   :  { %s841_s14 = smov 0  }
   0x2 LB: > { %s28_s15 = sadd.s32 1, %s808_s13  ;;  %p694_p0 = scmp.ge.s32.totalorder %s812_s14, 1  ;;  %s812_s14 = sphi %s841_s14, %s13_s14   ;;  %s808_s13 = sphi %s839_s13, %s899_s13   ;;  %s804_s12 = sphi %s837_s12, %s898_s12  }
   0x3   : > { %p30_p1 = scmp.ge.s32.totalorder %s28_s15, 2  ;;  %p200_p2 = scmp.lt.s32.totalorder %s812_s14, 3 }
   0x5   : > { %s901_s15 = smov (%p30_p1, %s28_s15), 0  ;;  %p201_p3 = pnand %p694_p0, %p200_p2 }
   0x6   : > { %p254_p4 = scmp.lt.s32.totalorder (!%p201_p3), %s804_s12, 1  ;;  %vm326_vm0 = vcmask (!%p201_p3), 64512   ;;  %vm424_vm1 = vcmask (!%p201_p3), 261120   ;;  %v814_v35 = vmov (!%p201_p3), 0.0|0.0   ;;  %vm815_vm2 = vmmov (!%p201_p3), 0  }
   0x7   : > { %204 = sbr.rel (%p201_p3) target bundleno = 914 (0x392), region = 32  ;;  %739 = vmatprep.subr.bf16.mxu1 (!%p201_p3), %v814_v35  ;;  %v816_v36 = vmov (!%p201_p3), 0.0   ;;  %vm741_vm3 = vmpackc.low (!%p201_p3), %vm424_vm1, %vm424_vm1 }
   0x8   : > { %736 = vmatprep.mubr.msk.f32.mxu1 (!%p201_p3), %vm815_vm2, %v816_v36 }
   0xe   : > { %s903_s12 = smov (!%p254_p4, %s804_s12), 1 }
   0xf   : > { %s855_s16 = sshll.u32 %s903_s12, 3 }
  0x10   : > { %s262_s19 = scalar_lea.vmem %s894_s0, %s855_s16  ;;  %s270_s22 = scalar_lea.vmem %s895_s1, %s855_s16 }
  0x11   : > { %v290_v0 = vld [vmem:[%s262_s19] sm:$0xff]  ;;  %s278_s25 = scalar_lea.vmem %s896_s2, %s855_s16  ;;  %s289_s28 = scalar_lea.vmem %s897_s3, %s855_s16 }
  0x12   : > { %v291_v1 = vmul.f32 0.35355338, %v290_v0  ;;  %v292_v2 = vld [vmem:[%s270_s22] sm:$0xff] }
  0x13   : > { %720 = vmatprep.subr.mxu0 %v292_v2  ;;  %v293_v51 = vld [vmem:[%s278_s25] sm:$0xff] }
  0x14   : > { %294 = vxpose.xlu0.b32.start.end [1/1] (short) (narrow) %v291_v1, 32  ;;  %721 = vmatpush3.msra.mxu0 %v292_v2 }
  0x94   : > { %v310_v3 = vpop.trf.xlu0 }
  0x95   : > { %722 = vmatprep.mubr.msk.f32.mxu0 %vm326_vm0, %v310_v3 }
  0x98   : > { %v311_v4 = vpop.trf.xlu0 }
  0x99   : > { %723 = vmatmul.mubr.msk.f32.vlgmr.msra.gmra.mrb[0].mxu0 %vm326_vm0, %v311_v4 }
  0x9c   : > { %v312_v5 = vpop.trf.xlu0 }
  0x9d   : > { %725 = vmatprep.mubr.msk.f32.mxu0 %vm326_vm0, %v312_v5 }
  0xa0   : > { %v313_v6 = vpop.trf.xlu0 }
  0xa1   : > { %726 = vmatmul.mubr.msk.f32.gmra.mrb[2].mxu0 %vm326_vm0, %v313_v6 }
 0x16c   : > { %v724_v7 = vpop.f32.mrb[0].mxu0 }
 0x16d   : > { %v405_v8 = vpop.f32.mrb[1].mxu0  ;;  %v428_v9 = vsel %vm424_vm1, %v724_v7, -inf }
 0x16e   : > { %429 = vmax.xlane.f32.xlu1 %v428_v9  ;;  %v425_v10 = vsel %vm424_vm1, %v405_v8, -inf }
 0x16f   : > { %426 = vmax.xlane.f32.xlu0 %v425_v10 }
 0x174   : > { %v727_v11 = vpop.f32.mrb[2].mxu0 }
 0x175   : > { %v415_v12 = vpop.f32.mrb[3].mxu0  ;;  %v434_v14 = vsel %vm424_vm1, %v727_v11, -inf }
 0x176   : > { %v431_v13 = vsel %vm424_vm1, %v415_v12, -inf }
 0x177   : > { %432 = vmax.xlane.f32.xlu1 %v431_v13 }
 0x17b   : > { %435 = vmax.xlane.f32.xlu1 %v434_v14 }
 0x1fb   : > { %v430_v15 = vpop.xlane.xlu1 %429 }
 0x1fc   : > { %v438_v16 = vsub.f32 %v724_v7, %v430_v15  ;;  %v427_v17 = vpop.xlane.xlu0 %426 }
 0x1fd   : > { %v437_v18 = vsub.f32 %v405_v8, %v427_v17 }
 0x1fe   : > { %v443_v19 = vmul.f32 1.442695, %v438_v16 }
 0x1ff   : > { %v441_v20 = vmul.f32 1.442695, %v437_v18 }
 0x200   : > { %774 = vpow2.f32 %v443_v19 }
 0x201   : > { %776 = vpow2.f32 %v441_v20 }
 0x204   : > { %v433_v21 = vpop.xlane.xlu1 %432 }
 0x205   : > { %v439_v22 = vsub.f32 %v415_v12, %v433_v21 }
 0x207   : > { %v445_v23 = vmul.f32 1.442695, %v439_v22 }
 0x208   : > { %v436_v24 = vpop.xlane.xlu1 %435 }
 0x209   : > { %778 = vpow2.f32 %v445_v23  ;;  %v440_v25 = vsub.f32 %v727_v11, %v436_v24 }
 0x20a   : > { %v775_v26 = vpop.eup %774 }
 0x20b   : > { %v447_v27 = vmul.f32 1.442695, %v440_v25  ;;  %v452_v28 = vsel %vm424_vm1, %v775_v26, 0.0  ;;  %v777_v29 = vpop.eup %776 }
 0x20c   : > { %453 = vadd.xlane.f32.xlu1 %v452_v28  ;;  %v449_v30 = vsel %vm424_vm1, %v777_v29, 0.0 }
 0x20d   : > { %780 = vpow2.f32 %v447_v27 }
 0x210   : > { %450 = vadd.xlane.f32.xlu1 %v449_v30 }
 0x213   : > { %v779_v31 = vpop.eup %778 }
 0x214   : > { %v455_v32 = vsel %vm424_vm1, %v779_v31, 0.0 }
 0x215   : > { %456 = vadd.xlane.f32.xlu1 %v455_v32 }
 0x217   : > { %v781_v33 = vpop.eup %780 }
 0x218   : > { %v458_v34 = vsel %vm424_vm1, %v781_v33, 0.0 }
 0x219   : > { %459 = vadd.xlane.f32.xlu1 %v458_v34 }
 0x299   : > { %v454_v37 = vpop.xlane.xlu1 %453 }
 0x29a   : > { %782 = vrcp.f32 %v454_v37 }
 0x29d   : > { %v451_v38 = vpop.xlane.xlu1 %450 }
 0x29e   : > { %784 = vrcp.f32 %v451_v38 }
 0x2a2   : > { %v457_v39 = vpop.xlane.xlu1 %456 }
 0x2a3   : > { %786 = vrcp.f32 %v457_v39 }
 0x2a4   : > { %v783_v40 = vpop.eup %782 }
 0x2a5   : > { %v466_v44 = vmul.f32 %v783_v40, %v775_v26 }
 0x2a6   : > { %v460_v41 = vpop.xlane.xlu1 %459 }
 0x2a7   : > { %788 = vrcp.f32 %v460_v41 }
 0x2a8   : > { %v785_v42 = vpop.eup %784 }
 0x2a9   : > { %v465_v43 = vmul.f32 %v785_v42, %v777_v29 }
 0x2ab   : > { %v740_v45 = vpack.c.bf16 %v466_v44, %v465_v43 }
 0x2ad   : > { %742 = vmatpush3.bf16.xpose.msk.msra.mxu1 %vm741_vm3, %v740_v45  ;;  %v787_v46 = vpop.eup %786 }
 0x2ae   : > { %743 = vmatprep.subr.bf16.mxu1 %v814_v35  ;;  %v467_v48 = vmul.f32 %v787_v46, %v779_v31 }
 0x2b1   : > { %v789_v47 = vpop.eup %788 }
 0x2b2   : > { %v468_v49 = vmul.f32 %v789_v47, %v781_v33 }
 0x2b4   : > { %v744_v50 = vpack.c.bf16 %v468_v49, %v467_v48 }
 0x2b6   : > { %746 = vmatpush3.bf16.xpose.msk.msra.mxu1 %vm741_vm3, %v744_v50 }
 0x2bd   : > { %737 = vmatmul.mubr.msk.f32.vlgmr.msra.gmra.mrb[0].mxu1 %vm424_vm1, %v293_v51 }
 0x390   : > { %v550_v52 = vpop.f32.mrb[0].mxu1 }
 0x391   : > { %554 = vst.msk [vmem:[%s289_s28] sm:$0xff] %vm424_vm1, %v550_v52  ;;  %v738_v53 = vpop.f32.mrb[1].mxu1 }
 0x392 PF: > { %s13_s14 = sadd.s32 1, %s812_s14   ;;  %s898_s12 = smov %s808_s13 }
 0x393   : > { %p10_p5 = scmp.ge.s32.totalorder %s13_s14, 4   ;;  %s899_s13 = smov %s901_s15 }
 0x395   :  { %12 = sbr.rel (!%p10_p5) target bundleno = 2 (0x2), region = 68 }

// kernel: _lambda_.56
= control target key start
LH: loop header
LB: loop body
LE: loop exit
PB: predicated region body
PF: predicated region fallthrough
CT: control target
= control target key end

     0   :  { %vm32_vm0 = vcmask 261120   ;;  %v149_v3 = vmov 0   ;;  %s204_s0 = inlined_call_operand.vmem [shape: f32[1,32,32], index: 0, kind: input, shape index: {}]   ;;  %s205_s1 = inlined_call_operand.vmem [shape: f32[16,32], index: 1, kind: input, shape index: {}]   ;;  %s206_s2 = inlined_call_operand.vmem [shape: f32[16,1], index: 2, kind: input, shape index: {}]   ;;  %s207_s3 = inlined_call_operand.vmem [shape: f32[1,16,32], index: 3, kind: output, shape index: {}]  }
   0x1   :  { %v16_v0 = vld [vmem:[%s204_s0] sm:$0xff]  ;;  %v17_v1 = vld [vmem:[%s204_s0 + $0x8] sm:$0xff]  ;;  %v18_v2 = vld [vmem:[%s204_s0 + $0x10] sm:$0xff]  ;;  %148 = vset.pattern.permute.xlu0 %v149_v3 }
   0x2   :  { %v139_v4 = vpack.c.bf16 %v17_v1, %v16_v0  ;;  %v19_v5 = vld [vmem:[%s204_s0 + $0x18] sm:$0xff]  ;;  %v14_v6 = vld [vmem:[%s205_s1] sm:$0xff]  ;;  %v21_v9 = vld [vmem:[%s206_s2 + $0x8] sm:$0xff] }
   0x3   :  { %v143_v7 = vpack.c.bf16 %v19_v5, %v18_v2  ;;  %136 = vmatprep.mubr.msk.f32.mxu0 %vm32_vm0, %v14_v6  ;;  %v20_v8 = vld [vmem:[%s206_s2] sm:$0xff]  ;;  %v15_v10 = vld [vmem:[%s205_s1 + $0x8] sm:$0xff] }
   0x4   :  { %140 = vmatprep.subr.bf16.mxu0 %v139_v4  ;;  %24 = vperm.xlu0 %148, %v20_v8  }
   0x5   :  { %142 = vmatpush3.bf16.msra.mxu0 %v139_v4 }
   0x6   :  { %144 = vmatprep.subr.bf16.mxu0 %v143_v7 }
   0x8   :  { %29 = vperm.xlu0 %148, %v21_v9  }
   0x9   :  { %146 = vmatpush3.bf16.msra.mxu0 %v143_v7 }
   0xc   :  { %137 = vmatmul.mubr.msk.f32.vlgmr.msra.gmra.mrb[0].mxu0 %vm32_vm0, %v15_v10 }
  0x83   :  { %v25_v11 = vpop.permute.xlu0 %24 }
  0x87   :  { %v30_v12 = vpop.permute.xlu0 %29 }
  0xdf   :  { %v138_v13 = vpop.f32.mrb[0].mxu0 }
  0xe0   :  { %v111_v14 = vadd.f32 %v138_v13, %v30_v12  ;;  %v105_v15 = vpop.f32.mrb[1].mxu0 }
  0xe1   :  { %v106_v16 = vadd.f32 %v105_v15, %v25_v11 }
  0xe2   :  { %115 = vst.msk [vmem:[%s207_s3 + $0x8] sm:$0xff] %vm32_vm0, %v111_v14 }
  0xe3   :  { %114 = vst.msk [vmem:[%s207_s3] sm:$0xff] %vm32_vm0, %v106_v16 }

// kernel: _lambda_.54
= control target key start
LH: loop header
LB: loop body
LE: loop exit
PB: predicated region body
PF: predicated region fallthrough
CT: control target
= control target key end

     0   :  { %vm48_vm0 = vcmask 130048   ;;  %v397_v3 = vmov 0   ;;  %vm27_vm1 = vcmask 7168   ;;  %v398_v19 = vmov 0.0   ;;  %s607_s1 = inlined_call_operand.vmem [shape: f32[1,16,32], index: 1, kind: input, shape index: {}]   ;;  %s608_s0 = inlined_call_operand.vmem [shape: f32[1,16,32], index: 0, kind: input, shape index: {}]   ;;  %s609_s3 = inlined_call_operand.vmem [shape: f32[32,16], index: 3, kind: input, shape index: {}]   ;;  %s610_s2 = inlined_call_operand.vmem [shape: f32[32,16], index: 2, kind: input, shape index: {}]   ;;  %s611_s4 = inlined_call_operand.vmem [shape: f32[32,1], index: 4, kind: input, shape index: {}]   ;;  %s612_s6 = inlined_call_operand.vmem [shape: f32[1,32,1], index: 6, kind: output, shape index: {1}]   ;;  %s613_s5 = inlined_call_operand.vmem [shape: f32[1,32,32], index: 5, kind: output, shape index: {0}]   ;;  %s614_s7 = inlined_call_operand.vmem [shape: f32[1,32,1], index: 7, kind: output, shape index: {2}]  }
   0x1   :  { %v46_v0 = vld [vmem:[%s607_s1] sm:$0xff]  ;;  %v47_v1 = vld [vmem:[%s607_s1 + $0x8] sm:$0xff]  ;;  %395 = vset.pattern.permute.xlu0 %v397_v3  ;;  %396 = vset.pattern.permute.xlu1 %v397_v3  ;;  %v245_v11 = vld [vmem:[%s611_s4 + $0x10] sm:$0xff]  ;;  %29 = vst.msk [vmem:[%s612_s6 + $0x8] sm:$0xff] %vm27_vm1, %v398_v19  ;;  %vm271_vm2 = vcmask 261120  }
   0x2   :  { %v40_v2 = vld [vmem:[%s608_s0] sm:$0xff]  ;;  %v381_v4 = vpack.c.bf16 %v47_v1, %v46_v0  ;;  %v41_v5 = vld [vmem:[%s608_s0 + $0x8] sm:$0xff]  ;;  %v44_v13 = vld [vmem:[%s609_s3 + $0x10] sm:$0xff]  ;;  %259 = vperm.xlu1 %396, %v245_v11   ;;  %28 = vst.msk [vmem:[%s612_s6] sm:$0xff] %vm27_vm1, %v398_v19 }
   0x3   :  { %v42_v6 = vld [vmem:[%s609_s3] sm:$0xff]  ;;  %v385_v8 = vpack.c.bf16 %v41_v5, %v40_v2  ;;  %v43_v9 = vld [vmem:[%s609_s3 + $0x8] sm:$0xff]  ;;  %v38_v14 = vld [vmem:[%s610_s2 + $0x10] sm:$0xff]  ;;  %30 = vst.msk [vmem:[%s612_s6 + $0x10] sm:$0xff] %vm27_vm1, %v398_v19 }
   0x4   :  { %v36_v7 = vld [vmem:[%s610_s2] sm:$0xff]  ;;  %365 = vmatprep.mubr.msk.f32.mxu1 %vm48_vm0, %v42_v6  ;;  %382 = vmatprep.subr.bf16.mxu1 %v381_v4  ;;  %v37_v12 = vld [vmem:[%s610_s2 + $0x8] sm:$0xff]  ;;  %v246_v16 = vld [vmem:[%s611_s4 + $0x18] sm:$0xff]  ;;  %31 = vst.msk [vmem:[%s612_s6 + $0x18] sm:$0xff] %vm27_vm1, %v398_v19 }
   0x5   :  { %375 = vmatprep.mubr.msk.f32.mxu0 %vm48_vm0, %v36_v7  ;;  %386 = vmatprep.subr.bf16.mxu0 %v385_v8  ;;  %v243_v10 = vld [vmem:[%s611_s4] sm:$0xff]  ;;  %v244_v15 = vld [vmem:[%s611_s4 + $0x8] sm:$0xff]  ;;  %v45_v17 = vld [vmem:[%s609_s3 + $0x18] sm:$0xff]  ;;  %32 = vst.msk [vmem:[%s614_s7] sm:$0xff] %vm27_vm1, %v398_v19 }
   0x6   :  { %384 = vmatpush3.bf16.msra.mxu1 %v381_v4  ;;  %388 = vmatpush3.bf16.msra.mxu0 %v385_v8  ;;  %v39_v18 = vld [vmem:[%s610_s2 + $0x18] sm:$0xff]  ;;  %33 = vst.msk [vmem:[%s614_s7 + $0x8] sm:$0xff] %vm27_vm1, %v398_v19  ;;  %34 = vst.msk [vmem:[%s614_s7 + $0x10] sm:$0xff] %vm27_vm1, %v398_v19 }
   0x7   :  { %249 = vperm.xlu0 %395, %v243_v10   ;;  %264 = vperm.xlu1 %396, %v246_v16   ;;  %35 = vst.msk [vmem:[%s614_s7 + $0x18] sm:$0xff] %vm27_vm1, %v398_v19 }
   0x8   :  { %v277_v52 = vld [vmem:[%s612_s6 + $0x8] sm:$0xff] }
   0x9   :  { %366 = vmatmul.mubr.msk.f32.vlgmr.msra.gmra.mrb[0].mxu1 %vm48_vm0, %v43_v9  ;;  %376 = vmatmul.mubr.msk.f32.vlgmr.msra.gmra.mrb[0].mxu0 %vm48_vm0, %v37_v12  ;;  %v276_v53 = vld [vmem:[%s612_s6] sm:$0xff] }
   0xa   :  { %368 = vmatprep.mubr.msk.f32.mxu1 %vm48_vm0, %v44_v13  ;;  %378 = vmatprep.mubr.msk.f32.mxu0 %vm48_vm0, %v38_v14  ;;  %v278_v6 = vld [vmem:[%s612_s6 + $0x10] sm:$0xff] }
   0xb   :  { %254 = vperm.xlu0 %395, %v244_v15   ;;  %v279_v1 = vld [vmem:[%s612_s6 + $0x18] sm:$0xff] }
   0xc   :  { %v301_v58 = vld [vmem:[%s614_s7] sm:$0xff] }
   0xd   :  { %369 = vmatmul.mubr.msk.f32.gmra.mrb[2].mxu1 %vm48_vm0, %v45_v17  ;;  %379 = vmatmul.mubr.msk.f32.gmra.mrb[2].mxu0 %vm48_vm0, %v39_v18  ;;  %v302_v59 = vld [vmem:[%s614_s7 + $0x8] sm:$0xff]  ;;  %v303_v0 = vld [vmem:[%s614_s7 + $0x10] sm:$0xff] }
   0xe   :  { %v304_v9 = vld [vmem:[%s614_s7 + $0x18] sm:$0xff] }
  0x81   :  { %v260_v21 = vpop.permute.xlu1 %259 }
  0x86   :  { %v250_v20 = vpop.permute.xlu0 %249  ;;  %v265_v31 = vpop.permute.xlu1 %264 }
  0x8a   :  { %v255_v23 = vpop.permute.xlu0 %254 }
  0xdc   :  { %v367_v22 = vpop.f32.mrb[0].mxu1  ;;  %v377_v24 = vpop.f32.mrb[0].mxu0 }
  0xdd   :  { %v127_v25 = vpop.f32.mrb[1].mxu1  ;;  %v230_v26 = vadd.f32 %v377_v24, %v367_v22  ;;  %v224_v27 = vpop.f32.mrb[1].mxu0 }
  0xde   :  { %v225_v28 = vadd.f32 %v224_v27, %v127_v25 }
  0xdf   :  { %v268_v29 = vadd.f32 %v255_v23, %v230_v26 }
  0xe0   :  { %v370_v30 = vpop.f32.mrb[2].mxu1  ;;  %v267_v32 = vadd.f32 %v250_v20, %v225_v28  ;;  %v380_v33 = vpop.f32.mrb[2].mxu0 }
  0xe1   :  { %v137_v34 = vpop.f32.mrb[3].mxu1  ;;  %273 = vst.msk [vmem:[%s613_s5 + $0x8] sm:$0xff] %vm271_vm2, %v268_v29  ;;  %v240_v35 = vadd.f32 %v380_v33, %v370_v30  ;;  %v234_v36 = vpop.f32.mrb[3].mxu0  ;;  %v283_v37 = vsel %vm271_vm2, %v268_v29, 0.0  ;;  %v306_v41 = vmul.f32 %v268_v29, %v268_v29 }
  0xe2   :  { %272 = vst.msk [vmem:[%s613_s5] sm:$0xff] %vm271_vm2, %v267_v32  ;;  %v235_v38 = vadd.f32 %v234_v36, %v137_v34  ;;  %284 = vadd.xlane.f32.xlu1 %v283_v37  ;;  %v280_v39 = vsel %vm271_vm2, %v267_v32, 0.0  ;;  %v305_v40 = vmul.f32 %v267_v32, %v267_v32 }
  0xe3   :  { %v270_v42 = vadd.f32 %v265_v31, %v240_v35  ;;  %281 = vadd.xlane.f32.xlu0 %v280_v39  ;;  %v312_v45 = vsel %vm271_vm2, %v306_v41, 0.0 }
  0xe4   :  { %v269_v43 = vadd.f32 %v260_v21, %v235_v38  ;;  %v309_v44 = vsel %vm271_vm2, %v305_v40, 0.0 }
  0xe5   :  { %275 = vst.msk [vmem:[%s613_s5 + $0x18] sm:$0xff] %vm271_vm2, %v270_v42  ;;  %v289_v48 = vsel %vm271_vm2, %v270_v42, 0.0  ;;  %v308_v50 = vmul.f32 %v270_v42, %v270_v42 }
  0xe6   :  { %274 = vst.msk [vmem:[%s613_s5 + $0x10] sm:$0xff] %vm271_vm2, %v269_v43  ;;  %310 = vadd.xlane.f32.xlu1 %v309_v44  ;;  %v307_v46 = vmul.f32 %v269_v43, %v269_v43  ;;  %v286_v49 = vsel %vm271_vm2, %v269_v43, 0.0 }
  0xe7   :  { %313 = vadd.xlane.f32.xlu0 %v312_v45  ;;  %v318_v51 = vsel %vm271_vm2, %v308_v50, 0.0 }
  0xe8   :  { %v315_v47 = vsel %vm271_vm2, %v307_v46, 0.0 }
  0xea   :  { %316 = vadd.xlane.f32.xlu1 %v315_v47 }
  0xeb   :  { %290 = vadd.xlane.f32.xlu0 %v289_v48 }
  0xef   :  { %287 = vadd.xlane.f32.xlu0 %v286_v49 }
  0xf3   :  { %319 = vadd.xlane.f32.xlu0 %v318_v51 }
 0x16f   :  { %v285_v54 = vpop.xlane.xlu1 %284 }
 0x170   :  { %v293_v55 = vadd.f32 %v285_v54, %v277_v52  ;;  %v282_v56 = vpop.xlane.xlu0 %281 }
 0x171   :  { %v292_v57 = vadd.f32 %v282_v56, %v276_v53 }
 0x172   :  { %298 = vst.msk [vmem:[%s612_s6 + $0x8] sm:$0xff] %vm27_vm1, %v293_v55 }
 0x173   :  { %297 = vst.msk [vmem:[%s612_s6] sm:$0xff] %vm27_vm1, %v292_v57  ;;  %v311_v60 = vpop.xlane.xlu1 %310 }
 0x174   :  { %v321_v61 = vadd.f32 %v311_v60, %v301_v58  ;;  %v314_v62 = vpop.xlane.xlu0 %313 }
 0x175   :  { %v322_v63 = vadd.f32 %v314_v62, %v302_v59 }
 0x176   :  { %325 = vst.msk [vmem:[%s614_s7] sm:$0xff] %vm27_vm1, %v321_v61 }
 0x177   :  { %326 = vst.msk [vmem:[%s614_s7 + $0x8] sm:$0xff] %vm27_vm1, %v322_v63  ;;  %v317_v2 = vpop.xlane.xlu1 %316 }
 0x178   :  { %v323_v3 = vadd.f32 %v317_v2, %v303_v0  ;;  %v291_v4 = vpop.xlane.xlu0 %290 }
 0x179   :  { %v295_v5 = vadd.f32 %v291_v4, %v279_v1 }
 0x17a   :  { %327 = vst.msk [vmem:[%s614_s7 + $0x10] sm:$0xff] %vm27_vm1, %v323_v3 }
 0x17b   :  { %300 = vst.msk [vmem:[%s612_s6 + $0x18] sm:$0xff] %vm27_vm1, %v295_v5 }
 0x17c   :  { %v288_v7 = vpop.xlane.xlu0 %287 }
 0x17d   :  { %v294_v8 = vadd.f32 %v288_v7, %v278_v6 }
 0x17f   :  { %299 = vst.msk [vmem:[%s612_s6 + $0x10] sm:$0xff] %vm27_vm1, %v294_v8 }
 0x180   :  { %v320_v10 = vpop.xlane.xlu0 %319 }
 0x181   :  { %v324_v11 = vadd.f32 %v320_v10, %v304_v9 }
 0x183   :  { %328 = vst.msk [vmem:[%s614_s7 + $0x18] sm:$0xff] %vm27_vm1, %v324_v11 }

// kernel: _lambda_.55
= control target key start
LH: loop header
LB: loop body
LE: loop exit
PB: predicated region body
PF: predicated region fallthrough
CT: control target
= control target key end

     0   :  { %v126_v0 = vmov 0   ;;  %vm106_vm0 = vcmask 261120   ;;  %s199_s1 = inlined_call_operand.vmem [shape: f32[1,32,1], index: 1, kind: input, shape index: {}]   ;;  %s200_s2 = inlined_call_operand.vmem [shape: f32[1,32,1], index: 2, kind: input, shape index: {}]   ;;  %s201_s0 = inlined_call_operand.vmem [shape: f32[1,32,32], index: 0, kind: input, shape index: {}]   ;;  %s202_s3 = inlined_call_operand.vmem [shape: f32[1,32,32], index: 3, kind: output, shape index: {}]  }
   0x1   :  { %117 = vset.pattern.permute.xlu1 %v126_v0  ;;  %116 = vset.pattern.permute.xlu0 %v126_v0  ;;  %v20_v1 = vld [vmem:[%s199_s1 + $0x10] sm:$0xff]  ;;  %v18_v3 = vld [vmem:[%s199_s1] sm:$0xff]  ;;  %v21_v8 = vld [vmem:[%s199_s1 + $0x18] sm:$0xff] }
   0x2   :  { %v28_v2 = vld [vmem:[%s200_s2 + $0x10] sm:$0xff]  ;;  %v24_v4 = vmul.f32 0.03125, %v20_v1  ;;  %v22_v6 = vmul.f32 0.03125, %v18_v3  ;;  %v26_v7 = vld [vmem:[%s200_s2] sm:$0xff]  ;;  %v29_v9 = vld [vmem:[%s200_s2 + $0x18] sm:$0xff]  ;;  %v25_v11 = vmul.f32 0.03125, %v21_v8 }
   0x3   :  { %v32_v5 = vmul.f32 0.03125, %v28_v2  ;;  %v30_v10 = vmul.f32 0.03125, %v26_v7  ;;  %v33_v12 = vmul.f32 0.03125, %v29_v9  ;;  %v19_v13 = vld [vmem:[%s199_s1 + $0x8] sm:$0xff]  ;;  %v14_v39 = vld [vmem:[%s201_s0] sm:$0xff]  ;;  %v16_v44 = vld [vmem:[%s201_s0 + $0x10] sm:$0xff] }
   0x4   :  { %v27_v14 = vld [vmem:[%s200_s2 + $0x8] sm:$0xff]  ;;  %66 = vperm.xlu1 %117, %v24_v4   ;;  %v36_v15 = vmul.f32 %v24_v4, %v24_v4  ;;  %56 = vperm.xlu0 %116, %v22_v6   ;;  %v34_v16 = vmul.f32 %v22_v6, %v22_v6  ;;  %v23_v17 = vmul.f32 0.03125, %v19_v13  ;;  %v37_v19 = vmul.f32 %v25_v11, %v25_v11  ;;  %v17_v48 = vld [vmem:[%s201_s0 + $0x18] sm:$0xff] }
   0x5   :  { %v31_v18 = vmul.f32 0.03125, %v27_v14  ;;  %v15_v42 = vld [vmem:[%s201_s0 + $0x8] sm:$0xff] }
   0x6   :  { %v40_v20 = vsub.f32 %v32_v5, %v36_v15  ;;  %v38_v21 = vsub.f32 %v30_v10, %v34_v16  ;;  %v35_v22 = vmul.f32 %v23_v17, %v23_v17  ;;  %v41_v23 = vsub.f32 %v33_v12, %v37_v19 }
   0x8   :  { %v44_v24 = vmax.f32 %v40_v20, 0.0  ;;  %v42_v25 = vmax.f32 %v38_v21, 0.0  ;;  %71 = vperm.xlu1 %117, %v25_v11   ;;  %v39_v26 = vsub.f32 %v31_v18, %v35_v22  ;;  %61 = vperm.xlu0 %116, %v23_v17   ;;  %v45_v27 = vmax.f32 %v41_v23, 0.0 }
   0xa   :  { %v48_v28 = vadd.f32 1e-05, %v44_v24  ;;  %v46_v29 = vadd.f32 1e-05, %v42_v25  ;;  %v43_v30 = vmax.f32 %v39_v26, 0.0 }
   0xb   :  { %v49_v32 = vadd.f32 1e-05, %v45_v27 }
   0xc   :  { %v47_v31 = vadd.f32 1e-05, %v43_v30  ;;  %118 = vrsqrt.f32 %v46_v29 }
   0xd   :  { %120 = vrsqrt.f32 %v48_v28 }
   0xe   :  { %122 = vrsqrt.f32 %v47_v31 }
   0xf   :  { %124 = vrsqrt.f32 %v49_v32 }
  0x16   :  { %v119_v33 = vpop.eup %118 }
  0x17   :  { %v121_v34 = vpop.eup %120  ;;  %80 = vperm.xlu0 %116, %v119_v33  }
  0x18   :  { %v123_v35 = vpop.eup %122 }
  0x19   :  { %85 = vperm.xlu1 %117, %v123_v35   ;;  %v125_v36 = vpop.eup %124 }
  0x1b   :  { %90 = vperm.xlu0 %116, %v121_v34  }
  0x1d   :  { %95 = vperm.xlu1 %117, %v125_v36  }
  0x83   :  { %v57_v37 = vpop.permute.xlu0 %56  ;;  %v67_v38 = vpop.permute.xlu1 %66 }
  0x84   :  { %v74_v43 = vsub.f32 %v14_v39, %v57_v37  ;;  %v76_v50 = vsub.f32 %v16_v44, %v67_v38 }
  0x87   :  { %v62_v40 = vpop.permute.xlu0 %61  ;;  %v72_v41 = vpop.permute.xlu1 %71 }
  0x88   :  { %v75_v46 = vsub.f32 %v15_v42, %v62_v40  ;;  %v77_v54 = vsub.f32 %v17_v48, %v72_v41 }
  0x96   :  { %v81_v45 = vpop.permute.xlu0 %80 }
  0x97   :  { %v98_v47 = vmul.f32 %v81_v45, %v74_v43 }
  0x98   :  { %v86_v49 = vpop.permute.xlu1 %85 }
  0x99   :  { %v99_v51 = vmul.f32 %v86_v49, %v75_v46  ;;  %v102_v52 = vmax.f32 %v98_v47, 0.0 }
  0x9a   :  { %v91_v53 = vpop.permute.xlu0 %90 }
  0x9b   :  { %v103_v55 = vmax.f32 %v99_v51, 0.0  ;;  %107 = vst.msk [vmem:[%s202_s3] sm:$0xff] %vm106_vm0, %v102_v52  ;;  %v100_v56 = vmul.f32 %v91_v53, %v76_v50 }
  0x9c   :  { %v96_v57 = vpop.permute.xlu1 %95 }
  0x9d   :  { %108 = vst.msk [vmem:[%s202_s3 + $0x8] sm:$0xff] %vm106_vm0, %v103_v55  ;;  %v101_v58 = vmul.f32 %v96_v57, %v77_v54  ;;  %v104_v59 = vmax.f32 %v100_v56, 0.0 }
  0x9f   :  { %v105_v60 = vmax.f32 %v101_v58, 0.0  ;;  %109 = vst.msk [vmem:[%s202_s3 + $0x10] sm:$0xff] %vm106_vm0, %v104_v59 }
  0xa1   :  { %110 = vst.msk [vmem:[%s202_s3 + $0x18] sm:$0xff] %vm106_vm0, %v105_v60 }

</bundles_post_ra>
